<compile_context>
chip_gen: v6e
topology: v6e:2x2x1
jax: 0.10.0
libtpu: 0.0.40
codegen_flags: <defaults>
</compile_context>

<pallas_src>
import functools

import jax
import jax.numpy as jnp
from jax.experimental import pallas as pl
from jax.experimental.pallas import tpu as pltpu


def _cdiv(a, b):
    return -(-a // b)


def _pick_cout_block(cout_p, cap=512):
    """Largest multiple of 128 that divides cout_p and is <= cap."""
    best = 128
    b = 128
    while b <= min(cout_p, cap):
        if cout_p % b == 0:
            best = b
        b += 128
    return best


def _apply_act(y, act):
    # Static (trace-time) dispatch; matches mmdet get_activation().
    if act == "silu":
        return y * jax.nn.sigmoid(y)
    if act == "relu":
        return jnp.maximum(y, 0.0)
    if act == "lrelu":
        return jnp.where(y >= 0.0, y, 0.1 * y)
    if act == "relu6":
        return jnp.clip(y, 0.0, 6.0)
    if act == "hardswish":
        return y * jnp.clip(y + 3.0, 0.0, 6.0) * (1.0 / 6.0)
    raise ValueError("Unsupported act type: {}".format(act))


# ----------------------------- Pallas kernel -------------------------------

def _conv_bn_act_kernel(x_ref, w_ref, scale_ref, shift_ref, o_ref, *,
                        k, stride, bh, Wo, Cin, bco, Hph, act):
    # x_ref:     (1, s*s*Hph, Wph, Cin)  phase-stacked padded NHWC image (bf16)
    # w_ref:     (k*k, Cin, bco)         conv weight taps (bf16)
    # scale_ref: (1, bco)                gamma / sqrt(var + eps)   (f32)
    # shift_ref: (1, bco)                beta - mean * scale       (f32)
    # o_ref:     (1, bh, Wo, bco)        output row/channel block
    h = pl.program_id(2)
    row0 = pl.multiple_of(h * bh, bh)
    m = bh * Wo

    acc = jnp.zeros((m, bco), jnp.float32)
    for di in range(k):                      # static k*k tap loop (unrolled)
        for dj in range(k):
            p = (di % stride) * stride + (dj % stride)   # phase index
            tap = x_ref[0,
                        pl.ds(p * Hph + row0 + di // stride, bh),
                        pl.ds(dj // stride, Wo), :]
            acc = acc + jnp.dot(tap.reshape(m, Cin), w_ref[di * k + dj],
                                preferred_element_type=jnp.float32)

    y = acc * scale_ref[...] + shift_ref[...]        # folded BN (eval mode)
    y = _apply_act(y, act)                           # activation (f32, EUP)
    o_ref[...] = y.reshape(1, bh, Wo, bco).astype(o_ref.dtype)


# ------------------------------ wrapper -------------------------------------

def base_conv_forward(x, conv_weight, bn_gamma, bn_beta, bn_mean, bn_var, *,
                      ksize, stride, eps=1e-5, act="silu", block_rows=None,
                      out_layout="NCHW"):
    """BaseConv.forward semantics (BatchNorm2d in eval mode), NCHW in/out."""
    # TODO(synk): groups > 1 (grouped / depthwise conv) is not implemented.
    N, Cin, H, W = map(int, x.shape)
    Cout = int(conv_weight.shape[0])
    k = int(ksize)
    s = int(stride)
    pad = (k - 1) // 2
    Ho = (H + 2 * pad - k) // s + 1
    Wo = (W + 2 * pad - k) // s + 1

    # Output-row block: aim for ~512 matmul rows (bh * Wo) per grid step.
    if block_rows is None:
        block_rows = max(1, min(Ho, 512 // max(Wo, 1)))
    bh = max(1, min(int(block_rows), Ho))
    bh = _cdiv(Ho, _cdiv(Ho, bh))           # balance the last (ragged) block
    n_h = _cdiv(Ho, bh)
    Ho_pad = n_h * bh

    Cout_p = _cdiv(Cout, 128) * 128         # lane-dense output stores
    bco = _pick_cout_block(Cout_p)          # Cout tile (bounds weight VMEM)
    n_co = Cout_p // bco

    # --- phase-decomposed, zero-padded NHWC input (bf16 MXU operand) ---------
    # Phase (pi, pj) holds x_p[:, pi::s, pj::s, :]; tap (di, dj) then reads a
    # *contiguous* slab of phase (di%s, dj%s) -> no strided VMEM loads.
    Hph = Ho_pad + (k - 1) // s
    Wph = Wo + (k - 1) // s
    x_nhwc = jnp.transpose(x.astype(jnp.bfloat16), (0, 2, 3, 1))
    x_p = jnp.pad(x_nhwc, ((0, 0), (pad, pad), (pad, pad), (0, 0)))
    phases = []
    for pi in range(s):
        for pj in range(s):
            ph = x_p[:, pi::s, pj::s, :][:, :Hph, :Wph, :]
            ph = jnp.pad(ph, ((0, 0), (0, Hph - ph.shape[1]),
                              (0, Wph - ph.shape[2]), (0, 0)))
            phases.append(ph)
    x_ph = jnp.concatenate(phases, axis=1) if len(phases) > 1 else phases[0]
    # x_ph: (N, s*s*Hph, Wph, Cin)
    # TODO(synk): for very large H*W*Cin, row-block the input with a halo
    # (manual DMA) instead of keeping the full phase image in VMEM.

    # (Cout, Cin, k, k) -> (k*k, Cin, Cout_p), bf16.
    w = jnp.transpose(conv_weight, (2, 3, 1, 0)).reshape(k * k, Cin, Cout)
    w = jnp.pad(w, ((0, 0), (0, 0), (0, Cout_p - Cout))).astype(jnp.bfloat16)

    # Folded eval-mode BatchNorm.
    scale = (bn_gamma / jnp.sqrt(bn_var + eps)).astype(jnp.float32)
    shift = (bn_beta.astype(jnp.float32)
             - bn_mean.astype(jnp.float32) * scale)
    scale = jnp.pad(scale, (0, Cout_p - Cout)).reshape(1, Cout_p)
    shift = jnp.pad(shift, (0, Cout_p - Cout)).reshape(1, Cout_p)

    kernel = functools.partial(_conv_bn_act_kernel, k=k, stride=s, bh=bh,
                               Wo=Wo, Cin=Cin, bco=bco, Hph=Hph, act=act)

    cost = pl.CostEstimate(
        flops=2 * N * Ho_pad * Wo * Cin * k * k * Cout_p,
        transcendentals=N * Ho_pad * Wo * Cout_p,
        bytes_accessed=(N * s * s * Hph * Wph * Cin * 2
                        + k * k * Cin * Cout_p * 2
                        + 2 * Cout_p * 4
                        + N * Ho_pad * Wo * Cout_p * 4),
    )

    out = pl.pallas_call(
        kernel,
        out_shape=jax.ShapeDtypeStruct((N, Ho_pad, Wo, Cout_p), jnp.float32),
        grid_spec=pltpu.PrefetchScalarGridSpec(
            num_scalar_prefetch=0,
            grid=(N, n_co, n_h),
            in_specs=[
                # Whole phase-stacked image per n: block index changes only
                # with n, so it is DMA'd once per image and stays resident in
                # VMEM across all (co, h) steps.
                pl.BlockSpec((1, s * s * Hph, Wph, Cin),
                             lambda n, co, h: (n, 0, 0, 0)),
                # Weights tiled along Cout; co is the middle grid axis so the
                # weight DMA is reissued only when co changes.
                pl.BlockSpec((k * k, Cin, bco), lambda n, co, h: (0, 0, co)),
                pl.BlockSpec((1, bco), lambda n, co, h: (0, co)),
                pl.BlockSpec((1, bco), lambda n, co, h: (0, co)),
            ],
            out_specs=pl.BlockSpec((1, bh, Wo, bco),
                                   lambda n, co, h: (n, h, 0, co)),
        ),
        compiler_params=pltpu.CompilerParams(
            dimension_semantics=("parallel", "parallel", "parallel")),
        cost_estimate=cost,
    )(x_ph, w, scale, shift)

    out = out[:, :Ho, :, :Cout]             # drop row / channel padding
    if out_layout == "NHWC":
        return out
    return jnp.transpose(out, (0, 3, 1, 2))  # NCHW, matches the PyTorch module


# ------------------------------- reference ----------------------------------

def _reference(x, conv_weight, bn_gamma, bn_beta, bn_mean, bn_var, *,
               ksize, stride, eps=1e-5):
    pad = (ksize - 1) // 2
    y = jax.lax.conv_general_dilated(
        x, conv_weight,
        window_strides=(stride, stride),
        padding=((pad, pad), (pad, pad)),
        dimension_numbers=("NCHW", "OIHW", "NCHW"))
    inv = bn_gamma / jnp.sqrt(bn_var + eps)
    y = y * inv.reshape(1, -1, 1, 1) + (bn_beta - bn_mean * inv).reshape(
        1, -1, 1, 1)
    return y * jax.nn.sigmoid(y)


# --------------------------------- main --------------------------------------

if __name__ == "__main__":
    key = jax.random.PRNGKey(0)
    k_x, k_w1, k_w2, k_g, k_b, k_m, k_v = jax.random.split(key, 7)

    N, Cin, H, W = 2, 4, 16, 16
    Cout = 8

    x = jax.random.normal(k_x, (N, Cin, H, W), dtype=jnp.float32)
    w1 = jax.random.normal(k_w1, (Cout, Cin, 3, 3), dtype=jnp.float32) * 0.1
    w2 = jax.random.normal(k_w2, (Cout, Cin, 3, 3), dtype=jnp.float32) * 0.1
    bn_gamma = 1.0 + 0.1 * jax.random.normal(k_g, (Cout,), dtype=jnp.float32)
    bn_beta = 0.1 * jax.random.normal(k_b, (Cout,), dtype=jnp.float32)
    bn_mean = 0.1 * jax.random.normal(k_m, (Cout,), dtype=jnp.float32)
    bn_var = jnp.abs(1.0 + 0.1 * jax.random.normal(
        k_v, (Cout,), dtype=jnp.float32))

    # Case 1: BaseConv(4, 8, ksize=3, stride=1) -- 3x3 same-size conv.
    out1 = jax.block_until_ready(
        base_conv_forward(x, w1, bn_gamma, bn_beta, bn_mean, bn_var,
                          ksize=3, stride=1))
    ref1 = _reference(x, w1, bn_gamma, bn_beta, bn_mean, bn_var,
                      ksize=3, stride=1)
    assert out1.shape == (N, Cout, H, W), out1.shape
    err1 = float(jnp.max(jnp.abs(out1 - ref1)))
    # bf16 matmul operands with f32 accumulation -> loosened tolerance.
    assert err1 < 2e-2, err1

    # Case 2: BaseConv(4, 8, ksize=3, stride=2) -- downsampling conv,
    # exercises the phase-decomposed strided path.
    out2 = jax.block_until_ready(
        base_conv_forward(x, w2, bn_gamma, bn_beta, bn_mean, bn_var,
                          ksize=3, stride=2))
    ref2 = _reference(x, w2, bn_gamma, bn_beta, bn_mean, bn_var,
                      ksize=3, stride=2)
    assert out2.shape == (N, Cout, H // 2, W // 2), out2.shape
    err2 = float(jnp.max(jnp.abs(out2 - ref2)))
    assert err2 < 2e-2, err2

    print("KERNEL_OK")
</pallas_src>

<mosaic_0001>
module attributes {stable_mosaic.version = 11 : i64} {
  func.func @_conv_bn_act_kernel(%arg0: i32, %arg1: i32, %arg2: i32, %arg3: memref<1x18x18x4xbf16, #tpu.memory_space<vmem>>, %arg4: memref<9x4x128xbf16, #tpu.memory_space<vmem>>, %arg5: memref<1x128xf32, #tpu.memory_space<vmem>>, %arg6: memref<1x128xf32, #tpu.memory_space<vmem>>, %arg7: memref<1x16x16x128xf32, #tpu.memory_space<vmem>>) attributes {dimension_semantics = [#tpu.dimension_semantics<parallel>, #tpu.dimension_semantics<parallel>, #tpu.dimension_semantics<parallel>], iteration_bounds = array<i64: 2, 1, 1>, scalar_prefetch = 0 : i64, scratch_operands = 0 : i64, tpu.core_type = #tpu.core_type<tc>, window_params = [{transform_indices = @transform_0, window_bounds = array<i64: 1, 18, 18, 4>}, {transform_indices = @transform_1, window_bounds = array<i64: 9, 4, 128>}, {transform_indices = @transform_2, window_bounds = array<i64: 1, 128>}, {transform_indices = @transform_3, window_bounds = array<i64: 1, 128>}, {transform_indices = @transform_4, window_bounds = array<i64: 1, 16, 16, 128>}]} {
    %c16_i32 = arith.constant 16 : i32
    %0 = arith.muli %arg2, %c16_i32 : i32
    %1 = tpu.assume_multiple %0, 16 : i32
    %cst = arith.constant 0.000000e+00 : f32
    %2 = vector.broadcast %cst : f32 to vector<256x128xf32>
    %c0_i32 = arith.constant 0 : i32
    %3 = arith.addi %c0_i32, %1 : i32
    %c0_i32_0 = arith.constant 0 : i32
    %4 = arith.addi %3, %c0_i32_0 : i32
    %c0 = arith.constant 0 : index
    %5 = arith.index_cast %4 : i32 to index
    %c0_1 = arith.constant 0 : index
    %c0_2 = arith.constant 0 : index
    %6 = vector.load %arg3[%c0, %5, %c0_1, %c0_2] : memref<1x18x18x4xbf16, #tpu.memory_space<vmem>>, vector<1x16x16x4xbf16>
    %7 = vector.shape_cast %6 : vector<1x16x16x4xbf16> to vector<16x16x4xbf16>
    %8 = vector.shape_cast %7 : vector<16x16x4xbf16> to vector<256x4xbf16>
    %c0_3 = arith.constant 0 : index
    %c0_4 = arith.constant 0 : index
    %c0_5 = arith.constant 0 : index
    %9 = vector.load %arg4[%c0_3, %c0_4, %c0_5] : memref<9x4x128xbf16, #tpu.memory_space<vmem>>, vector<1x4x128xbf16>
    %10 = vector.shape_cast %9 : vector<1x4x128xbf16> to vector<4x128xbf16>
    %cst_6 = arith.constant dense<0.000000e+00> : vector<256x128xf32>
    %11 = tpu.matmul %8, %10, %cst_6 {dimension_numbers = #tpu.dot_dimension_numbers<[1], [0], [0], [1], [0, 0, 1, 1], [], []>} : vector<256x4xbf16>, vector<4x128xbf16>, vector<256x128xf32> -> vector<256x128xf32>
    %12 = arith.addf %2, %11 : vector<256x128xf32>
    %c0_i32_7 = arith.constant 0 : i32
    %13 = arith.addi %c0_i32_7, %1 : i32
    %c0_i32_8 = arith.constant 0 : i32
    %14 = arith.addi %13, %c0_i32_8 : i32
    %c0_9 = arith.constant 0 : index
    %15 = arith.index_cast %14 : i32 to index
    %c1 = arith.constant 1 : index
    %c0_10 = arith.constant 0 : index
    %16 = vector.load %arg3[%c0_9, %15, %c1, %c0_10] : memref<1x18x18x4xbf16, #tpu.memory_space<vmem>>, vector<1x16x16x4xbf16>
    %17 = vector.shape_cast %16 : vector<1x16x16x4xbf16> to vector<16x16x4xbf16>
    %18 = vector.shape_cast %17 : vector<16x16x4xbf16> to vector<256x4xbf16>
    %c1_11 = arith.constant 1 : index
    %c0_12 = arith.constant 0 : index
    %c0_13 = arith.constant 0 : index
    %19 = vector.load %arg4[%c1_11, %c0_12, %c0_13] : memref<9x4x128xbf16, #tpu.memory_space<vmem>>, vector<1x4x128xbf16>
    %20 = vector.shape_cast %19 : vector<1x4x128xbf16> to vector<4x128xbf16>
    %cst_14 = arith.constant dense<0.000000e+00> : vector<256x128xf32>
    %21 = tpu.matmul %18, %20, %cst_14 {dimension_numbers = #tpu.dot_dimension_numbers<[1], [0], [0], [1], [0, 0, 1, 1], [], []>} : vector<256x4xbf16>, vector<4x128xbf16>, vector<256x128xf32> -> vector<256x128xf32>
    %22 = arith.addf %12, %21 : vector<256x128xf32>
    %c0_i32_15 = arith.constant 0 : i32
    %23 = arith.addi %c0_i32_15, %1 : i32
    %c0_i32_16 = arith.constant 0 : i32
    %24 = arith.addi %23, %c0_i32_16 : i32
    %c0_17 = arith.constant 0 : index
    %25 = arith.index_cast %24 : i32 to index
    %c2 = arith.constant 2 : index
    %c0_18 = arith.constant 0 : index
    %26 = vector.load %arg3[%c0_17, %25, %c2, %c0_18] : memref<1x18x18x4xbf16, #tpu.memory_space<vmem>>, vector<1x16x16x4xbf16>
    %27 = vector.shape_cast %26 : vector<1x16x16x4xbf16> to vector<16x16x4xbf16>
    %28 = vector.shape_cast %27 : vector<16x16x4xbf16> to vector<256x4xbf16>
    %c2_19 = arith.constant 2 : index
    %c0_20 = arith.constant 0 : index
    %c0_21 = arith.constant 0 : index
    %29 = vector.load %arg4[%c2_19, %c0_20, %c0_21] : memref<9x4x128xbf16, #tpu.memory_space<vmem>>, vector<1x4x128xbf16>
    %30 = vector.shape_cast %29 : vector<1x4x128xbf16> to vector<4x128xbf16>
    %cst_22 = arith.constant dense<0.000000e+00> : vector<256x128xf32>
    %31 = tpu.matmul %28, %30, %cst_22 {dimension_numbers = #tpu.dot_dimension_numbers<[1], [0], [0], [1], [0, 0, 1, 1], [], []>} : vector<256x4xbf16>, vector<4x128xbf16>, vector<256x128xf32> -> vector<256x128xf32>
    %32 = arith.addf %22, %31 : vector<256x128xf32>
    %c0_i32_23 = arith.constant 0 : i32
    %33 = arith.addi %c0_i32_23, %1 : i32
    %c1_i32 = arith.constant 1 : i32
    %34 = arith.addi %33, %c1_i32 : i32
    %c0_24 = arith.constant 0 : index
    %35 = arith.index_cast %34 : i32 to index
    %c0_25 = arith.constant 0 : index
    %c0_26 = arith.constant 0 : index
    %36 = vector.load %arg3[%c0_24, %35, %c0_25, %c0_26] : memref<1x18x18x4xbf16, #tpu.memory_space<vmem>>, vector<1x16x16x4xbf16>
    %37 = vector.shape_cast %36 : vector<1x16x16x4xbf16> to vector<16x16x4xbf16>
    %38 = vector.shape_cast %37 : vector<16x16x4xbf16> to vector<256x4xbf16>
    %c3 = arith.constant 3 : index
    %c0_27 = arith.constant 0 : index
    %c0_28 = arith.constant 0 : index
    %39 = vector.load %arg4[%c3, %c0_27, %c0_28] : memref<9x4x128xbf16, #tpu.memory_space<vmem>>, vector<1x4x128xbf16>
    %40 = vector.shape_cast %39 : vector<1x4x128xbf16> to vector<4x128xbf16>
    %cst_29 = arith.constant dense<0.000000e+00> : vector<256x128xf32>
    %41 = tpu.matmul %38, %40, %cst_29 {dimension_numbers = #tpu.dot_dimension_numbers<[1], [0], [0], [1], [0, 0, 1, 1], [], []>} : vector<256x4xbf16>, vector<4x128xbf16>, vector<256x128xf32> -> vector<256x128xf32>
    %42 = arith.addf %32, %41 : vector<256x128xf32>
    %c0_i32_30 = arith.constant 0 : i32
    %43 = arith.addi %c0_i32_30, %1 : i32
    %c1_i32_31 = arith.constant 1 : i32
    %44 = arith.addi %43, %c1_i32_31 : i32
    %c0_32 = arith.constant 0 : index
    %45 = arith.index_cast %44 : i32 to index
    %c1_33 = arith.constant 1 : index
    %c0_34 = arith.constant 0 : index
    %46 = vector.load %arg3[%c0_32, %45, %c1_33, %c0_34] : memref<1x18x18x4xbf16, #tpu.memory_space<vmem>>, vector<1x16x16x4xbf16>
    %47 = vector.shape_cast %46 : vector<1x16x16x4xbf16> to vector<16x16x4xbf16>
    %48 = vector.shape_cast %47 : vector<16x16x4xbf16> to vector<256x4xbf16>
    %c4 = arith.constant 4 : index
    %c0_35 = arith.constant 0 : index
    %c0_36 = arith.constant 0 : index
    %49 = vector.load %arg4[%c4, %c0_35, %c0_36] : memref<9x4x128xbf16, #tpu.memory_space<vmem>>, vector<1x4x128xbf16>
    %50 = vector.shape_cast %49 : vector<1x4x128xbf16> to vector<4x128xbf16>
    %cst_37 = arith.constant dense<0.000000e+00> : vector<256x128xf32>
    %51 = tpu.matmul %48, %50, %cst_37 {dimension_numbers = #tpu.dot_dimension_numbers<[1], [0], [0], [1], [0, 0, 1, 1], [], []>} : vector<256x4xbf16>, vector<4x128xbf16>, vector<256x128xf32> -> vector<256x128xf32>
    %52 = arith.addf %42, %51 : vector<256x128xf32>
    %c0_i32_38 = arith.constant 0 : i32
    %53 = arith.addi %c0_i32_38, %1 : i32
    %c1_i32_39 = arith.constant 1 : i32
    %54 = arith.addi %53, %c1_i32_39 : i32
    %c0_40 = arith.constant 0 : index
    %55 = arith.index_cast %54 : i32 to index
    %c2_41 = arith.constant 2 : index
    %c0_42 = arith.constant 0 : index
    %56 = vector.load %arg3[%c0_40, %55, %c2_41, %c0_42] : memref<1x18x18x4xbf16, #tpu.memory_space<vmem>>, vector<1x16x16x4xbf16>
    %57 = vector.shape_cast %56 : vector<1x16x16x4xbf16> to vector<16x16x4xbf16>
    %58 = vector.shape_cast %57 : vector<16x16x4xbf16> to vector<256x4xbf16>
    %c5 = arith.constant 5 : index
    %c0_43 = arith.constant 0 : index
    %c0_44 = arith.constant 0 : index
    %59 = vector.load %arg4[%c5, %c0_43, %c0_44] : memref<9x4x128xbf16, #tpu.memory_space<vmem>>, vector<1x4x128xbf16>
    %60 = vector.shape_cast %59 : vector<1x4x128xbf16> to vector<4x128xbf16>
    %cst_45 = arith.constant dense<0.000000e+00> : vector<256x128xf32>
    %61 = tpu.matmul %58, %60, %cst_45 {dimension_numbers = #tpu.dot_dimension_numbers<[1], [0], [0], [1], [0, 0, 1, 1], [], []>} : vector<256x4xbf16>, vector<4x128xbf16>, vector<256x128xf32> -> vector<256x128xf32>
    %62 = arith.addf %52, %61 : vector<256x128xf32>
    %c0_i32_46 = arith.constant 0 : i32
    %63 = arith.addi %c0_i32_46, %1 : i32
    %c2_i32 = arith.constant 2 : i32
    %64 = arith.addi %63, %c2_i32 : i32
    %c0_47 = arith.constant 0 : index
    %65 = arith.index_cast %64 : i32 to index
    %c0_48 = arith.constant 0 : index
    %c0_49 = arith.constant 0 : index
    %66 = vector.load %arg3[%c0_47, %65, %c0_48, %c0_49] : memref<1x18x18x4xbf16, #tpu.memory_space<vmem>>, vector<1x16x16x4xbf16>
    %67 = vector.shape_cast %66 : vector<1x16x16x4xbf16> to vector<16x16x4xbf16>
    %68 = vector.shape_cast %67 : vector<16x16x4xbf16> to vector<256x4xbf16>
    %c6 = arith.constant 6 : index
    %c0_50 = arith.constant 0 : index
    %c0_51 = arith.constant 0 : index
    %69 = vector.load %arg4[%c6, %c0_50, %c0_51] : memref<9x4x128xbf16, #tpu.memory_space<vmem>>, vector<1x4x128xbf16>
    %70 = vector.shape_cast %69 : vector<1x4x128xbf16> to vector<4x128xbf16>
    %cst_52 = arith.constant dense<0.000000e+00> : vector<256x128xf32>
    %71 = tpu.matmul %68, %70, %cst_52 {dimension_numbers = #tpu.dot_dimension_numbers<[1], [0], [0], [1], [0, 0, 1, 1], [], []>} : vector<256x4xbf16>, vector<4x128xbf16>, vector<256x128xf32> -> vector<256x128xf32>
    %72 = arith.addf %62, %71 : vector<256x128xf32>
    %c0_i32_53 = arith.constant 0 : i32
    %73 = arith.addi %c0_i32_53, %1 : i32
    %c2_i32_54 = arith.constant 2 : i32
    %74 = arith.addi %73, %c2_i32_54 : i32
    %c0_55 = arith.constant 0 : index
    %75 = arith.index_cast %74 : i32 to index
    %c1_56 = arith.constant 1 : index
    %c0_57 = arith.constant 0 : index
    %76 = vector.load %arg3[%c0_55, %75, %c1_56, %c0_57] : memref<1x18x18x4xbf16, #tpu.memory_space<vmem>>, vector<1x16x16x4xbf16>
    %77 = vector.shape_cast %76 : vector<1x16x16x4xbf16> to vector<16x16x4xbf16>
    %78 = vector.shape_cast %77 : vector<16x16x4xbf16> to vector<256x4xbf16>
    %c7 = arith.constant 7 : index
    %c0_58 = arith.constant 0 : index
    %c0_59 = arith.constant 0 : index
    %79 = vector.load %arg4[%c7, %c0_58, %c0_59] : memref<9x4x128xbf16, #tpu.memory_space<vmem>>, vector<1x4x128xbf16>
    %80 = vector.shape_cast %79 : vector<1x4x128xbf16> to vector<4x128xbf16>
    %cst_60 = arith.constant dense<0.000000e+00> : vector<256x128xf32>
    %81 = tpu.matmul %78, %80, %cst_60 {dimension_numbers = #tpu.dot_dimension_numbers<[1], [0], [0], [1], [0, 0, 1, 1], [], []>} : vector<256x4xbf16>, vector<4x128xbf16>, vector<256x128xf32> -> vector<256x128xf32>
    %82 = arith.addf %72, %81 : vector<256x128xf32>
    %c0_i32_61 = arith.constant 0 : i32
    %83 = arith.addi %c0_i32_61, %1 : i32
    %c2_i32_62 = arith.constant 2 : i32
    %84 = arith.addi %83, %c2_i32_62 : i32
    %c0_63 = arith.constant 0 : index
    %85 = arith.index_cast %84 : i32 to index
    %c2_64 = arith.constant 2 : index
    %c0_65 = arith.constant 0 : index
    %86 = vector.load %arg3[%c0_63, %85, %c2_64, %c0_65] : memref<1x18x18x4xbf16, #tpu.memory_space<vmem>>, vector<1x16x16x4xbf16>
    %87 = vector.shape_cast %86 : vector<1x16x16x4xbf16> to vector<16x16x4xbf16>
    %88 = vector.shape_cast %87 : vector<16x16x4xbf16> to vector<256x4xbf16>
    %c8 = arith.constant 8 : index
    %c0_66 = arith.constant 0 : index
    %c0_67 = arith.constant 0 : index
    %89 = vector.load %arg4[%c8, %c0_66, %c0_67] : memref<9x4x128xbf16, #tpu.memory_space<vmem>>, vector<1x4x128xbf16>
    %90 = vector.shape_cast %89 : vector<1x4x128xbf16> to vector<4x128xbf16>
    %cst_68 = arith.constant dense<0.000000e+00> : vector<256x128xf32>
    %91 = tpu.matmul %88, %90, %cst_68 {dimension_numbers = #tpu.dot_dimension_numbers<[1], [0], [0], [1], [0, 0, 1, 1], [], []>} : vector<256x4xbf16>, vector<4x128xbf16>, vector<256x128xf32> -> vector<256x128xf32>
    %92 = arith.addf %82, %91 : vector<256x128xf32>
    %c0_69 = arith.constant 0 : index
    %c0_70 = arith.constant 0 : index
    %93 = vector.load %arg5[%c0_69, %c0_70] : memref<1x128xf32, #tpu.memory_space<vmem>>, vector<1x128xf32>
    %94 = vector.broadcast %93 : vector<1x128xf32> to vector<256x128xf32>
    %95 = arith.mulf %92, %94 : vector<256x128xf32>
    %c0_71 = arith.constant 0 : index
    %c0_72 = arith.constant 0 : index
    %96 = vector.load %arg6[%c0_71, %c0_72] : memref<1x128xf32, #tpu.memory_space<vmem>>, vector<1x128xf32>
    %97 = vector.broadcast %96 : vector<1x128xf32> to vector<256x128xf32>
    %98 = arith.addf %95, %97 : vector<256x128xf32>
    %99 = arith.negf %98 : vector<256x128xf32>
    %100 = math.exp %99 : vector<256x128xf32>
    %cst_73 = arith.constant 1.000000e+00 : f32
    %101 = vector.broadcast %cst_73 : f32 to vector<256x128xf32>
    %102 = arith.addf %101, %100 : vector<256x128xf32>
    %103 = arith.divf %101, %102 : vector<256x128xf32>
    %104 = arith.mulf %98, %103 : vector<256x128xf32>
    %105 = vector.shape_cast %104 : vector<256x128xf32> to vector<1x16x16x128xf32>
    %c0_74 = arith.constant 0 : index
    %c0_75 = arith.constant 0 : index
    %c0_76 = arith.constant 0 : index
    %c0_77 = arith.constant 0 : index
    %106 = vector.load %arg7[%c0_74, %c0_75, %c0_76, %c0_77] : memref<1x16x16x128xf32, #tpu.memory_space<vmem>>, vector<1x16x16x128xf32>
    tpu.vector_store %arg7[%c0_74, %c0_75, %c0_76, %c0_77], %105 {strides = array<i32>} : memref<1x16x16x128xf32, #tpu.memory_space<vmem>>, vector<1x16x16x128xf32>,
    return
  }
  func.func @transform_0(%arg0: i32, %arg1: i32, %arg2: i32) -> (i32, i32, i32, i32) {
    %c0_i32 = arith.constant 0 : i32
    %c0_i32_0 = arith.constant 0 : i32
    %c0_i32_1 = arith.constant 0 : i32
    %c0_i32_2 = arith.constant 0 : i32
    return %arg0, %c0_i32, %c0_i32_0, %c0_i32_1 : i32, i32, i32, i32
  }
  func.func @transform_1(%arg0: i32, %arg1: i32, %arg2: i32) -> (i32, i32, i32) {
    %c0_i32 = arith.constant 0 : i32
    %c0_i32_0 = arith.constant 0 : i32
    %c0_i32_1 = arith.constant 0 : i32
    return %c0_i32, %c0_i32_0, %arg1 : i32, i32, i32
  }
  func.func @transform_2(%arg0: i32, %arg1: i32, %arg2: i32) -> (i32, i32) {
    %c0_i32 = arith.constant 0 : i32
    %c0_i32_0 = arith.constant 0 : i32
    return %c0_i32, %arg1 : i32, i32
  }
  func.func @transform_3(%arg0: i32, %arg1: i32, %arg2: i32) -> (i32, i32) {
    %c0_i32 = arith.constant 0 : i32
    %c0_i32_0 = arith.constant 0 : i32
    return %c0_i32, %arg1 : i32, i32
  }
  func.func @transform_4(%arg0: i32, %arg1: i32, %arg2: i32) -> (i32, i32, i32, i32) {
    %c0_i32 = arith.constant 0 : i32
    %c0_i32_0 = arith.constant 0 : i32
    return %arg0, %arg2, %c0_i32, %arg1 : i32, i32, i32, i32
  }
}

</mosaic_0001>

<bundles_post_ra>
// kernel: tpu_custom_call.1
= control target key start
LH: loop header
LB: loop body
LE: loop exit
PB: predicated region body
PF: predicated region fallthrough
CT: control target
= control target key end

     0   :  { %9 = vsyncpa [#allocation3], 0  ;;  %s9629_s0 = inlined_call_operand.vmem [shape: bf16[2,18,18,4], index: 0, kind: input, shape index: {}]   ;;  %s9630_s1 = inlined_call_operand.vmem [shape: bf16[9,4,128], index: 1, kind: input, shape index: {}]   ;;  %s9631_s2 = inlined_call_operand.vmem [shape: f32[1,128], index: 2, kind: input, shape index: {}]   ;;  %s9632_s3 = inlined_call_operand.vmem [shape: f32[1,128], index: 3, kind: input, shape index: {}]   ;;  %s9633_s4 = inlined_call_operand.hbm [shape: f32[2,16,16,128], index: 4, kind: output, shape index: {}]  }
   0x1   :  { %11 = vsyncpa [#allocation3 + $0x1], 0  ;;  %s6712_s15 = smov 0   ;;  %s6714_s16 = smov 0  }
   0x2   :  { %s6716_s17 = smov 0   ;;  %s6718_s18 = smov 0  }
   0x3   :  { %s6720_s19 = smov 0   ;;  %s6722_s20 = smov 0  }
   0x4 LB: > { %s5313_s21 = sadd.s32 4294967295, %s6682_s20   ;;  %s5314_s22 = sadd.s32 4294967294, %s6682_s20   ;;  %s6682_s20 = sphi %s6722_s20, %s17_s20   ;;  %s6678_s19 = sphi %s6720_s19, %s9884_s19   ;;  %s6674_s18 = sphi %s6718_s18, %s9883_s18   ;;  %s6670_s17 = sphi %s6716_s17, %s9882_s17   ;;  %s6666_s16 = sphi %s6714_s16, %s9881_s16   ;;  %s6662_s15 = sphi %s6712_s15, %s9880_s15  }
   0x5   : > { %s36_s23 = sadd.s32 1, %s6678_s19  ;;  %s151_s24 = sadd.s32 1, %s6670_s17 }
   0x6   : > { %p38_p0 = scmp.ge.s32.totalorder %s36_s23, 2  ;;  %p161_p1 = scmp.ne.s32.totalorder %s6670_s17, %s6666_s16 }
   0x7   : > { %p162_p2 = scmp.eq.s32.totalorder %s5313_s21, 1  ;;  %p167_p3 = scmp.ne.s32.totalorder %s6666_s16, %s6662_s15 }
   0x8   : > { %s9886_s23 = smov (%p38_p0, %s36_s23), 0  ;;  %p168_p5 = scmp.eq.s32.totalorder %s5314_s22, 1 }
   0x9   : > { %p6752_p4 = por %p162_p2, %p161_p1  ;;  %s144_s26 = ssub.s32 %s6678_s19, %s9886_s23 }
   0xa   : > { %p5320_p6 = scmp.ge.s32.totalorder %s6682_s20, 1  ;;  %p149_p7 = scmp.eq.s32.totalorder %s144_s26, 0 }
   0xb   : > { %p6759_p8 = por %p168_p5, %p167_p3  ;;  %p213_p9 = scmp.lt.s32.totalorder %s6682_s20, 3 }
   0xc   : > { %s6765_s28 = scalar_select %p149_p7, %s6670_s17, %s151_s24  }
   0xd   : > { %p214_p10 = pnand %p5320_p6, %p213_p9 }
   0xf   : > { %217 = sbr.rel (%p214_p10) target bundleno = 619 (0x26b), region = 36 }
  0x14   : > { %v5323_v0 = vld [vmem:[%s9630_s1 + $0x2] sm:$0x3]  ;;  %vm805_vm0 = vcmask 1041408   ;;  %p249_p11 = scmp.lt.s32.totalorder %s6674_s18, 1  ;;  %v302_v2 = vld [vmem:[%s9630_s1] sm:$0x3] }
  0x15   : > { %6361 = vmatprep.subr.msk.bf16.mxu1 %vm805_vm0, %v5323_v0  ;;  %6360 = vmatprep.subr.msk.bf16.mxu0 %vm805_vm0, %v5323_v0  ;;  %v807_v1 = vsel %vm805_vm0, %v5323_v0, 0  ;;  %v5404_v3 = vld [vmem:[%s9630_s1 + $0x4] sm:$0x3]  ;;  %vm319_vm1 = vsmask.f32 3328  ;;  %v6789_v4 = vsel %vm805_vm0, %v302_v2, 0 }
  0x16   : > { %6359 = vmatpush3.bf16.msra.mxu1 %v807_v1  ;;  %6053 = vmatpush3.bf16.msra.mxu0 %v807_v1  ;;  %s250_s7 = scalar_select %p249_p11, %s6674_s18, 1  ;;  %vm320_vm2 = vsmask.f32 7440  ;;  %vm756_vm3 = vcmask 31744   ;;  %v6815_v16 = vsel %vm805_vm0, %v5404_v3, 0  ;;  %vm1310_vm5 = vcmask 1042432  }
  0x17   : > { %6362 = vmatprep.subr.msk.bf16.mxu1 %vm805_vm0, %v302_v2  ;;  %6363 = vmatprep.subr.msk.bf16.mxu0 %vm805_vm0, %v5404_v3  ;;  %vm6830_vm4 = vmor %vm319_vm1, %vm320_vm2  ;;  %vm1311_vm6 = vcmask 1046532   ;;  %s246_s14 = sand.u32 1, %s6666_s16   ;;  %s5898_s24 = sshll.u32 %s6674_s18, 12 }
  0x18   : > { %s6370_s10 = smul.u32 216, %s250_s7  ;;  %vm7116_vm7 = vmor %vm1310_vm5, %vm1311_vm6  ;;  %s9406_s21 = sshll.u32 %s246_s14, 8 }
  0x19   : > { %s9427_s22 = scalar_lea.vmem [#allocation2], %s9406_s21  ;;  %s9575_s5 = scalar_lea.hbm %s9633_s4, %s5898_s24 }
  0x1a   : > { %s6786_s13 = scalar_lea.vmem %s9629_s0, %s6370_s10  ;;  %s5187_s26 = sshll.u32 %s9427_s22, 4  ;;  %s9577_s26 = int_to_ptr.vmem [resolvable:$true] %s5187_s26 }
  0x1b   : > { %v6792_v5 = vld [vmem:[%s6786_s13] sm:$0xf]  ;;  %v6795_v6 = vld [vmem:[%s6786_s13 + $0x4] sm:$0xf]  ;;  %v6798_v7 = vld [vmem:[%s6786_s13 + $0x8] sm:$0x1] }
  0x1c   : > { %v323_v8 = vshrl.u32 %v6792_v5, 16  ;;  %v326_v9 = vshll.u32 %v6792_v5, 16  ;;  %v332_v10 = vshll.u32 %v6795_v6, 16  ;;  %v336_v11 = vshrl.u32 %v6795_v6, 16  ;;  %v6805_v12 = vld [vmem:[%s6786_s13 + $0x60] sm:$0xf] }
  0x1d   : > { %v342_v13 = vshll.u32 %v6798_v7, 16  ;;  %v6809_v14 = vld [vmem:[%s6786_s13 + $0x64] sm:$0xf]  ;;  %v6812_v15 = vld [vmem:[%s6786_s13 + $0x68] sm:$0x1]  ;;  %v515_v22 = vshrl.u32 %v6805_v12, 16 }
  0x1e   : > { %v325_v17 = vrot.slane %v323_v8, 4  ;;  %v328_v18 = vrot.slane %v326_v9, 5  ;;  %v334_v19 = vrot.slane %v332_v10, 5  ;;  %v338_v20 = vrot.slane %v336_v11, 4  ;;  %v6823_v29 = vld [vmem:[%s6786_s13 + $0xc] sm:$0xf] }
  0x1f   : > { %v344_v21 = vrot.slane %v342_v13, 5  ;;  %v518_v23 = vshll.u32 %v6805_v12, 16  ;;  %v524_v24 = vshll.u32 %v6809_v14, 16  ;;  %v528_v27 = vshrl.u32 %v6809_v14, 16  ;;  %v6826_v30 = vld [vmem:[%s6786_s13 + $0x10] sm:$0xf] }
  0x20   : > { %v329_v25 = vor.u32 %v328_v18, %v325_v17  ;;  %v339_v26 = vor.u32 %v338_v20, %v334_v19  ;;  %v534_v28 = vshll.u32 %v6812_v15, 16  ;;  %v517_v33 = vrot.slane %v515_v22, 4  ;;  %v6836_v41 = vld [vmem:[%s6786_s13 + $0x14] sm:$0x1]  ;;  %v6847_v53 = vld [vmem:[%s6786_s13 + $0x6c] sm:$0xf] }
  0x21   : > { %v520_v34 = vrot.slane %v518_v23, 5  ;;  %v526_v35 = vrot.slane %v524_v24, 5  ;;  %v530_v38 = vrot.slane %v528_v27, 4  ;;  %v347_v42 = vshrl.u32 %v6823_v29, 16  ;;  %v6851_v58 = vld [vmem:[%s6786_s13 + $0x70] sm:$0xf] }
  0x22   : > { %v330_v36 = vrot.slane %v329_v25, 4  ;;  %v340_v37 = vrot.slane %v339_v26, 4  ;;  %v536_v39 = vrot.slane %v534_v28, 5  ;;  %v350_v43 = vshll.u32 %v6823_v29, 16  ;;  %v6859_v63 = vld [vmem:[%s6786_s13 + $0x74] sm:$0x1] }
  0x23   : > { %v521_v40 = vor.u32 %v520_v34, %v517_v33  ;;  %v356_v44 = vshll.u32 %v6826_v30, 16  ;;  %v531_v47 = vor.u32 %v530_v38, %v526_v35  ;;  %v360_v48 = vshrl.u32 %v6826_v30, 16  ;;  %v6865_v8 = vld [vmem:[%s6786_s13 + $0x18] sm:$0xf]  ;;  %v6878_v25 = vld [vmem:[%s6786_s13 + $0x20] sm:$0x1] }
  0x24   : > { %v335_v45 = vsel %vm6830_vm4, %v330_v36, %v334_v19  ;;  %v345_v46 = vsel %vm6830_vm4, %v340_v37, %v344_v21  ;;  %v349_v51 = vrot.slane %v347_v42, 4  ;;  %v352_v52 = vrot.slane %v350_v43, 5  ;;  %v6872_v21 = vld [vmem:[%s6786_s13 + $0x1c] sm:$0xf]  ;;  %s9584_s18 = scalar_lea.sflag [#allocation3], %s246_s14  ;;  %s6606_s6 = scalar_lea.vmem %s9577_s26, 4096 }
  0x25   : > { %v5324_v49 = vcombine.low %v335_v45, %v345_v46  ;;  %v522_v50 = vrot.slane %v521_v40, 4  ;;  %v532_v54 = vrot.slane %v531_v47, 4  ;;  %v358_v55 = vrot.slane %v356_v44, 5  ;;  %v6891_v40 = vld [vmem:[%s9630_s1 + $0x8] sm:$0x3]  ;;  %p6607_p12 = scmp.ne.s32.totalorder %s9577_s26, %s6606_s6  ;;  %s6684_s7 = smov [#allocation2]  }
  0x26   : > { %v362_v56 = vrot.slane %v360_v48, 4  ;;  %v366_v57 = vshll.u32 %v6836_v41, 16  ;;  %v353_v60 = vor.u32 %v352_v52, %v349_v51  ;;  %v539_v3 = vshrl.u32 %v6847_v53, 16  ;;  %v6896_v46 = vld [vmem:[%s6786_s13 + $0x7c] sm:$0xf]  ;;  %s6610_s8 = sshll.u32 %s6684_s7, 4  ;;  %s6611_s8 = int_to_ptr.vmem [resolvable:$false] %s6610_s8 }
  0x27   : > { %6054 = vmatprep.mubr.msk.bf16.mxu0 %vm756_vm3, %v5324_v49  ;;  %v527_v59 = vsel %vm6830_vm4, %v522_v50, %v526_v35  ;;  %v537_v0 = vsel %vm6830_vm4, %v532_v54, %v536_v39  ;;  %v542_v11 = vshll.u32 %v6847_v53, 16  ;;  %v548_v13 = vshll.u32 %v6851_v58, 16  ;;  %v6885_v35 = vld [vmem:[%s6786_s13 + $0x78] sm:$0xf]  ;;  %p6608_p13 = pnand %p6607_p12, %p6752_p4  ;;  %s6612_s9 = scalar_lea.vmem %s6611_s8, 8192 }
  0x28   : > { %v363_v1 = vor.u32 %v362_v56, %v358_v55  ;;  %v368_v2 = vrot.slane %v366_v57, 5  ;;  %v5332_v9 = vcombine.low %v527_v59, %v537_v0  ;;  %v354_v10 = vrot.slane %v353_v60, 4  ;;  %v6903_v56 = vld [vmem:[%s6786_s13 + $0x80] sm:$0x1]  ;;  %p6613_p1 = scmp.lt.s32.totalorder %s9577_s26, %s6611_s8  ;;  %p6614_p2 = scmp.lt.s32.totalorder %s6612_s9, %s6606_s6 }
  0x29   : > { %v541_v18 = vrot.slane %v539_v3, 4  ;;  %v552_v19 = vshrl.u32 %v6851_v58, 16  ;;  %v558_v20 = vshll.u32 %v6859_v63, 16  ;;  %v544_v23 = vrot.slane %v542_v11, 5  ;;  %9671 = vst [vmem:[#allocation5_spill] sm:$0xff] %v6903_v56  ;;  %p6609_p0 = pneg %p6608_p13 }
  0x2a   : > { %v364_v17 = vrot.slane %v363_v1, 4  ;;  %6070 = vmatprep.mubr.msk.bf16.mxu1 %vm756_vm3, %v5332_v9  ;;  %v359_v22 = vsel %vm6830_vm4, %v354_v10, %v358_v55  ;;  %v550_v24 = vrot.slane %v548_v13, 5  ;;  %v371_v26 = vshrl.u32 %v6865_v8, 16  ;;  %v6909_v1 = vld [vmem:[%s6786_s13 + $0x24] sm:$0xf]  ;;  %p6615_p3 = por %p6614_p2, %p6613_p1 }
  0x2b   : > { %v554_v28 = vrot.slane %v552_v19, 4  ;;  %v560_v33 = vrot.slane %v558_v20, 5  ;;  %v374_v34 = vshll.u32 %v6865_v8, 16  ;;  %v545_v37 = vor.u32 %v544_v23, %v541_v18  ;;  %v6917_v10 = vld [vmem:[%s6786_s13 + $0x28] sm:$0xf] }
  0x2c   : > { %v369_v27 = vsel %vm6830_vm4, %v364_v17, %v368_v2  ;;  %v373_v38 = vrot.slane %v371_v26, 4  ;;  %v380_v39 = vshll.u32 %v6872_v21, 16  ;;  %v384_v44 = vshrl.u32 %v6872_v21, 16  ;;  %v6923_v19 = vld [vmem:[%s9630_s1 + $0x6] sm:$0x3]  ;;  %p6616_p5 = pnand %p6615_p3, %p6609_p0 }
  0x2d   : > { %v5325_v36 = vcombine.low %v359_v22, %v369_v27  ;;  %v555_v42 = vor.u32 %v554_v28, %v550_v24  ;;  %v376_v43 = vrot.slane %v374_v34, 5  ;;  %v390_v45 = vshll.u32 %v6878_v25, 16 }
  0x2e   : > { %v546_v47 = vrot.slane %v545_v37, 4  ;;  %v382_v48 = vrot.slane %v380_v39, 5  ;;  %v563_v49 = vshrl.u32 %v6885_v35, 16  ;;  %v566_v50 = vshll.u32 %v6885_v35, 16 }
  0x2f   : > { %6055 = vmatmul.mubr.msk.bf16.vlgmr.msra.gmra.mxu0 %vm756_vm3, %v5325_v36  ;;  %v556_v51 = vrot.slane %v555_v42, 4  ;;  %v377_v52 = vor.u32 %v376_v43, %v373_v38  ;;  %v386_v54 = vrot.slane %v384_v44, 4  ;;  %v392_v55 = vrot.slane %v390_v45, 5  ;;  %v6935_v36 = vld [vmem:[%s6786_s13 + $0x84] sm:$0xf] }
  0x30   : > { %6121 = vmatpush3.bf16.msra.mxu0 %v6815_v16  ;;  %v551_v57 = vsel %vm6830_vm4, %v546_v47, %v550_v24  ;;  %v565_v59 = vrot.slane %v563_v49, 4  ;;  %v568_v60 = vrot.slane %v566_v50, 5  ;;  %v572_v0 = vshll.u32 %v6896_v46, 16  ;;  %v6928_v24 = vld [vmem:[%s6786_s13 + $0x2c] sm:$0x1] }
  0x31   : > { %6365 = vmatprep.subr.msk.bf16.mxu0 %vm805_vm0, %v6891_v40  ;;  %v561_v16 = vsel %vm6830_vm4, %v556_v51, %v560_v33  ;;  %v378_v2 = vrot.slane %v377_v52, 4  ;;  %v387_v3 = vor.u32 %v386_v54, %v382_v48  ;;  %v576_v9 = vshrl.u32 %v6896_v46, 16  ;;  %v6942_v43 = vld [vmem:[%s6786_s13 + $0x88] sm:$0xf]  ;;  %v6950_v51 = vld [vmem:[%s6786_s13 + $0x8c] sm:$0x1] }
  0x32   : > { %v5333_v11 = vcombine.low %v551_v57, %v561_v16  ;;  %v569_v13 = vor.u32 %v568_v60, %v565_v59  ;;  %v574_v17 = vrot.slane %v572_v0, 5  ;;  %v582_v18 = vshll.u32 %v6903_v56, 16  ;;  %9672 = vst [vmem:[#allocation6_spill] sm:$0xff] %v6950_v51  ;;  %v6958_v60 = vld [vmem:[%s6786_s13 + $0x30] sm:$0xf] }
  0x33   : > { %v383_v20 = vsel %vm6830_vm4, %v378_v2, %v382_v48  ;;  %v388_v22 = vrot.slane %v387_v3, 4  ;;  %v578_v23 = vrot.slane %v576_v9, 4  ;;  %v395_v26 = vshrl.u32 %v6909_v1, 16  ;;  %v6963_v9 = vld [vmem:[%s6786_s13 + $0x34] sm:$0xf] }
  0x34   : > { %6071 = vmatmul.mubr.msk.bf16.vlgmr.msra.gmra.mxu1 %vm756_vm3, %v5333_v11  ;;  %v570_v27 = vrot.slane %v569_v13, 4  ;;  %v584_v28 = vrot.slane %v582_v18, 5  ;;  %v398_v33 = vshll.u32 %v6909_v1, 16  ;;  %v404_v34 = vshll.u32 %v6917_v10, 16 }
  0x35   : > { %6087 = vmatpush3.bf16.msra.mxu1 %v6789_v4  ;;  %v393_v37 = vsel %vm6830_vm4, %v388_v22, %v392_v55  ;;  %v579_v38 = vor.u32 %v578_v23, %v574_v17  ;;  %v397_v39 = vrot.slane %v395_v26, 4  ;;  %v408_v42 = vshrl.u32 %v6917_v10, 16 }
  0x36   : > { %v5326_v44 = vcombine.low %v383_v20, %v393_v37  ;;  %v575_v45 = vsel %vm6830_vm4, %v570_v27, %v574_v17  ;;  %v400_v47 = vrot.slane %v398_v33, 5  ;;  %v406_v48 = vrot.slane %v404_v34, 5  ;;  %6364 = vmatprep.subr.msk.bf16.mxu1 %vm805_vm0, %v6923_v19  ;;  %v6971_v33 = vld [vmem:[%s6786_s13 + $0x38] sm:$0x1] }
  0x37   : > { %v580_v4 = vrot.slane %v579_v38, 4  ;;  %v410_v49 = vrot.slane %v408_v42, 4  ;;  %v414_v50 = vshll.u32 %v6928_v24, 16  ;;  %v587_v52 = vshrl.u32 %v6935_v36, 16  ;;  %v6976_v38 = vld [vmem:[%s6786_s13 + $0x90] sm:$0xf] }
  0x38   : > { %6058 = vmatprep.mubr.msk.bf16.mxu0 %vm756_vm3, %v5326_v44  ;;  %v401_v54 = vor.u32 %v400_v47, %v397_v39  ;;  %v590_v55 = vshll.u32 %v6935_v36, 16  ;;  %v596_v57 = vshll.u32 %v6942_v43, 16  ;;  %v600_v59 = vshrl.u32 %v6942_v43, 16  ;;  %9673 = vst [vmem:[#allocation7_spill] sm:$0xff] %v6976_v38  ;;  %v6981_v47 = vld [vmem:[%s6786_s13 + $0x94] sm:$0xf] }
  0x39   : > { %v585_v0 = vsel %vm6830_vm4, %v580_v4, %v584_v28  ;;  %v411_v16 = vor.u32 %v410_v49, %v406_v48  ;;  %v416_v2 = vrot.slane %v414_v50, 5  ;;  %v589_v3 = vrot.slane %v587_v52, 4  ;;  %9674 = vst [vmem:[#allocation8_spill] sm:$0xff] %v6981_v47 }
  0x3a   : > { %v5334_v11 = vcombine.low %v575_v45, %v585_v0  ;;  %v402_v13 = vrot.slane %v401_v54, 4  ;;  %v592_v17 = vrot.slane %v590_v55, 5  ;;  %v598_v18 = vrot.slane %v596_v57, 5 }
  0x3b   : > { %v412_v20 = vrot.slane %v411_v16, 4  ;;  %v602_v22 = vrot.slane %v600_v59, 4  ;;  %v606_v23 = vshll.u32 %v6950_v51, 16  ;;  %v419_v26 = vshrl.u32 %v6958_v60, 16  ;;  %v6990_v16 = vld [vmem:[%s6786_s13 + $0x98] sm:$0x1] }
  0x3c   : > { %6074 = vmatprep.mubr.msk.bf16.mxu1 %vm756_vm3, %v5334_v11  ;;  %v407_v27 = vsel %vm6830_vm4, %v402_v13, %v406_v48  ;;  %v593_v28 = vor.u32 %v592_v17, %v589_v3  ;;  %v422_v34 = vshll.u32 %v6958_v60, 16  ;;  %v428_v37 = vshll.u32 %v6963_v9, 16  ;;  %9675 = vst [vmem:[#allocation9_spill] sm:$0xff] %v6990_v16  ;;  %v6995_v11 = vld [vmem:[%s6786_s13 + $0x3c] sm:$0xf] }
  0x3d   : > { %v417_v39 = vsel %vm6830_vm4, %v412_v20, %v416_v2  ;;  %v603_v42 = vor.u32 %v602_v22, %v598_v18  ;;  %v608_v44 = vrot.slane %v606_v23, 5  ;;  %v421_v45 = vrot.slane %v419_v26, 4  ;;  %v7000_v23 = vld [vmem:[%s6786_s13 + $0x40] sm:$0xf]  ;;  %v1263_v51 = vld [vmem:[%s6786_s13 + $0xc] sm:$0xe] }
  0x3e   : > { %v5327_v48 = vcombine.low %v407_v27, %v417_v39  ;;  %v594_v4 = vrot.slane %v593_v28, 4  ;;  %v424_v49 = vrot.slane %v422_v34, 5  ;;  %v430_v50 = vrot.slane %v428_v37, 5 }
  0x3f   : > { %v604_v52 = vrot.slane %v603_v42, 4  ;;  %v432_v54 = vshrl.u32 %v6963_v9, 16  ;;  %v438_v55 = vshll.u32 %v6971_v33, 16  ;;  %v611_v57 = vshrl.u32 %v6976_v38, 16 }
  0x40   : > { %6059 = vmatmul.mubr.msk.bf16.gmra.mxu0 %vm756_vm3, %v5327_v48  ;;  %v599_v59 = vsel %vm6830_vm4, %v594_v4, %v598_v18  ;;  %v425_v0 = vor.u32 %v424_v49, %v421_v45  ;;  %v614_v2 = vshll.u32 %v6976_v38, 16  ;;  %v620_v3 = vshll.u32 %v6981_v47, 16  ;;  %v7009_v48 = vld [vmem:[%s6786_s13 + $0x44] sm:$0x1] }
  0x41   : > { %v609_v13 = vsel %vm6830_vm4, %v604_v52, %v608_v44  ;;  %v434_v17 = vrot.slane %v432_v54, 4  ;;  %v440_v20 = vrot.slane %v438_v55, 5  ;;  %v613_v22 = vrot.slane %v611_v57, 4  ;;  %v7014_v52 = vld [vmem:[%s6786_s13 + $0x9c] sm:$0xf] }
  0x42   : > { %v5335_v18 = vcombine.low %v599_v59, %v609_v13  ;;  %v426_v26 = vrot.slane %v425_v0, 4  ;;  %v616_v27 = vrot.slane %v614_v2, 5  ;;  %v622_v28 = vrot.slane %v620_v3, 5  ;;  %9676 = vst [vmem:[#allocation10_spill] sm:$0xff] %v7014_v52  ;;  %v7018_v13 = vld [vmem:[%s6786_s13 + $0xa0] sm:$0xf] }
  0x43   : > { %v435_v34 = vor.u32 %v434_v17, %v430_v50  ;;  %v624_v37 = vshrl.u32 %v6981_v47, 16  ;;  %v630_v39 = vshll.u32 %v6990_v16, 16  ;;  %v443_v42 = vshrl.u32 %v6995_v11, 16  ;;  %9677 = vst [vmem:[#allocation11_spill] sm:$0xff] %v7018_v13 }
  0x44   : > { %6075 = vmatmul.mubr.msk.bf16.gmra.mxu1 %vm756_vm3, %v5335_v18  ;;  %v431_v44 = vsel %vm6830_vm4, %v426_v26, %v430_v50  ;;  %v617_v45 = vor.u32 %v616_v27, %v613_v22  ;;  %v446_v4 = vshll.u32 %v6995_v11, 16  ;;  %v452_v49 = vshll.u32 %v7000_v23, 16  ;;  %v7024_v26 = vld [vmem:[%s6786_s13 + $0xa4] sm:$0x1] }
  0x45   : > { %v436_v54 = vrot.slane %v435_v34, 4  ;;  %v626_v55 = vrot.slane %v624_v37, 4  ;;  %v632_v57 = vrot.slane %v630_v39, 5  ;;  %v445_v59 = vrot.slane %v443_v42, 4  ;;  %9678 = vst [vmem:[#allocation12_spill] sm:$0xff] %v7024_v26 }
  0x46   : > { %v618_v0 = vrot.slane %v617_v45, 4  ;;  %v448_v2 = vrot.slane %v446_v4, 5  ;;  %v454_v3 = vrot.slane %v452_v49, 5  ;;  %v456_v50 = vshrl.u32 %v7000_v23, 16  ;;  %v7028_v34 = vld [vmem:[%s6786_s13 + $0x48] sm:$0xf] }
  0x47   : > { %v441_v17 = vsel %vm6830_vm4, %v436_v54, %v440_v20  ;;  %v627_v22 = vor.u32 %v626_v55, %v622_v28  ;;  %v462_v18 = vshll.u32 %v7009_v48, 16  ;;  %v635_v27 = vshrl.u32 %v7014_v52, 16 }
  0x48   : > { %v5328_v37 = vcombine.low %v431_v44, %v441_v17  ;;  %v623_v39 = vsel %vm6830_vm4, %v618_v0, %v622_v28  ;;  %v449_v42 = vor.u32 %v448_v2, %v445_v59  ;;  %v458_v45 = vrot.slane %v456_v50, 4  ;;  %v7037_v17 = vld [vmem:[%s6786_s13 + $0x4c] sm:$0xf]  ;;  %v7043_v2 = vld [vmem:[%s6786_s13 + $0x50] sm:$0x1] }
  0x49   : > { %v628_v4 = vrot.slane %v627_v22, 4  ;;  %v464_v49 = vrot.slane %v462_v18, 5  ;;  %v637_v20 = vrot.slane %v635_v27, 4  ;;  %v638_v54 = vshll.u32 %v7014_v52, 16 }
  0x4a   : > { %6062 = vmatprep.mubr.msk.bf16.mxu0 %vm756_vm3, %v5328_v37  ;;  %v450_v55 = vrot.slane %v449_v42, 4  ;;  %v459_v62 = vor.u32 %v458_v45, %v454_v3  ;;  %v644_v32 = vshll.u32 %v7018_v13, 16  ;;  %v648_v44 = vshrl.u32 %v7018_v13, 16  ;;  %v7049_v42 = vld [vmem:[%s6786_s13 + $0xa8] sm:$0xf] }
  0x4b   : > { %v633_v28 = vsel %vm6830_vm4, %v628_v4, %v632_v57  ;;  %v640_v59 = vrot.slane %v638_v54, 5  ;;  %v654_v0 = vshll.u32 %v7024_v26, 16  ;;  %v467_v50 = vshrl.u32 %v7028_v34, 16  ;;  %9679 = vst [vmem:[#allocation13_spill] sm:$0xff] %v7049_v42 }
  0x4c   : > { %v5336_v22 = vcombine.low %v623_v39, %v633_v28  ;;  %v455_v18 = vsel %vm6830_vm4, %v450_v55, %v454_v3  ;;  %v460_v27 = vrot.slane %v459_v62, 4  ;;  %v646_v37 = vrot.slane %v644_v32, 5 }
  0x4d   : > { %v641_v45 = vor.u32 %v640_v59, %v637_v20  ;;  %v650_v61 = vrot.slane %v648_v44, 4  ;;  %v656_v57 = vrot.slane %v654_v0, 5  ;;  %v469_v4 = vrot.slane %v467_v50, 4  ;;  %v7059_v44 = vld [vmem:[%s6786_s13 + $0xac] sm:$0xf] }
  0x4e   : > { %6078 = vmatprep.mubr.msk.bf16.mxu1 %vm756_vm3, %v5336_v22  ;;  %v465_v54 = vsel %vm6830_vm4, %v460_v27, %v464_v49  ;;  %v470_v39 = vshll.u32 %v7028_v34, 16  ;;  %v476_v28 = vshll.u32 %v7037_v17, 16  ;;  %v480_v62 = vshrl.u32 %v7037_v17, 16  ;;  %9680 = vst [vmem:[#allocation14_spill] sm:$0xff] %v7059_v44  ;;  %v7062_v22 = vld [vmem:[%s6786_s13 + $0xb0] sm:$0x1] }
  0x4f   : > { %v5329_v3 = vcombine.low %v455_v18, %v465_v54  ;;  %v642_v32 = vrot.slane %v641_v45, 4  ;;  %v651_v55 = vor.u32 %v650_v61, %v646_v37  ;;  %v486_v20 = vshll.u32 %v7043_v2, 16  ;;  %9681 = vst [vmem:[#allocation15_spill] sm:$0xff] %v7062_v22 }
  0x50   : > { %v472_v59 = vrot.slane %v470_v39, 5  ;;  %v478_v0 = vrot.slane %v476_v28, 5  ;;  %v482_v50 = vrot.slane %v480_v62, 4  ;;  %v659_v49 = vshrl.u32 %v7049_v42, 16  ;;  %v7071_v62 = vld [vmem:[%s6786_s13 + $0x54] sm:$0xf] }
  0x51   : > { %6063 = vmatmul.mubr.msk.bf16.gmra.mxu0 %vm756_vm3, %v5329_v3  ;;  %v647_v18 = vsel %vm6830_vm4, %v642_v32, %v646_v37  ;;  %v652_v27 = vrot.slane %v651_v55, 4  ;;  %v488_v61 = vrot.slane %v486_v20, 5  ;;  %v662_v45 = vshll.u32 %v7049_v42, 16  ;;  %v7078_v55 = vld [vmem:[%s6786_s13 + $0x58] sm:$0xf] }
  0x52   : > { %v473_v54 = vor.u32 %v472_v59, %v469_v4  ;;  %v483_v56 = vor.u32 %v482_v50, %v478_v0  ;;  %v661_v39 = vrot.slane %v659_v49, 4  ;;  %v668_v28 = vshll.u32 %v7059_v44, 16  ;;  %v7081_v49 = vld [vmem:[%s6786_s13 + $0x5c] sm:$0x1] }
  0x53   : > { %v657_v3 = vsel %vm6830_vm4, %v652_v27, %v656_v57  ;;  %v664_v26 = vrot.slane %v662_v45, 5  ;;  %v672_v37 = vshrl.u32 %v7059_v44, 16  ;;  %v678_v32 = vshll.u32 %v7062_v22, 16  ;;  %v1262_v22 = vld [vmem:[%s6786_s13] sm:$0xe] }
  0x54   : > { %v5337_v4 = vcombine.low %v647_v18, %v657_v3  ;;  %v474_v20 = vrot.slane %v473_v54, 4  ;;  %v484_v59 = vrot.slane %v483_v56, 4  ;;  %v670_v50 = vrot.slane %v668_v28, 5  ;;  %v7092_v54 = vld [vmem:[%s6786_s13 + $0xb4] sm:$0xf] }
  0x55   : > { %v665_v42 = vor.u32 %v664_v26, %v661_v39  ;;  %v674_v52 = vrot.slane %v672_v37, 4  ;;  %v680_v13 = vrot.slane %v678_v32, 5  ;;  %v491_v57 = vshrl.u32 %v7071_v62, 16  ;;  %9682 = vst [vmem:[#allocation16_spill] sm:$0xff] %v7092_v54  ;;  %v7095_v37 = vld [vmem:[%s6786_s13 + $0xb8] sm:$0xf] }
  0x56   : > { %6079 = vmatmul.mubr.msk.bf16.gmra.mxu1 %vm756_vm3, %v5337_v4  ;;  %v479_v27 = vsel %vm6830_vm4, %v474_v20, %v478_v0  ;;  %v489_v18 = vsel %vm6830_vm4, %v484_v59, %v488_v61  ;;  %v494_v56 = vshll.u32 %v7071_v62, 16  ;;  %v500_v45 = vshll.u32 %v7078_v55, 16  ;;  %v7100_v61 = vld [vmem:[%s6786_s13 + $0xbc] sm:$0x1] }
  0x57   : > { %v5330_v26 = vcombine.low %v479_v27, %v489_v18  ;;  %v666_v39 = vrot.slane %v665_v42, 4  ;;  %v675_v28 = vor.u32 %v674_v52, %v670_v50  ;;  %v493_v3 = vrot.slane %v491_v57, 4 }
  0x58   : > { %v496_v32 = vrot.slane %v494_v56, 5  ;;  %v502_v4 = vrot.slane %v500_v45, 5  ;;  %v504_v0 = vshrl.u32 %v7078_v55, 16  ;;  %v510_v20 = vshll.u32 %v7081_v49, 16 }
  0x59   : > { %6066 = vmatprep.mubr.msk.bf16.mxu0 %vm756_vm3, %v5330_v26  ;;  %v671_v59 = vsel %vm6830_vm4, %v666_v39, %v670_v50  ;;  %v676_v27 = vrot.slane %v675_v28, 4  ;;  %v683_v52 = vshrl.u32 %v7092_v54, 16  ;;  %v686_v42 = vshll.u32 %v7092_v54, 16 }
  0x5a   : > { %v497_v57 = vor.u32 %v496_v32, %v493_v3  ;;  %v506_v18 = vrot.slane %v504_v0, 4  ;;  %v512_v56 = vrot.slane %v510_v20, 5  ;;  %v692_v45 = vshll.u32 %v7095_v37, 16 }
  0x5b   : > { %v681_v44 = vsel %vm6830_vm4, %v676_v27, %v680_v13  ;;  %v685_v16 = vrot.slane %v683_v52, 4  ;;  %v688_v26 = vrot.slane %v686_v42, 5  ;;  %v696_v38 = vshrl.u32 %v7095_v37, 16 }
  0x5c   : > { %v5338_v50 = vcombine.low %v671_v59, %v681_v44  ;;  %v498_v39 = vrot.slane %v497_v57, 4  ;;  %v507_v28 = vor.u32 %v506_v18, %v502_v4  ;;  %v694_v47 = vrot.slane %v692_v45, 5  ;;  %v1264_v57 = vld [vmem:[%s6786_s13 + $0x18] sm:$0xe] }
  0x5d   : > { %v689_v54 = vor.u32 %v688_v26, %v685_v16  ;;  %v698_v3 = vrot.slane %v696_v38, 4  ;;  %v702_v32 = vshll.u32 %v7100_v61, 16  ;;  %v5388_v13 = vrot.slane %v1262_v22, 9 }
  0x5e   : > { %6082 = vmatprep.mubr.msk.bf16.mxu1 %vm756_vm3, %v5338_v50  ;;  %v503_v44 = vsel %vm6830_vm4, %v498_v39, %v502_v4  ;;  %v508_v20 = vrot.slane %v507_v28, 4  ;;  %v1315_v59 = vrot.slane %v6795_v6, 5  ;;  %v5357_v38 = vcombine.low %v6823_v29, %v6826_v30 }
  0x5f   : > { %v690_v16 = vrot.slane %v689_v54, 4  ;;  %v699_v27 = vor.u32 %v698_v3, %v694_v47  ;;  %v704_v52 = vrot.slane %v702_v32, 5  ;;  %v5389_v42 = vrot.slane %v1263_v51, 9 }
  0x60   : > { %v513_v18 = vsel %vm6830_vm4, %v508_v20, %v512_v56  ;;  %v1316_v22 = vsel %vm7116_vm7, %v5388_v13, %v1315_v59  ;;  %v1317_v45 = vrot.slane %v1315_v59, 4  ;;  %v9685_v4 = vrot.slane %v6826_v30, 5 }
  0x61   : > { %v5331_v50 = vcombine.low %v503_v44, %v513_v18  ;;  %v695_v54 = vsel %vm6830_vm4, %v690_v16, %v694_v47  ;;  %v700_v39 = vrot.slane %v699_v27, 4  ;;  %v5356_v51 = vcombine.low %v6792_v5, %v6795_v6  ;;  %v1265_v27 = vld [vmem:[%s6786_s13 + $0x24] sm:$0xe] }
  0x62   : > { %v1324_v26 = vrot.slane %v9685_v4, 4  ;;  %v9686_v28 = vrot.slane %v6798_v7, 5  ;;  %v9687_v3 = vmov %v9685_v4  ;;  %v5358_v13 = vcombine.low %v6865_v8, %v6872_v21  ;;  %v1267_v4 = vld [vmem:[%s6786_s13 + $0x3c] sm:$0xe] }
  0x63   : > { %v1323_v32 = vsel %vm7116_vm7, %v5389_v42, %v9687_v3  ;;  %v5390_v44 = vrot.slane %v1264_v57, 9  ;;  %6067 = vmatmul.mubr.msk.bf16.gmra.mxu0 %vm756_vm3, %v5331_v50  ;;  %v705_v47 = vsel %vm6830_vm4, %v700_v39, %v704_v52  ;;  %v9688_v6 = vrot.slane %v6836_v41, 5  ;;  %v1266_v42 = vld [vmem:[%s6786_s13 + $0x30] sm:$0xe]  ;;  %v1268_v39 = vld [vmem:[%s6786_s13 + $0x48] sm:$0xe] }
  0x64   : > { %v1319_v56 = vsel %vm7116_vm7, %v1317_v45, %v9686_v28  ;;  %v1329_v20 = vrot.slane %v6872_v21, 5  ;;  %v5339_v59 = vcombine.low %v695_v54, %v705_v47  ;;  %v1332_v16 = vrot.slane %v6878_v25, 5  ;;  %v1269_v47 = vld [vmem:[%s6786_s13 + $0x54] sm:$0xe]  ;;  %v7411_v21 = vld [vmem:[%s6786_s13 + $0x2c] sm:$0x1] }
  0x65   : > { %v5405_v5 = vcombine.low %v1316_v22, %v1319_v56  ;;  %v1326_v7 = vsel %vm7116_vm7, %v1324_v26, %v9688_v6  ;;  %v1886_v52 = vsel %vm805_vm0, %v6923_v19, 0  ;;  %v1336_v18 = vrot.slane %v6917_v10, 5 }
  0x66   : > { %v1330_v41 = vsel %vm7116_vm7, %v5390_v44, %v1329_v20  ;;  %v1331_v57 = vrot.slane %v1329_v20, 4  ;;  %6083 = vmatmul.mubr.msk.bf16.gmra.mxu1 %vm756_vm3, %v5339_v59  ;;  %v5406_v22 = vcombine.low %v1323_v32, %v1326_v7  ;;  %v2612_v25 = vsel %vm805_vm0, %v6891_v40, 0 }
  0x67   : > { %6122 = vmatprep.mubr.msk.bf16.mxu0 %vm756_vm3, %v5405_v5  ;;  %v1343_v45 = vrot.slane %v6963_v9, 5  ;;  %6088 = vmatprep.mubr.msk.bf16.mxu1 %vm756_vm3, %v5356_v51  ;;  %v5391_v26 = vrot.slane %v1265_v27, 9  ;;  %v1339_v50 = vrot.slane %v6928_v24, 5  ;;  %v5392_v54 = vrot.slane %v1266_v42, 9  ;;  %v7183_v24 = vld [vmem:[%s9630_s1 + $0xc] sm:$0x3] }
  0x68   : > { %v1333_v19 = vsel %vm7116_vm7, %v1331_v57, %v1332_v16  ;;  %v1338_v56 = vrot.slane %v1336_v18, 4  ;;  %v1346_v32 = vrot.slane %v6971_v33, 5  ;;  %v5393_v44 = vrot.slane %v1267_v4, 9 }
  0x69   : > { %v5407_v28 = vcombine.low %v1330_v41, %v1333_v19  ;;  %v1345_v3 = vrot.slane %v1343_v45, 4  ;;  %v1350_v40 = vrot.slane %v7000_v23, 5  ;;  %v1374_v5 = vrot.slane %v6812_v15, 5 }
  0x6a   : > { %v1353_v51 = vrot.slane %v7009_v48, 5  ;;  %v5394_v6 = vrot.slane %v1268_v39, 9  ;;  %v1357_v7 = vrot.slane %v7037_v17, 5  ;;  %v5359_v33 = vcombine.low %v6909_v1, %v6917_v10  ;;  %v1270_v1 = vld [vmem:[%s6786_s13 + $0x60] sm:$0xe] }
  0x6b   : > { %6123 = vmatmul.mubr.msk.bf16.vlgmr.msra.gmra.mxu0 %vm756_vm3, %v5406_v22  ;;  %v1337_v20 = vsel %vm7116_vm7, %v5391_v26, %v1336_v18  ;;  %v1352_v59 = vrot.slane %v1350_v40, 4  ;;  %v1360_v16 = vrot.slane %v7043_v2, 5  ;;  %v1340_v48 = vsel %vm7116_vm7, %v1338_v56, %v1339_v50  ;;  %v7211_v22 = vld [vmem:[%s9630_s1 + $0xa] sm:$0x3]  ;;  %v7236_v50 = vld [vmem:[%s6786_s13 + $0x6c] sm:$0xe] }
  0x6c   : > { %6189 = vmatpush3.bf16.msra.mxu0 %v2612_v25  ;;  %6126 = vmatprep.mubr.msk.bf16.mxu0 %vm756_vm3, %v5407_v28  ;;  %v1344_v27 = vsel %vm7116_vm7, %v5392_v54, %v1343_v45  ;;  %v1347_v42 = vsel %vm7116_vm7, %v1345_v3, %v1346_v32  ;;  %v1359_v41 = vrot.slane %v1357_v7, 4  ;;  %v7201_v10 = vsel %vm7116_vm7, %v5393_v44, %v1350_v40  ;;  %v1273_v39 = vld [vmem:[%s6786_s13 + $0x84] sm:$0xe]  ;;  %v7265_v44 = vld [vmem:[%s6786_s13 + $0x78] sm:$0xe] }
  0x6d   : > { %v7205_v2 = vsel %vm7116_vm7, %v5394_v6, %v1357_v7  ;;  %v5395_v57 = vrot.slane %v1269_v47, 9  ;;  %v1364_v18 = vrot.slane %v7078_v55, 5  ;;  %6367 = vmatprep.subr.msk.bf16.mxu0 %vm805_vm0, %v7183_v24  ;;  %v7221_v25 = vsel %vm7116_vm7, %v1352_v59, %v1353_v51  ;;  %v1274_v40 = vld [vmem:[%s6786_s13 + $0x90] sm:$0xe] }
  0x6e   : > { %6089 = vmatmul.mubr.msk.bf16.vlgmr.msra.gmra.mxu1 %vm756_vm3, %v5357_v38  ;;  %v7225_v45 = vsel %vm7116_vm7, %v1359_v41, %v1360_v16  ;;  %v1367_v4 = vrot.slane %v7081_v49, 5  ;;  %v1371_v19 = vrot.slane %v6809_v14, 5  ;;  %v5408_v29 = vcombine.low %v1337_v20, %v1340_v48  ;;  %v9689_v48 = vld [vmem:[#allocation6_spill] sm:$0xff] }
  0x6f   : > { %6155 = vmatpush3.bf16.msra.mxu1 %v1886_v52  ;;  %6092 = vmatprep.mubr.msk.bf16.mxu1 %vm756_vm3, %v5358_v13  ;;  %v5360_v30 = vcombine.low %v6958_v60, %v6963_v9  ;;  %v1366_v38 = vrot.slane %v1364_v18, 4  ;;  %v5396_v26 = vrot.slane %v1270_v1, 9  ;;  %v5409_v49 = vcombine.low %v1344_v27, %v1347_v42  ;;  %v1275_v42 = vld [vmem:[%s6786_s13 + $0x9c] sm:$0xe] }
  0x70   : > { %v5361_v52 = vcombine.low %v6995_v11, %v7000_v23  ;;  %v5362_v8 = vcombine.low %v7028_v34, %v7037_v17  ;;  %6366 = vmatprep.subr.msk.bf16.mxu1 %vm805_vm0, %v7211_v22  ;;  %v5410_v60 = vcombine.low %v7201_v10, %v7221_v25  ;;  %v5411_v9 = vcombine.low %v7205_v2, %v7225_v45  ;;  %v9690_v10 = vld [vmem:[#allocation8_spill] sm:$0xff]  ;;  %v9691_v2 = vld [vmem:[#allocation7_spill] sm:$0xff] }
  0x71   : > { %v1373_v54 = vrot.slane %v1371_v19, 4  ;;  %v7255_v28 = vsel %vm7116_vm7, %v5395_v57, %v1364_v18  ;;  %v7259_v56 = vsel %vm7116_vm7, %v1366_v38, %v1367_v4  ;;  %v5397_v32 = vrot.slane %v7236_v50, 9  ;;  %v1276_v18 = vld [vmem:[%s6786_s13 + $0xa8] sm:$0xe]  ;;  %v9693_v38 = vld [vmem:[#allocation11_spill] sm:$0xff] }
  0x72   : > { %v7271_v47 = vsel %vm7116_vm7, %v5396_v26, %v1371_v19  ;;  %v1378_v51 = vrot.slane %v6851_v58, 5  ;;  %v1381_v6 = vrot.slane %v6859_v63, 5  ;;  %v5399_v59 = vrot.slane %v1273_v39, 9  ;;  %v9692_v19 = vld [vmem:[#allocation9_spill] sm:$0xff]  ;;  %v9694_v26 = vld [vmem:[#allocation10_spill] sm:$0xff] }
  0x73   : > { %6127 = vmatmul.mubr.msk.bf16.gmra.mxu0 %vm756_vm3, %v5408_v29  ;;  %v1392_v16 = vrot.slane %v6942_v43, 5  ;;  %v1395_v27 = vrot.slane %v9689_v48, 5  ;;  %v5412_v41 = vcombine.low %v7255_v28, %v7259_v56  ;;  %v7289_v63 = vsel %vm7116_vm7, %v1373_v54, %v1374_v5  ;;  %v9696_v48 = vld [vmem:[#allocation14_spill] sm:$0xff] }
  0x74   : > { %6130 = vmatprep.mubr.msk.bf16.mxu0 %vm756_vm3, %v5409_v49  ;;  %v5398_v1 = vrot.slane %v7265_v44, 9  ;;  %v5400_v4 = vrot.slane %v1274_v40, 9  ;;  %v1399_v15 = vrot.slane %v9690_v10, 5  ;;  %v1380_v5 = vrot.slane %v1378_v51, 4  ;;  %v5502_v57 = vld [vmem:[%s6786_s13 + $0xc] sm:$0xf] }
  0x75   : > { %v7298_v25 = vsel %vm7116_vm7, %v5399_v59, %v1392_v16  ;;  %v1394_v45 = vrot.slane %v1392_v16, 4  ;;  %v1402_v29 = vrot.slane %v9692_v19, 5  ;;  %v5401_v49 = vrot.slane %v1275_v42, 9  ;;  %v9695_v59 = vld [vmem:[#allocation12_spill] sm:$0xff]  ;;  %v9697_v42 = vld [vmem:[#allocation13_spill] sm:$0xff] }
  0x76   : > { %6093 = vmatmul.mubr.msk.bf16.gmra.mxu1 %vm756_vm3, %v5359_v33  ;;  %v1385_v33 = vrot.slane %v6896_v46, 5  ;;  %v7312_v39 = vsel %vm7116_vm7, %v5400_v4, %v1399_v15  ;;  %v1401_v44 = vrot.slane %v1399_v15, 4  ;;  %v1406_v40 = vrot.slane %v9693_v38, 5  ;;  %v9698_v15 = vld [vmem:[#allocation15_spill] sm:$0xff] }
  0x77   : > { %6096 = vmatprep.mubr.msk.bf16.mxu1 %vm756_vm3, %v5360_v30  ;;  %v7308_v54 = vsel %vm7116_vm7, %v1394_v45, %v1395_v27  ;;  %v1409_v16 = vrot.slane %v9695_v59, 5  ;;  %v5402_v45 = vrot.slane %v1276_v18, 9  ;;  %v1413_v4 = vrot.slane %v9696_v48, 5 }
  0x78   : > { %v7322_v27 = vsel %vm7116_vm7, %v1401_v44, %v1402_v29  ;;  %v1416_v50 = vrot.slane %v9698_v15, 5  ;;  %v7332_v19 = vsel %vm7116_vm7, %v5401_v49, %v1406_v40  ;;  %v1408_v7 = vrot.slane %v1406_v40, 4  ;;  %v9699_v29 = vld [vmem:[#allocation16_spill] sm:$0xff]  ;;  %v9700_v15 = vld [vmem:[#allocation5_spill] sm:$0xff]  ;;  %v7347_v49 = vld [vmem:[%s6786_s13 + $0x10] sm:$0xf] }
  0x79   : > { %v7339_v18 = vsel %vm7116_vm7, %v5397_v32, %v1378_v51  ;;  %v7344_v59 = vsel %vm7116_vm7, %v5402_v45, %v1413_v4  ;;  %v1415_v30 = vrot.slane %v1413_v4, 4  ;;  %v5505_v40 = vld [vmem:[%s6786_s13 + $0x18] sm:$0xf]  ;;  %v1387_v20 = vrot.slane %v1385_v33, 4 }
  0x7a   : > { %v2130_v44 = vshrl.u32 %v5502_v57, 16  ;;  %v2133_v32 = vshll.u32 %v5502_v57, 16  ;;  %v5413_v51 = vcombine.low %v7271_v47, %v7289_v63  ;;  %v7362_v45 = vsel %vm7116_vm7, %v1380_v5, %v1381_v6  ;;  %v1277_v57 = vld [vmem:[%s6786_s13 + $0xb4] sm:$0xe]  ;;  %v7383_v47 = vld [vmem:[%s6786_s13 + $0x14] sm:$0x1] }
  0x7b   : > { %6131 = vmatmul.mubr.msk.bf16.gmra.mxu0 %vm756_vm3, %v5410_v60  ;;  %v1388_v60 = vrot.slane %v9700_v15, 5  ;;  %v7377_v11 = vsel %vm7116_vm7, %v5398_v1, %v1385_v33  ;;  %v2139_v6 = vshll.u32 %v7347_v49, 16  ;;  %v5506_v63 = vld [vmem:[%s6786_s13 + $0x1c] sm:$0xf]  ;;  %v2143_v17 = vshrl.u32 %v7347_v49, 16 }
  0x7c   : > { %6134 = vmatprep.mubr.msk.bf16.mxu0 %vm756_vm3, %v5411_v9  ;;  %v7352_v9 = vsel %vm7116_vm7, %v1408_v7, %v1409_v16  ;;  %v7368_v7 = vsel %vm7116_vm7, %v1415_v30, %v1416_v50  ;;  %v2132_v5 = vrot.slane %v2130_v44, 4  ;;  %v2135_v34 = vrot.slane %v2133_v32, 5  ;;  %v5508_v15 = vld [vmem:[%s6786_s13 + $0x24] sm:$0xf]  ;;  %v7396_v44 = vld [vmem:[%s6786_s13 + $0x28] sm:$0xf] }
  0x7d   : > { %v2154_v50 = vshrl.u32 %v5505_v40, 16  ;;  %v1389_v1 = vsel %vm7116_vm7, %v1387_v20, %v1388_v60  ;;  %v5403_v33 = vrot.slane %v1277_v57, 9  ;;  %v7391_v30 = vrot.slane %v2139_v6, 5 }
  0x7e   : > { %6097 = vmatmul.mubr.msk.bf16.gmra.mxu1 %vm756_vm3, %v5361_v52  ;;  %v1420_v52 = vrot.slane %v7095_v37, 5  ;;  %v2157_v16 = vshll.u32 %v5505_v40, 16  ;;  %v1423_v23 = vrot.slane %v7100_v61, 5  ;;  %v2145_v4 = vrot.slane %v2143_v17, 4 }
  0x7f   : > { %6100 = vmatprep.mubr.msk.bf16.mxu1 %vm756_vm3, %v5362_v8  ;;  %v5507_v8 = vld [vmem:[%s6786_s13 + $0x20] sm:$0x1]  ;;  %v2156_v3 = vrot.slane %v2154_v50, 4  ;;  %v2163_v13 = vshll.u32 %v5506_v63, 16  ;;  %v2149_v20 = vshll.u32 %v7383_v47, 16  ;;  %v2167_v57 = vshrl.u32 %v5506_v63, 16 }
  0x80   : > { %v1422_v32 = vrot.slane %v1420_v52, 4  ;;  %v2159_v60 = vrot.slane %v2157_v16, 5  ;;  %v5414_v61 = vcombine.low %v7339_v18, %v7362_v45  ;;  %v5415_v40 = vcombine.low %v7377_v11, %v1389_v1 }
  0x81   : > { %v2136_v6 = vor.u32 %v2135_v34, %v2132_v5  ;;  %v7407_v17 = vrot.slane %v2163_v13, 5  ;;  %v2146_v28 = vor.u32 %v2145_v4, %v7391_v30  ;;  %v2173_v50 = vshll.u32 %v5507_v8, 16  ;;  %v7434_v5 = vld [vmem:[%s6786_s13 + $0x34] sm:$0xf] }
  0x82   : > { %v2160_v56 = vor.u32 %v2159_v60, %v2156_v3  ;;  %v7419_v18 = vsel %vm7116_vm7, %v5403_v33, %v1420_v52  ;;  %v2178_v13 = vshrl.u32 %v5508_v15, 16  ;;  %v2181_v45 = vshll.u32 %v5508_v15, 16  ;;  %v5511_v52 = vld [vmem:[%s6786_s13 + $0x30] sm:$0xf] }
  0x83   : > { %6135 = vmatmul.mubr.msk.bf16.gmra.mxu0 %vm756_vm3, %v5412_v41  ;;  %v2169_v41 = vrot.slane %v2167_v57, 4  ;;  %v2187_v11 = vshll.u32 %v7396_v44, 16  ;;  %v9702_v3 = vcombine.low %v6805_v12, %v6809_v14  ;;  %v7428_v4 = vsel %vm7116_vm7, %v1422_v32, %v1423_v23 }
  0x84   : > { %6138 = vmatprep.mubr.msk.bf16.mxu0 %vm756_vm3, %v5413_v51  ;;  %v9701_v51 = vcombine.low %v7071_v62, %v7078_v55  ;;  %v2151_v62 = vrot.slane %v2149_v20, 5  ;;  %v2191_v63 = vshrl.u32 %v7396_v44, 16  ;;  %v2137_v34 = vrot.slane %v2136_v6, 4 }
  0x85   : > { %v2170_v55 = vor.u32 %v2169_v41, %v7407_v17  ;;  %v2180_v8 = vrot.slane %v2178_v13, 4  ;;  %v2183_v1 = vrot.slane %v2181_v45, 5  ;;  %v7436_v33 = vrot.slane %v2187_v11, 5  ;;  %v7442_v41 = vld [vmem:[%s6786_s13 + $0x38] sm:$0x1] }
  0x86   : > { %6101 = vmatmul.mubr.msk.bf16.gmra.mxu1 %vm756_vm3, %v9701_v51  ;;  %v2147_v12 = vrot.slane %v2146_v28, 4  ;;  %v2161_v14 = vrot.slane %v2160_v56, 4  ;;  %v2175_v16 = vrot.slane %v2173_v50, 5  ;;  %v2193_v23 = vrot.slane %v2191_v63, 4  ;;  %v5514_v13 = vld [vmem:[%s6786_s13 + $0x3c] sm:$0xf] }
  0x87   : > { %6104 = vmatprep.mubr.msk.bf16.mxu1 %vm756_vm3, %v9702_v3  ;;  %v2171_v15 = vrot.slane %v2170_v55, 4  ;;  %v2197_v32 = vshll.u32 %v7411_v21, 16  ;;  %v2202_v20 = vshrl.u32 %v5511_v52, 16  ;;  %v2205_v60 = vshll.u32 %v5511_v52, 16 }
  0x88   : > { %v2184_v57 = vor.u32 %v2183_v1, %v2180_v8  ;;  %v2194_v6 = vor.u32 %v2193_v23, %v7436_v33  ;;  %v2211_v28 = vshll.u32 %v7434_v5, 16  ;;  %v2215_v56 = vshrl.u32 %v7434_v5, 16  ;;  %v5517_v8 = vld [vmem:[%s6786_s13 + $0x48] sm:$0xf]  ;;  %v7469_v1 = vld [vmem:[%s6786_s13 + $0x4c] sm:$0xf] }
  0x89   : > { %v2204_v50 = vrot.slane %v2202_v20, 4  ;;  %v2207_v51 = vrot.slane %v2205_v60, 5  ;;  %v9703_v3 = vcombine.low %v6847_v53, %v6851_v58  ;;  %v5420_v55 = vcombine.low %v7419_v18, %v7428_v4 }
  0x8a   : > { %v7448_v45 = vrot.slane %v2211_v28, 5  ;;  %v2217_v11 = vrot.slane %v2215_v56, 4  ;;  %v2152_v63 = vsel %vm6830_vm4, %v2147_v12, %v2151_v62  ;;  %v2166_v52 = vsel %vm6830_vm4, %v2161_v14, %v7407_v17 }
  0x8b   : > { %6139 = vmatmul.mubr.msk.bf16.gmra.mxu0 %vm756_vm3, %v5414_v61  ;;  %v7451_v61 = vld [vmem:[%s6786_s13 + $0x40] sm:$0xf]  ;;  %v9704_v53 = vcombine.low %v6885_v35, %v6896_v46  ;;  %v2176_v58 = vsel %vm6830_vm4, %v2171_v15, %v2175_v16  ;;  %v2185_v23 = vrot.slane %v2184_v57, 4  ;;  %v2208_v20 = vor.u32 %v2207_v51, %v2204_v50  ;;  %v7503_v50 = vld [vmem:[%s6786_s13 + $0x44] sm:$0x1] }
  0x8c   : > { %6142 = vmatprep.mubr.msk.bf16.mxu0 %vm756_vm3, %v5415_v40  ;;  %v2142_v40 = vsel %vm6830_vm4, %v2137_v34, %v7391_v30  ;;  %v2195_v30 = vrot.slane %v2194_v6, 4  ;;  %v2199_v34 = vrot.slane %v2197_v32, 5  ;;  %v2221_v62 = vshll.u32 %v7442_v41, 16  ;;  %v5520_v51 = vld [vmem:[%s6786_s13 + $0x54] sm:$0xf] }
  0x8d   : > { %v2226_v12 = vshrl.u32 %v5514_v13, 16  ;;  %v2229_v17 = vshll.u32 %v5514_v13, 16  ;;  %v7480_v14 = vsel %vm805_vm0, %v7211_v22, 0  ;;  %v2218_v35 = vor.u32 %v2217_v11, %v7448_v45 }
  0x8e   : > { %6105 = vmatmul.mubr.msk.bf16.gmra.mxu1 %vm756_vm3, %v9703_v3  ;;  %v2235_v46 = vshll.u32 %v7451_v61, 16  ;;  %v2239_v16 = vshrl.u32 %v7451_v61, 16  ;;  %v7485_v15 = vcombine.low %v2142_v40, %v2152_v63  ;;  %v7489_v32 = vsel %vm805_vm0, %v7183_v24, 0  ;;  %v7512_v40 = vld [vmem:[%s6786_s13 + $0x58] sm:$0xf] }
  0x8f   : > { %6108 = vmatprep.mubr.msk.bf16.mxu1 %vm756_vm3, %v9704_v53  ;;  %v2250_v60 = vshrl.u32 %v5517_v8, 16  ;;  %v2253_v57 = vshll.u32 %v5517_v8, 16  ;;  %v9705_v6 = vcombine.low %v7298_v25, %v7308_v54  ;;  %v7495_v22 = vcombine.low %v2166_v52, %v2176_v58  ;;  %v7517_v8 = vld [vmem:[%s6786_s13 + $0x50] sm:$0x1] }
  0x90   : > { %v2190_v28 = vsel %vm6830_vm4, %v2185_v23, %v7436_v33  ;;  %v2200_v56 = vsel %vm6830_vm4, %v2195_v30, %v2199_v34  ;;  %v2259_v24 = vshll.u32 %v7469_v1, 16  ;;  %v9706_v25 = vcombine.low %v7312_v39, %v7322_v27  ;;  %v5523_v34 = vld [vmem:[%s6786_s13 + $0x60] sm:$0xf] }
  0x91   : > { %v2209_v54 = vrot.slane %v2208_v20, 4  ;;  %v2223_v13 = vrot.slane %v2221_v62, 5  ;;  %v2228_v11 = vrot.slane %v2226_v12, 4  ;;  %v2231_v3 = vrot.slane %v2229_v17, 5 }
  0x92   : > { %v2219_v33 = vrot.slane %v2218_v35, 4  ;;  %v7514_v63 = vrot.slane %v2235_v46, 5  ;;  %v2241_v52 = vrot.slane %v2239_v16, 4  ;;  %v2263_v53 = vshrl.u32 %v7469_v1, 16  ;;  %v7534_v35 = vld [vmem:[%s6786_s13 + $0x5c] sm:$0x1] }
  0x93   : > { %6143 = vmatmul.mubr.msk.bf16.gmra.mxu0 %vm756_vm3, %v9705_v6  ;;  %v9707_v39 = vcombine.low %v6935_v36, %v6942_v43  ;;  %v2252_v27 = vrot.slane %v2250_v60, 4  ;;  %v2255_v58 = vrot.slane %v2253_v57, 5  ;;  %v2274_v23 = vshrl.u32 %v5520_v51, 16 }
  0x94   : > { %6146 = vmatprep.mubr.msk.bf16.mxu0 %vm756_vm3, %v9706_v25  ;;  %v2277_v30 = vshll.u32 %v5520_v51, 16  ;;  %v9708_v20 = vcombine.low %v9691_v2, %v9690_v10  ;;  %v7529_v62 = vcombine.low %v2190_v28, %v2200_v56  ;;  %v7531_v12 = vrot.slane %v2259_v24, 5  ;;  %v7547_v28 = vld [vmem:[%s6786_s13 + $0x64] sm:$0xf] }
  0x95   : > { %v2265_v17 = vrot.slane %v2263_v53, 4  ;;  %v2283_v36 = vshll.u32 %v7512_v40, 16  ;;  %v2245_v43 = vshll.u32 %v7503_v50, 16  ;;  %v2276_v46 = vrot.slane %v2274_v23, 4 }
  0x96   : > { %6109 = vmatmul.mubr.msk.bf16.gmra.mxu1 %vm756_vm3, %v9707_v39  ;;  %v2279_v16 = vrot.slane %v2277_v30, 5  ;;  %v2287_v60 = vshrl.u32 %v7512_v40, 16  ;;  %v2214_v10 = vsel %vm6830_vm4, %v2209_v54, %v7448_v45  ;;  %v2224_v2 = vsel %vm6830_vm4, %v2219_v33, %v2223_v13  ;;  %v7569_v30 = vld [vmem:[%s6786_s13 + $0x68] sm:$0x1] }
  0x97   : > { %6112 = vmatprep.mubr.msk.bf16.mxu1 %vm756_vm3, %v9708_v20  ;;  %v2232_v57 = vor.u32 %v2231_v3, %v2228_v11  ;;  %v7544_v6 = vrot.slane %v2283_v36, 5  ;;  %v2242_v56 = vor.u32 %v2241_v52, %v7514_v63  ;;  %v2256_v24 = vor.u32 %v2255_v58, %v2252_v27  ;;  %v5526_v3 = vld [vmem:[%s6786_s13 + $0x6c] sm:$0xf]  ;;  %v7566_v27 = vld [vmem:[%s6786_s13 + $0x70] sm:$0xf] }
  0x98   : > { %v2269_v51 = vshll.u32 %v7517_v8, 16  ;;  %v2289_v25 = vrot.slane %v2287_v60, 4  ;;  %v9709_v53 = vcombine.low %v7332_v19, %v7352_v9  ;;  %v2266_v45 = vor.u32 %v2265_v17, %v7531_v12 }
  0x99   : > { %v2280_v54 = vor.u32 %v2279_v16, %v2276_v46  ;;  %v2298_v13 = vshrl.u32 %v5523_v34, 16  ;;  %v2301_v11 = vshll.u32 %v5523_v34, 16  ;;  %v9710_v33 = vcombine.low %v7344_v59, %v7368_v7  ;;  %v5529_v16 = vld [vmem:[%s6786_s13 + $0x78] sm:$0xf] }
  0x9a   : > { %v2290_v52 = vor.u32 %v2289_v25, %v7544_v6  ;;  %v2293_v39 = vshll.u32 %v7534_v35, 16  ;;  %v2307_v19 = vshll.u32 %v7547_v28, 16  ;;  %v2311_v9 = vshrl.u32 %v7547_v28, 16 }
  0x9b   : > { %6147 = vmatmul.mubr.msk.bf16.gmra.mxu0 %vm756_vm3, %v9709_v53  ;;  %v2233_v58 = vrot.slane %v2232_v57, 4  ;;  %v2247_v23 = vrot.slane %v2245_v43, 5  ;;  %v2300_v34 = vrot.slane %v2298_v13, 4  ;;  %v2303_v20 = vrot.slane %v2301_v11, 5 }
  0x9c   : > { %6150 = vmatprep.mubr.msk.bf16.mxu0 %vm756_vm3, %v9710_v33  ;;  %v9711_v59 = vcombine.low %v9694_v26, %v9693_v38  ;;  %v7575_v7 = vcombine.low %v2214_v10, %v2224_v2  ;;  %v2243_v17 = vrot.slane %v2242_v56, 4  ;;  %v2257_v36 = vrot.slane %v2256_v24, 4  ;;  %v7585_v2 = vld [vmem:[%s6786_s13 + $0x7c] sm:$0xf] }
  0x9d   : > { %v7577_v46 = vrot.slane %v2307_v19, 5  ;;  %v9712_v43 = vcombine.low %v9697_v42, %v9696_v48  ;;  %v2267_v60 = vrot.slane %v2266_v45, 4  ;;  %v2271_v57 = vrot.slane %v2269_v51, 5  ;;  %9713 = vst [vmem:[#allocation6_spill] sm:$0xff] %v7585_v2  ;;  %v5532_v19 = vld [vmem:[%s6786_s13 + $0x84] sm:$0xf] }
  0x9e   : > { %6113 = vmatmul.mubr.msk.bf16.gmra.mxu1 %vm756_vm3, %v9711_v59  ;;  %v2281_v25 = vrot.slane %v2280_v54, 4  ;;  %v2313_v38 = vrot.slane %v2311_v9, 4  ;;  %v2291_v26 = vrot.slane %v2290_v52, 4  ;;  %v2295_v53 = vrot.slane %v2293_v39, 5 }
  0x9f   : > { %6116 = vmatprep.mubr.msk.bf16.mxu1 %vm756_vm3, %v9712_v43  ;;  %v2304_v13 = vor.u32 %v2303_v20, %v2300_v34  ;;  %v2322_v10 = vshrl.u32 %v5526_v3, 16  ;;  %v2238_v56 = vsel %vm6830_vm4, %v2233_v58, %v7514_v63  ;;  %v2325_v24 = vshll.u32 %v5526_v3, 16  ;;  %v6444_v63 = vld [vmem:[%s6786_s13 + $0xc] sm:$0xff]   ;;  %v7619_v34 = vld [vmem:[%s6786_s13 + $0x88] sm:$0xf] }
  0xa0   : > { %v2331_v48 = vshll.u32 %v7566_v27, 16  ;;  %v2335_v42 = vshrl.u32 %v7566_v27, 16  ;;  %v2248_v51 = vsel %vm6830_vm4, %v2243_v17, %v2247_v23  ;;  %v2262_v45 = vsel %vm6830_vm4, %v2257_v36, %v7531_v12  ;;  %9714 = vst [vmem:[#allocation8_spill] sm:$0xff] %v7619_v34  ;;  %v7628_v36 = vld [vmem:[%s6786_s13 + $0x74] sm:$0x1] }
  0xa1   : > { %v2314_v54 = vor.u32 %v2313_v38, %v7577_v46  ;;  %v2317_v11 = vshll.u32 %v7569_v30, 16  ;;  %v2272_v3 = vsel %vm6830_vm4, %v2267_v60, %v2271_v57  ;;  %v2286_v33 = vsel %vm6830_vm4, %v2281_v25, %v7544_v6  ;;  %9716 = vst [vmem:[#allocation7_spill] sm:$0xff] %v7628_v36  ;;  %v7638_v38 = vld [vmem:[%s6786_s13 + $0x80] sm:$0x1] }
  0xa2   : > { %v2346_v52 = vshrl.u32 %v5529_v16, 16  ;;  %v2349_v12 = vshll.u32 %v5529_v16, 16  ;;  %v2296_v18 = vsel %vm6830_vm4, %v2291_v26, %v2295_v53  ;;  %v2305_v4 = vrot.slane %v2304_v13, 4  ;;  %9717 = vst [vmem:[#allocation9_spill] sm:$0xff] %v7638_v38  ;;  %v7641_v26 = vld [vmem:[%s6786_s13 + $0x8c] sm:$0x1] }
  0xa3   : > { %6151 = vmatmul.mubr.msk.bf16.gmra.mxu0 %vm756_vm3, %v5420_v55  ;;  %v2324_v55 = vrot.slane %v2322_v10, 4  ;;  %v2355_v39 = vshll.u32 %v7585_v2, 16  ;;  %v2327_v9 = vrot.slane %v2325_v24, 5  ;;  %v7615_v58 = vrot.slane %v2331_v48, 5  ;;  %9718 = vst [vmem:[#allocation11_spill] sm:$0xff] %v7641_v26  ;;  %v6445_v10 = vld [vmem:[%s6786_s13 + $0x18] sm:$0xff]  }
  0xa4   : > { %6190 = vmatprep.mubr.msk.bf16.mxu0 %vm756_vm3, %v7485_v15  ;;  %v2337_v23 = vrot.slane %v2335_v42, 4  ;;  %v2359_v6 = vshrl.u32 %v7585_v2, 16  ;;  %v9715_v15 = vcombine.low %v9699_v29, %v7095_v37  ;;  %v7625_v20 = vcombine.low %v2238_v56, %v2248_v51  ;;  %v5535_v51 = vld [vmem:[%s6786_s13 + $0x90] sm:$0xf] }
  0xa5   : > { %v2315_v59 = vrot.slane %v2314_v54, 4  ;;  %v2319_v17 = vrot.slane %v2317_v11, 5  ;;  %v2348_v16 = vrot.slane %v2346_v52, 4  ;;  %v2351_v43 = vrot.slane %v2349_v12, 5 }
  0xa6   : > { %6117 = vmatmul.mubr.msk.bf16.gmra.mxu1 %vm756_vm3, %v9715_v15  ;;  %v7631_v60 = vrot.slane %v2355_v39, 5  ;;  %v2361_v57 = vrot.slane %v2359_v6, 4  ;;  %v2370_v25 = vshrl.u32 %v5532_v19, 16  ;;  %v7633_v37 = vcombine.low %v2262_v45, %v2272_v3  ;;  %v7652_v45 = vld [vmem:[%s6786_s13 + $0x94] sm:$0xf] }
  0xa7   : > { %6156 = vmatprep.mubr.msk.bf16.mxu1 %vm756_vm3, %v6444_v63  ;;  %v7635_v29 = vcombine.low %v2286_v33, %v2296_v18  ;;  %v2373_v53 = vshll.u32 %v5532_v19, 16  ;;  %v2379_v13 = vshll.u32 %v7619_v34, 16  ;;  %v2310_v56 = vsel %vm6830_vm4, %v2305_v4, %v7577_v46  ;;  %9719 = vst [vmem:[#allocation10_spill] sm:$0xff] %v7652_v45  ;;  %v7660_v33 = vld [vmem:[%s9630_s1 + $0x10] sm:$0x3]  ;;  %v6446_v46 = vld [vmem:[%s6786_s13 + $0x24] sm:$0xff]  }
  0xa8   : > { %v2328_v24 = vor.u32 %v2327_v9, %v2324_v55  ;;  %v2338_v48 = vor.u32 %v2337_v23, %v7615_v58  ;;  %v2341_v42 = vshll.u32 %v7628_v36, 16  ;;  %v2372_v54 = vrot.slane %v2370_v25, 4  ;;  %9720 = vst [vmem:[#allocation12_spill] sm:$0xff] %v7660_v33 }
  0xa9   : > { %v2375_v11 = vrot.slane %v2373_v53, 5  ;;  %v7654_v63 = vrot.slane %v2379_v13, 5  ;;  %v2383_v3 = vshrl.u32 %v7619_v34, 16  ;;  %v2320_v52 = vsel %vm6830_vm4, %v2315_v59, %v2319_v17 }
  0xaa   : > { %v2352_v12 = vor.u32 %v2351_v43, %v2348_v16  ;;  %v2362_v18 = vor.u32 %v2361_v57, %v7631_v60  ;;  %v2365_v4 = vshll.u32 %v7638_v38, 16  ;;  %v2394_v19 = vshrl.u32 %v5535_v51, 16  ;;  %v7694_v57 = vld [vmem:[%s6786_s13 + $0xa0] sm:$0xf] }
  0xab   : > { %6191 = vmatmul.mubr.msk.bf16.vlgmr.msra.gmra.mxu0 %vm756_vm3, %v7495_v22  ;;  %v2376_v55 = vor.u32 %v2375_v11, %v2372_v54  ;;  %v2385_v39 = vrot.slane %v2383_v3, 4  ;;  %v2397_v9 = vshll.u32 %v5535_v51, 16  ;;  %v5538_v22 = vld [vmem:[%s6786_s13 + $0x9c] sm:$0xf]  ;;  %v7673_v23 = vrot.slane %v2328_v24, 4  ;;  %9722 = vst [vmem:[#allocation13_spill] sm:$0xff] %v7694_v57 }
  0xac   : > { %6257 = vmatpush3.bf16.msra.mxu0 %v7489_v32  ;;  %6194 = vmatprep.mubr.msk.bf16.mxu0 %vm756_vm3, %v7529_v62  ;;  %v7675_v6 = vrot.slane %v2341_v42, 5  ;;  %v2389_v15 = vshll.u32 %v7641_v26, 16  ;;  %v2403_v59 = vshll.u32 %v7652_v45, 16  ;;  %v7682_v32 = vld [vmem:[%s9630_s1 + $0xe] sm:$0x3]  ;;  %v7687_v62 = vcombine.low %v2310_v56, %v2320_v52 }
  0xad   : > { %9721 = vst [vmem:[#allocation14_spill] sm:$0xff] %v7682_v32  ;;  %6369 = vmatprep.subr.msk.bf16.mxu0 %vm805_vm0, %v7660_v33  ;;  %v7689_v17 = vrot.slane %v2338_v48, 4  ;;  %v2386_v16 = vor.u32 %v2385_v39, %v7654_v63  ;;  %v2407_v43 = vshrl.u32 %v7652_v45, 16  ;;  %v7698_v25 = vrot.slane %v2352_v12, 4  ;;  %v7707_v56 = vld [vmem:[%s6786_s13 + $0x98] sm:$0x1] }
  0xae   : > { %6157 = vmatmul.mubr.msk.bf16.vlgmr.msra.gmra.mxu1 %vm756_vm3, %v6445_v10  ;;  %v7700_v53 = vrot.slane %v2362_v18, 4  ;;  %v7702_v13 = vrot.slane %v2365_v4, 5  ;;  %v7704_v10 = vrot.slane %v2376_v55, 4  ;;  %9723 = vst [vmem:[#allocation15_spill] sm:$0xff] %v7707_v56  ;;  %v2396_v24 = vrot.slane %v2394_v19, 4  ;;  %v6448_v19 = vld [vmem:[%s6786_s13 + $0x3c] sm:$0xff]  }
  0xaf   : > { %6223 = vmatpush3.bf16.msra.mxu1 %v7480_v14  ;;  %6160 = vmatprep.mubr.msk.bf16.mxu1 %vm756_vm3, %v6446_v46  ;;  %v2399_v48 = vrot.slane %v2397_v9, 5  ;;  %v2418_v42 = vshrl.u32 %v5538_v22, 16  ;;  %v2421_v51 = vshll.u32 %v5538_v22, 16  ;;  %v6447_v14 = vld [vmem:[%s6786_s13 + $0x30] sm:$0xff]   ;;  %v7716_v11 = vrot.slane %v2389_v15, 5 }
  0xb0   : > { %6368 = vmatprep.subr.msk.bf16.mxu1 %vm805_vm0, %v7682_v32  ;;  %v7718_v3 = vrot.slane %v2403_v59, 5  ;;  %v2427_v46 = vshll.u32 %v7694_v57, 16  ;;  %v5541_v52 = vld [vmem:[%s6786_s13 + $0xa8] sm:$0xf]  ;;  %v7722_v12 = vrot.slane %v2386_v16, 4  ;;  %v2409_v18 = vrot.slane %v2407_v43, 4 }
  0xb1   : > { %v2413_v4 = vshll.u32 %v7707_v56, 16  ;;  %v2431_v55 = vshrl.u32 %v7694_v57, 16  ;;  %v7727_v39 = vld [vmem:[%s6786_s13 + $0xac] sm:$0xf]  ;;  %v2400_v59 = vor.u32 %v2399_v48, %v2396_v24  ;;  %v7751_v16 = vld [vmem:[%s6786_s13 + $0xa4] sm:$0x1] }
  0xb2   : > { %9724 = vst [vmem:[#allocation16_spill] sm:$0xff] %v7727_v39  ;;  %9725 = vst [vmem:[#allocation5_spill] sm:$0xff] %v7751_v16  ;;  %v2420_v43 = vrot.slane %v2418_v42, 4  ;;  %v2423_v22 = vrot.slane %v2421_v51, 5  ;;  %v2442_v54 = vshrl.u32 %v5541_v52, 16  ;;  %v7753_v9 = vrot.slane %v2427_v46, 5 }
  0xb3   : > { %6195 = vmatmul.mubr.msk.bf16.gmra.mxu0 %vm756_vm3, %v7575_v7  ;;  %v2433_v32 = vrot.slane %v2431_v55, 4  ;;  %v2445_v15 = vshll.u32 %v5541_v52, 16  ;;  %v2451_v33 = vshll.u32 %v7727_v39, 16  ;;  %v5544_v57 = vld [vmem:[%s6786_s13 + $0xb4] sm:$0xf]  ;;  %v2410_v24 = vor.u32 %v2409_v18, %v7718_v3 }
  0xb4   : > { %6198 = vmatprep.mubr.msk.bf16.mxu0 %vm756_vm3, %v7625_v20  ;;  %v2392_v20 = vsel %vm6830_vm4, %v7722_v12, %v7716_v11  ;;  %v7763_v48 = vrot.slane %v2413_v4, 5  ;;  %v7766_v42 = vld [vmem:[%s6786_s13 + $0xb0] sm:$0x1]  ;;  %v2444_v51 = vrot.slane %v2442_v54, 4  ;;  %v7769_v46 = vld [vmem:[%s6786_s13 + $0xb8] sm:$0xf]  ;;  %v2424_v18 = vor.u32 %v2423_v22, %v2420_v43 }
  0xb5   : > { %9726 = vst [vmem:[#allocation17_spill] sm:$0xff] %v7766_v42  ;;  %9727 = vst [vmem:[#allocation18_spill] sm:$0xff] %v7769_v46  ;;  %v2447_v52 = vrot.slane %v2445_v15, 5  ;;  %v7773_v55 = vrot.slane %v2451_v33, 5  ;;  %v2455_v11 = vshrl.u32 %v7727_v39, 16  ;;  %v7776_v12 = vrot.slane %v2400_v59, 4 }
  0xb6   : > { %6161 = vmatmul.mubr.msk.bf16.gmra.mxu1 %vm756_vm3, %v6447_v14  ;;  %v2437_v14 = vshll.u32 %v7751_v16, 16  ;;  %v7779_v4 = vld [vmem:[%s6786_s13 + $0xbc] sm:$0x1]  ;;  %v2466_v54 = vshrl.u32 %v5544_v57, 16  ;;  %v2469_v7 = vshll.u32 %v5544_v57, 16  ;;  %v2434_v56 = vor.u32 %v2433_v32, %v7753_v9  ;;  %v6449_v16 = vld [vmem:[%s6786_s13 + $0x48] sm:$0xff]  }
  0xb7   : > { %6164 = vmatprep.mubr.msk.bf16.mxu1 %vm756_vm3, %v6448_v19  ;;  %v2457_v45 = vrot.slane %v2455_v11, 4  ;;  %v2461_v19 = vshll.u32 %v7766_v42, 16  ;;  %v2475_v15 = vshll.u32 %v7769_v46, 16  ;;  %v5547_v33 = vld [vmem:[%s6786_s13 + $0xc0] sm:$0xf]  ;;  %v2448_v26 = vor.u32 %v2447_v52, %v2444_v51  ;;  %v6450_v57 = vld [vmem:[%s6786_s13 + $0x54] sm:$0xff]  }
  0xb8   : > { %v2468_v39 = vrot.slane %v2466_v54, 4  ;;  %v2471_v34 = vrot.slane %v2469_v7, 5  ;;  %v2479_v59 = vshrl.u32 %v7769_v46, 16  ;;  %v7788_v22 = vld [vmem:[%s6786_s13 + $0xc4] sm:$0xf]  ;;  %v2411_v43 = vrot.slane %v2410_v24, 4 }
  0xb9   : > { %v2439_v32 = vrot.slane %v2437_v14, 5  ;;  %v2458_v11 = vor.u32 %v2457_v45, %v7773_v55  ;;  %v2477_v42 = vrot.slane %v2475_v15, 5  ;;  %v2485_v7 = vshll.u32 %v7779_v4, 16  ;;  %v7800_v45 = vld [vmem:[%s6786_s13 + $0xc8] sm:$0x1] }
  0xba   : > { %v2472_v51 = vor.u32 %v2471_v34, %v2468_v39  ;;  %v2481_v52 = vrot.slane %v2479_v59, 4  ;;  %v2490_v54 = vshrl.u32 %v5547_v33, 16  ;;  %v2425_v46 = vrot.slane %v2424_v18, 4 }
  0xbb   : > { %6199 = vmatmul.mubr.msk.bf16.gmra.mxu0 %vm756_vm3, %v7633_v37  ;;  %v2435_v38 = vrot.slane %v2434_v56, 4  ;;  %v2493_v2 = vshll.u32 %v5547_v33, 16  ;;  %v2499_v37 = vshll.u32 %v7788_v22, 16  ;;  %v2449_v24 = vrot.slane %v2448_v26, 4 }
  0xbc   : > { %6202 = vmatprep.mubr.msk.bf16.mxu0 %vm756_vm3, %v7635_v29  ;;  %v2463_v14 = vrot.slane %v2461_v19, 5  ;;  %v2482_v36 = vor.u32 %v2481_v52, %v2477_v42  ;;  %v2492_v15 = vrot.slane %v2490_v54, 4  ;;  %v2459_v34 = vrot.slane %v2458_v11, 4 }
  0xbd   : > { %v2495_v29 = vrot.slane %v2493_v2, 5  ;;  %v7803_v39 = vrot.slane %v2499_v37, 5  ;;  %v2503_v56 = vshrl.u32 %v7788_v22, 16  ;;  %v9728_v26 = vsel %vm6830_vm4, %v7689_v17, %v7675_v6 }
  0xbe   : > { %6165 = vmatmul.mubr.msk.bf16.gmra.mxu1 %vm756_vm3, %v6449_v16  ;;  %v9729_v16 = vsel %vm6830_vm4, %v7673_v23, %v7615_v58  ;;  %v2473_v19 = vrot.slane %v2472_v51, 4  ;;  %v2483_v33 = vrot.slane %v2482_v36, 4  ;;  %v2487_v2 = vrot.slane %v2485_v7, 5  ;;  %v6451_v23 = vld [vmem:[%s6786_s13 + $0x60] sm:$0xff]  }
  0xbf   : > { %6168 = vmatprep.mubr.msk.bf16.mxu1 %vm756_vm3, %v6450_v57  ;;  %v5559_v18 = vcombine.low %v9729_v16, %v9728_v26  ;;  %v9730_v59 = vsel %vm6830_vm4, %v7700_v53, %v7702_v13  ;;  %v9731_v6 = vsel %vm6830_vm4, %v7698_v25, %v7631_v60  ;;  %v2496_v57 = vor.u32 %v2495_v29, %v2492_v15  ;;  %v5585_v13 = vld [vmem:[%s6786_s13 + $0x24] sm:$0xe]  ;;  %v5588_v26 = vld [vmem:[%s6786_s13 + $0x48] sm:$0xe] }
  0xc0   : > { %v5560_v17 = vcombine.low %v9731_v6, %v9730_v59  ;;  %v2505_v11 = vrot.slane %v2503_v56, 4  ;;  %v2509_v58 = vshll.u32 %v7800_v45, 16  ;;  %v9732_v36 = vsel %vm6830_vm4, %v7704_v10, %v7654_v63  ;;  %v6452_v63 = vld [vmem:[%s6786_s13 + $0x6c] sm:$0xff]   ;;  %v5589_v6 = vld [vmem:[%s6786_s13 + $0x54] sm:$0xe] }
  0xc1   : > { %v5561_v51 = vcombine.low %v9732_v36, %v2392_v20  ;;  %v2406_v53 = vsel %vm6830_vm4, %v7776_v12, %v7718_v3  ;;  %v2416_v60 = vsel %vm6830_vm4, %v2411_v43, %v7763_v48  ;;  %v2430_v25 = vsel %vm6830_vm4, %v2425_v46, %v7753_v9  ;;  %v7856_v12 = vld [vmem:[%s6786_s13 + $0xc] sm:$0xe] }
  0xc2   : > { %v2440_v10 = vsel %vm6830_vm4, %v2435_v38, %v2439_v32  ;;  %v2454_v3 = vsel %vm6830_vm4, %v2449_v24, %v7773_v55  ;;  %v2464_v20 = vsel %vm6830_vm4, %v2459_v34, %v2463_v14  ;;  %v2506_v48 = vor.u32 %v2505_v11, %v7803_v39  ;;  %v5586_v55 = vld [vmem:[%s6786_s13 + $0x30] sm:$0xe]  ;;  %v5587_v14 = vld [vmem:[%s6786_s13 + $0x3c] sm:$0xe] }
  0xc3   : > { %6203 = vmatmul.mubr.msk.bf16.gmra.mxu0 %vm756_vm3, %v7687_v62  ;;  %v2478_v62 = vsel %vm6830_vm4, %v2473_v19, %v2477_v42  ;;  %v2488_v38 = vsel %vm6830_vm4, %v2483_v33, %v2487_v2  ;;  %v7863_v9 = vrot.slane %v2496_v57, 4  ;;  %v2873_v46 = vrot.slane %v7347_v49, 5  ;;  %v6453_v57 = vld [vmem:[%s6786_s13 + $0x78] sm:$0xff]  }
  0xc4   : > { %6206 = vmatprep.mubr.msk.bf16.mxu0 %vm756_vm3, %v5559_v18  ;;  %v7867_v43 = vcombine.low %v2406_v53, %v2416_v60  ;;  %v7869_v32 = vrot.slane %v2506_v48, 4  ;;  %v7871_v52 = vrot.slane %v2509_v58, 5  ;;  %v5601_v7 = vrot.slane %v5585_v13, 9  ;;  %v6454_v53 = vld [vmem:[%s6786_s13 + $0x84] sm:$0xff]   ;;  %v5590_v13 = vld [vmem:[%s6786_s13 + $0x60] sm:$0xe] }
  0xc5   : > { %v7874_v54 = vcombine.low %v2430_v25, %v2440_v10  ;;  %v7876_v42 = vcombine.low %v2454_v3, %v2464_v20  ;;  %v5599_v37 = vrot.slane %v7856_v12, 9  ;;  %v2887_v24 = vrot.slane %v7396_v44, 5  ;;  %v6460_v49 = vld [vmem:[%s6786_s13 + $0x18] sm:$0xff]  }
  0xc6   : > { %6169 = vmatmul.mubr.msk.bf16.gmra.mxu1 %vm756_vm3, %v6451_v23  ;;  %v7882_v15 = vcombine.low %v2478_v62, %v2488_v38  ;;  %v2876_v34 = vrot.slane %v7383_v47, 5  ;;  %v2890_v29 = vrot.slane %v7411_v21, 5  ;;  %v5602_v56 = vrot.slane %v5586_v55, 9  ;;  %v5592_v55 = vld [vmem:[%s6786_s13 + $0x78] sm:$0xe] }
  0xc7   : > { %6172 = vmatprep.mubr.msk.bf16.mxu1 %vm756_vm3, %v6452_v63  ;;  %v2502_v16 = vsel %vm6830_vm4, %v7863_v9, %v7803_v39  ;;  %v7893_v44 = vrot.slane %v2873_v46, 4  ;;  %v7897_v18 = vsel %vm7116_vm7, %v5601_v7, %v2887_v24  ;;  %v2889_v19 = vrot.slane %v2887_v24, 4 }
  0xc8   : > { %v2512_v21 = vsel %vm6830_vm4, %v7869_v32, %v7871_v52  ;;  %v2894_v33 = vrot.slane %v7434_v5, 5  ;;  %v2897_v2 = vrot.slane %v7442_v41, 5  ;;  %v5603_v59 = vrot.slane %v5587_v14, 9  ;;  %v6459_v52 = vld [vmem:[%s6786_s13 + $0xc0] sm:$0xff]  }
  0xc9   : > { %v7909_v11 = vsel %vm7116_vm7, %v2889_v19, %v2890_v29  ;;  %v2901_v58 = vrot.slane %v7451_v61, 5  ;;  %v2904_v23 = vrot.slane %v7503_v50, 5  ;;  %v5604_v36 = vrot.slane %v5588_v26, 9  ;;  %v5593_v19 = vld [vmem:[%s6786_s13 + $0x84] sm:$0xe] }
  0xca   : > { %v5618_v5 = vcombine.low %v7897_v18, %v7909_v11  ;;  %v7919_v41 = vsel %vm7116_vm7, %v5602_v56, %v2894_v33  ;;  %v2896_v60 = vrot.slane %v2894_v33, 4  ;;  %v2908_v25 = vrot.slane %v7469_v1, 5 }
  0xcb   : > { %6207 = vmatmul.mubr.msk.bf16.gmra.mxu0 %vm756_vm3, %v5560_v17  ;;  %v7926_v61 = vsel %vm7116_vm7, %v5603_v59, %v2901_v58  ;;  %v2903_v50 = vrot.slane %v2901_v58, 4  ;;  %v2911_v17 = vrot.slane %v7517_v8, 5  ;;  %v5605_v63 = vrot.slane %v5589_v6, 9  ;;  %v9733_v59 = vld [vmem:[#allocation7_spill] sm:$0xff] }
  0xcc   : > { %6210 = vmatprep.mubr.msk.bf16.mxu0 %vm756_vm3, %v5561_v51  ;;  %v7931_v10 = vsel %vm7116_vm7, %v2896_v60, %v2897_v2  ;;  %v7935_v3 = vsel %vm7116_vm7, %v5604_v36, %v2908_v25  ;;  %v2910_v1 = vrot.slane %v2908_v25, 4  ;;  %v2915_v20 = vrot.slane %v7512_v40, 5  ;;  %v5591_v51 = vld [vmem:[%s6786_s13 + $0x6c] sm:$0xe]  ;;  %v6455_v58 = vld [vmem:[%s6786_s13 + $0x90] sm:$0xff]  }
  0xcd   : > { %v5619_v48 = vcombine.low %v7919_v41, %v7931_v10  ;;  %v7944_v8 = vsel %vm7116_vm7, %v2903_v50, %v2904_v23  ;;  %v2918_v62 = vrot.slane %v7534_v35, 5  ;;  %v5606_v38 = vrot.slane %v5590_v13, 9  ;;  %v9734_v36 = vld [vmem:[#allocation6_spill] sm:$0xff]  ;;  %v5594_v60 = vld [vmem:[%s6786_s13 + $0x90] sm:$0xe]  ;;  %v9735_v50 = vld [vmem:[#allocation9_spill] sm:$0xff] }
  0xce   : > { %6173 = vmatmul.mubr.msk.bf16.gmra.mxu1 %vm756_vm3, %v6453_v57  ;;  %v5620_v40 = vcombine.low %v7926_v61, %v7944_v8  ;;  %v7953_v7 = vsel %vm7116_vm7, %v2910_v1, %v2911_v17  ;;  %v7957_v24 = vsel %vm7116_vm7, %v5605_v63, %v2915_v20  ;;  %v2917_v14 = vrot.slane %v2915_v20, 4 }
  0xcf   : > { %6176 = vmatprep.mubr.msk.bf16.mxu1 %vm756_vm3, %v6454_v53  ;;  %v5621_v35 = vcombine.low %v7935_v3, %v7953_v7  ;;  %v2922_v29 = vrot.slane %v7547_v28, 5  ;;  %v2925_v56 = vrot.slane %v7569_v30, 5  ;;  %v5607_v26 = vrot.slane %v5591_v51, 9  ;;  %v9736_v51 = vld [vmem:[#allocation8_spill] sm:$0xff]  ;;  %v5725_v3 = vld [vmem:[%s6786_s13 + $0x48] sm:$0xf] }
  0xd0   : > { %v7966_v33 = vsel %vm7116_vm7, %v2917_v14, %v2918_v62  ;;  %v2929_v2 = vrot.slane %v7566_v27, 5  ;;  %v2932_v6 = vrot.slane %v9733_v59, 5  ;;  %v5608_v57 = vrot.slane %v5592_v55, 9  ;;  %v6456_v27 = vld [vmem:[%s6786_s13 + $0x9c] sm:$0xff]   ;;  %v9744_v55 = vld [vmem:[#allocation18_spill] sm:$0xff] }
  0xd1   : > { %v5622_v23 = vcombine.low %v7957_v24, %v7966_v33  ;;  %v7975_v28 = vsel %vm7116_vm7, %v5606_v38, %v2922_v29  ;;  %v2924_v30 = vrot.slane %v2922_v29, 4  ;;  %v2936_v53 = vrot.slane %v9734_v36, 5  ;;  %v5595_v38 = vld [vmem:[%s6786_s13 + $0x9c] sm:$0xe]  ;;  %v9739_v36 = vld [vmem:[#allocation15_spill] sm:$0xff] }
  0xd2   : > { %v7984_v25 = vsel %vm7116_vm7, %v5607_v26, %v2929_v2  ;;  %v2931_v13 = vrot.slane %v2929_v2, 4  ;;  %v2939_v17 = vrot.slane %v9735_v50, 5  ;;  %v5609_v63 = vrot.slane %v5593_v19, 9  ;;  %v5596_v26 = vld [vmem:[%s6786_s13 + $0xa8] sm:$0xe] }
  0xd3   : > { %6211 = vmatmul.mubr.msk.bf16.gmra.mxu0 %vm756_vm3, %v7867_v43  ;;  %v7991_v1 = vsel %vm7116_vm7, %v2924_v30, %v2925_v56  ;;  %v7995_v43 = vsel %vm7116_vm7, %v5608_v57, %v2936_v53  ;;  %v2938_v20 = vrot.slane %v2936_v53, 4  ;;  %v2943_v62 = vrot.slane %v9736_v51, 5  ;;  %v5598_v57 = vld [vmem:[%s6786_s13 + $0xc0] sm:$0xe]  ;;  %v6457_v19 = vld [vmem:[%s6786_s13 + $0xa8] sm:$0xff]  }
  0xd4   : > { %6214 = vmatprep.mubr.msk.bf16.mxu0 %vm756_vm3, %v7874_v54  ;;  %v8003_v14 = vsel %vm7116_vm7, %v2931_v13, %v2932_v6  ;;  %v9737_v54 = vld [vmem:[#allocation11_spill] sm:$0xff]  ;;  %v5610_v56 = vrot.slane %v5594_v60, 9  ;;  %v2953_v53 = vrot.slane %v9739_v36, 5  ;;  %v5611_v60 = vrot.slane %v5595_v38, 9  ;;  %v9742_v38 = vld [vmem:[#allocation16_spill] sm:$0xff] }
  0xd5   : > { %v2946_v29 = vrot.slane %v9737_v54, 5  ;;  %v8012_v2 = vsel %vm7116_vm7, %v2938_v20, %v2939_v17  ;;  %v8016_v59 = vsel %vm7116_vm7, %v5609_v63, %v2943_v62  ;;  %v2945_v6 = vrot.slane %v2943_v62, 4  ;;  %v5597_v13 = vld [vmem:[%s6786_s13 + $0xb4] sm:$0xe]  ;;  %v9740_v17 = vld [vmem:[#allocation13_spill] sm:$0xff] }
  0xd6   : > { %6177 = vmatmul.mubr.msk.bf16.gmra.mxu1 %vm756_vm3, %v6455_v58  ;;  %v9738_v58 = vld [vmem:[#allocation10_spill] sm:$0xff]  ;;  %v2957_v63 = vrot.slane %v9740_v17, 5  ;;  %v9741_v20 = vld [vmem:[#allocation5_spill] sm:$0xff]  ;;  %v5612_v62 = vrot.slane %v5596_v26, 9  ;;  %v2964_v36 = vrot.slane %v9742_v38, 5  ;;  %v5613_v26 = vrot.slane %v5597_v13, 9 }
  0xd7   : > { %6180 = vmatprep.mubr.msk.bf16.mxu1 %vm756_vm3, %v6456_v27  ;;  %v2950_v30 = vrot.slane %v9738_v58, 5  ;;  %v8026_v50 = vsel %vm7116_vm7, %v2945_v6, %v2946_v29  ;;  %v2960_v51 = vrot.slane %v9741_v20, 5  ;;  %v9743_v17 = vld [vmem:[#allocation17_spill] sm:$0xff]  ;;  %v6458_v27 = vld [vmem:[%s6786_s13 + $0xb4] sm:$0xff]   ;;  %v2877_v39 = vsel %vm7116_vm7, %v7893_v44, %v2876_v34  ;;  %v8243_v7 = vld [vmem:[%s6786_s13 + $0x4c] sm:$0xf] }
  0xd8   : > { %v8041_v29 = vsel %vm7116_vm7, %v5611_v60, %v2957_v63  ;;  %v2959_v6 = vrot.slane %v2957_v63, 4  ;;  %v2967_v20 = vrot.slane %v9743_v17, 5  ;;  %v2966_v38 = vrot.slane %v2964_v36, 4  ;;  %v6605_v44 = vld [vmem:[%s6786_s13 + $0x20] sm:$0x1] }
  0xd9   : > { %v8034_v54 = vsel %vm7116_vm7, %v5610_v56, %v2950_v30  ;;  %v2952_v58 = vrot.slane %v2950_v30, 4  ;;  %v8053_v30 = vsel %vm7116_vm7, %v5612_v62, %v2964_v36  ;;  %v2971_v60 = vrot.slane %v9744_v55, 5 }
  0xda   : > { %v5614_v63 = vrot.slane %v5598_v57, 9  ;;  %v8069_v55 = vsel %vm7116_vm7, %v2966_v38, %v2967_v20  ;;  %v2978_v57 = vrot.slane %v7788_v22, 5  ;;  %v2874_v22 = vsel %vm7116_vm7, %v5599_v37, %v2873_v46  ;;  %v6462_v38 = vld [vmem:[%s6786_s13 + $0x30] sm:$0xff]  }
  0xdb   : > { %6215 = vmatmul.mubr.msk.bf16.gmra.mxu0 %vm756_vm3, %v7876_v42  ;;  %v8049_v56 = vsel %vm7116_vm7, %v2952_v58, %v2953_v53  ;;  %v8062_v42 = vsel %vm7116_vm7, %v2959_v6, %v2960_v51  ;;  %v2974_v53 = vrot.slane %v7779_v4, 5  ;;  %v2973_v58 = vrot.slane %v2971_v60, 4 }
  0xdc   : > { %6218 = vmatprep.mubr.msk.bf16.mxu0 %vm756_vm3, %v7882_v15  ;;  %v8073_v15 = vsel %vm7116_vm7, %v5613_v26, %v2971_v60  ;;  %v2981_v51 = vrot.slane %v7800_v45, 5  ;;  %v5584_v45 = vld [vmem:[%s6786_s13 + $0x18] sm:$0xe]  ;;  %v8113_v9 = vsel %vm7116_vm7, %v5614_v63, %v2978_v57  ;;  %v2980_v46 = vrot.slane %v2978_v57, 4  ;;  %v6461_v26 = vld [vmem:[%s6786_s13 + $0x24] sm:$0xff]  }
  0xdd   : > { %v8101_v32 = vsel %vm7116_vm7, %v2973_v58, %v2974_v53  ;;  %v5600_v37 = vrot.slane %v5584_v45, 9  ;;  %v5616_v34 = vcombine.low %v2874_v22, %v2877_v39  ;;  %v9745_v60 = vld [vmem:[#allocation12_spill] sm:$0xff] }
  0xde   : > { %6181 = vmatmul.mubr.msk.bf16.gmra.mxu1 %vm756_vm3, %v6457_v19  ;;  %v5566_v19 = vcombine.low %v2502_v16, %v2512_v21  ;;  %v8118_v47 = vsel %vm7116_vm7, %v2980_v46, %v2981_v51  ;;  %v2883_v21 = vrot.slane %v6605_v44, 5  ;;  %v4640_v53 = vsel %vm805_vm0, %v9745_v60, 0  ;;  %v5713_v63 = vld [vmem:[%s6786_s13 + $0x18] sm:$0xf]  ;;  %v5714_v57 = vld [vmem:[%s6786_s13 + $0x1c] sm:$0xf] }
  0xdf   : > { %6184 = vmatprep.mubr.msk.bf16.mxu1 %vm756_vm3, %v6458_v27  ;;  %v6604_v27 = vld [vmem:[%s6786_s13 + $0x1c] sm:$0xf]  ;;  %v5716_v51 = vld [vmem:[%s6786_s13 + $0x24] sm:$0xf]  ;;  %v3688_v45 = vshrl.u32 %v5713_v63, 16  ;;  %v3697_v39 = vshll.u32 %v5714_v57, 16 }
  0xe0   : > { %v2880_v36 = vrot.slane %v6604_v27, 5  ;;  %v3691_v27 = vshll.u32 %v5713_v63, 16  ;;  %v3712_v46 = vshrl.u32 %v5716_v51, 16  ;;  %v6464_v44 = vld [vmem:[%s6786_s13 + $0x48] sm:$0xff]   ;;  %v5794_v60 = vld [vmem:[%s6786_s13 + $0x18] sm:$0xe] }
  0xe1   : > { %v8159_v63 = vld [vmem:[%s6786_s13 + $0x2c] sm:$0x1] }
  0xe2   : > { %v2882_v16 = vrot.slane %v2880_v36, 4  ;;  %v2881_v17 = vsel %vm7116_vm7, %v5600_v37, %v2880_v36  ;;  %v8143_v36 = vld [vmem:[%s6786_s13 + $0x28] sm:$0xf]  ;;  %v6463_v37 = vld [vmem:[%s6786_s13 + $0x3c] sm:$0xff]   ;;  %v3714_v18 = vrot.slane %v3712_v46, 4 }
  0xe3   : > { %6219 = vmatmul.mubr.msk.bf16.gmra.mxu0 %vm756_vm3, %v5566_v19  ;;  %v9746_v19 = vld [vmem:[#allocation14_spill] sm:$0xff] }
  0xe4   : > { %6258 = vmatprep.mubr.msk.bf16.mxu0 %vm756_vm3, %v6460_v49  ;;  %v2884_v20 = vsel %vm7116_vm7, %v2882_v16, %v2883_v21  ;;  %v4170_v22 = vsel %vm805_vm0, %v9746_v19, 0  ;;  %v3701_v49 = vshrl.u32 %v5714_v57, 16  ;;  %v3725_v16 = vshrl.u32 %v8143_v36, 16  ;;  %v5715_v21 = vld [vmem:[%s6786_s13 + $0x20] sm:$0x1] }
  0xe5   : > { %v5617_v58 = vcombine.low %v2881_v17, %v2884_v20  ;;  %v3690_v17 = vrot.slane %v3688_v45, 4  ;;  %v3693_v20 = vrot.slane %v3691_v27, 5  ;;  %v5719_v19 = vld [vmem:[%s6786_s13 + $0x30] sm:$0xf]  ;;  %v3707_v45 = vshll.u32 %v5715_v21, 16 }
  0xe6   : > { %6185 = vmatmul.mubr.msk.bf16.gmra.mxu1 %vm756_vm3, %v6459_v52  ;;  %v3715_v52 = vshll.u32 %v5716_v51, 16  ;;  %v3727_v51 = vrot.slane %v3725_v16, 4  ;;  %v5810_v27 = vrot.slane %v5794_v60, 9  ;;  %v4434_v46 = vrot.slane %v5715_v21, 5  ;;  %v5795_v16 = vld [vmem:[%s6786_s13 + $0x24] sm:$0xe] }
  0xe7   : > { %6224 = vmatprep.mubr.msk.bf16.mxu1 %vm756_vm3, %v5616_v34  ;;  %v3721_v34 = vshll.u32 %v8143_v36, 16  ;;  %v6465_v21 = vld [vmem:[%s6786_s13 + $0x54] sm:$0xff]   ;;  %v3739_v10 = vshll.u32 %v5719_v19, 16  ;;  %v6466_v60 = vld [vmem:[%s6786_s13 + $0x60] sm:$0xff]  }
  0xe8   : > { %v3717_v11 = vrot.slane %v3715_v52, 5  ;;  %v3731_v52 = vshll.u32 %v8159_v63, 16 }
  0xeb   : > { %6259 = vmatmul.mubr.msk.bf16.vlgmr.msra.gmra.mxu0 %vm756_vm3, %v6461_v26  ;;  %v8155_v26 = vrot.slane %v3697_v39, 5 }
  0xec   : > { %6325 = vmatpush3.bf16.msra.mxu0 %v4640_v53  ;;  %6262 = vmatprep.mubr.msk.bf16.mxu0 %vm756_vm3, %v6462_v38  ;;  %v3703_v38 = vrot.slane %v3701_v49, 4  ;;  %v4431_v53 = vrot.slane %v5714_v57, 5  ;;  %v8169_v57 = vld [vmem:[%s6786_s13 + $0x34] sm:$0xf] }
  0xee   : > { %6225 = vmatmul.mubr.msk.bf16.vlgmr.msra.gmra.mxu1 %vm756_vm3, %v5617_v58  ;;  %v8164_v58 = vrot.slane %v3721_v34, 5  ;;  %v3704_v39 = vor.u32 %v3703_v38, %v8155_v26  ;;  %v4433_v49 = vrot.slane %v4431_v53, 4  ;;  %v3718_v34 = vor.u32 %v3717_v11, %v3714_v18 }
  0xef   : > { %6291 = vmatpush3.bf16.msra.mxu1 %v4170_v22  ;;  %6228 = vmatprep.mubr.msk.bf16.mxu1 %vm756_vm3, %v5618_v5  ;;  %v8162_v5 = vpop.f32.mrf.mxu0  ;;  %v3694_v22 = vor.u32 %v3693_v20, %v3690_v17  ;;  %v3736_v17 = vshrl.u32 %v5719_v19, 16  ;;  %v3749_v38 = vshrl.u32 %v8169_v57, 16  ;;  %v8194_v61 = vsel %vm7116_vm7, %v5810_v27, %v4431_v53  ;;  %v5722_v19 = vld [vmem:[%s6786_s13 + $0x3c] sm:$0xf] }
  0xf0   : > { %v3728_v41 = vor.u32 %v3727_v51, %v8164_v58  ;;  %v3705_v8 = vrot.slane %v3704_v39, 4  ;;  %v3733_v11 = vrot.slane %v3731_v52, 5  ;;  %v5811_v51 = vrot.slane %v5795_v16, 9  ;;  %v8208_v39 = vld [vmem:[%s6786_s13 + $0x38] sm:$0x1] }
  0xf1   : > { %v8186_v20 = vpop.f32.mrf.mxu0  ;;  %v3695_v18 = vrot.slane %v3694_v22, 4  ;;  %v3719_v12 = vrot.slane %v3718_v34, 4  ;;  %v4441_v22 = vrot.slane %v8159_v63, 5  ;;  %v3751_v52 = vrot.slane %v3749_v38, 4 }
  0xf2   : > { %v3729_v27 = vrot.slane %v3728_v41, 4  ;;  %v3760_v34 = vshrl.u32 %v5722_v19, 16  ;;  %v3763_v16 = vshll.u32 %v5722_v19, 16  ;;  %v8221_v41 = vld [vmem:[%s6786_s13 + $0x40] sm:$0xf] }
  0xf3   : > { %6263 = vmatmul.mubr.msk.bf16.gmra.mxu0 %vm756_vm3, %v6463_v37  ;;  %v8205_v53 = vpop.f32.mrf.mxu0  ;;  %v3700_v63 = vsel %vm6830_vm4, %v3695_v18, %v8155_v26  ;;  %v3724_v26 = vsel %vm6830_vm4, %v3719_v12, %v8164_v58  ;;  %v5796_v18 = vld [vmem:[%s6786_s13 + $0x30] sm:$0xe]  ;;  %v3769_v24 = vshll.u32 %v8221_v41, 16  ;;  %v3773_v33 = vshrl.u32 %v8221_v41, 16 }
  0xf4   : > { %6266 = vmatprep.mubr.msk.bf16.mxu0 %vm756_vm3, %v6464_v44  ;;  %v8177_v37 = vpop.f32.mrf.mxu1  ;;  %v4438_v44 = vrot.slane %v8143_v36, 5  ;;  %v3709_v36 = vrot.slane %v3707_v45, 5  ;;  %v3738_v45 = vrot.slane %v3736_v17, 4  ;;  %v3734_v58 = vsel %vm6830_vm4, %v3729_v27, %v3733_v11 }
  0xf5   : > { %9747 = vst [vmem:[#allocation7_spill] sm:$0xff] %v8177_v37  ;;  %v8250_v12 = vpop.f32.mrf.mxu0  ;;  %v3765_v19 = vrot.slane %v3763_v16, 5  ;;  %v3797_v11 = vshrl.u32 %v8243_v7, 16 }
  0xf6   : > { %6229 = vmatmul.mubr.msk.bf16.gmra.mxu1 %vm756_vm3, %v5619_v48  ;;  %v3745_v48 = vshll.u32 %v8169_v57, 16  ;;  %v8201_v6 = vpop.f32.mrf.mxu1  ;;  %v4440_v4 = vrot.slane %v4438_v44, 4  ;;  %v3710_v17 = vsel %vm6830_vm4, %v3705_v8, %v3709_v36  ;;  %v4445_v36 = vrot.slane %v8169_v57, 5  ;;  %v6468_v8 = vld [vmem:[%s6786_s13 + $0x78] sm:$0xff]  }
  0xf7   : > { %6232 = vmatprep.mubr.msk.bf16.mxu1 %vm756_vm3, %v5620_v40  ;;  %v8198_v40 = vsel %vm7116_vm7, %v4433_v49, %v4434_v46  ;;  %9748 = vst [vmem:[#allocation6_spill] sm:$0xff] %v8201_v6  ;;  %v3741_v49 = vrot.slane %v3739_v10, 5  ;;  %v8264_v27 = vcombine.low %v3700_v63, %v3710_v17  ;;  %v8266_v57 = vcombine.low %v3724_v26, %v3734_v58  ;;  %v8280_v17 = vld [vmem:[%s6786_s13 + $0x58] sm:$0xf]  ;;  %v8286_v58 = vld [vmem:[%s6786_s13 + $0x44] sm:$0x1] }
  0xf8   : > { %v8210_v46 = vrot.slane %v3745_v48, 5  ;;  %v8227_v10 = vpop.f32.mrf.mxu1  ;;  %v8234_v48 = vsel %vm7116_vm7, %v5811_v51, %v4438_v44  ;;  %v8238_v38 = vsel %vm7116_vm7, %v4440_v4, %v4441_v22  ;;  %v3762_v51 = vrot.slane %v3760_v34, 4  ;;  %v5728_v34 = vld [vmem:[%s6786_s13 + $0x54] sm:$0xf] }
  0xf9   : > { %9749 = vst [vmem:[#allocation9_spill] sm:$0xff] %v8227_v10  ;;  %v3742_v44 = vor.u32 %v3741_v49, %v3738_v45  ;;  %v3787_v22 = vshll.u32 %v5725_v3, 16  ;;  %v4447_v13 = vrot.slane %v4445_v36, 4  ;;  %v4448_v63 = vrot.slane %v8208_v39, 5  ;;  %v5797_v49 = vld [vmem:[%s6786_s13 + $0x3c] sm:$0xe] }
  0xfa   : > { %v3752_v4 = vor.u32 %v3751_v52, %v8210_v46  ;;  %v8262_v45 = vpop.f32.mrf.mxu1  ;;  %v5812_v52 = vrot.slane %v5796_v18, 9  ;;  %v3766_v18 = vor.u32 %v3765_v19, %v3762_v51  ;;  %v9752_v6 = vcombine.low %v7975_v28, %v7991_v1 }
  0xfb   : > { %6267 = vmatmul.mubr.msk.bf16.gmra.mxu0 %vm756_vm3, %v6465_v21  ;;  %v3793_v21 = vshll.u32 %v8243_v7, 16  ;;  %9750 = vst [vmem:[#allocation8_spill] sm:$0xff] %v8262_v45  ;;  %v3789_v45 = vrot.slane %v3787_v22, 5  ;;  %v3808_v51 = vshrl.u32 %v5728_v34, 16  ;;  %v3811_v19 = vshll.u32 %v5728_v34, 16 }
  0xfc   : > { %6270 = vmatprep.mubr.msk.bf16.mxu0 %vm756_vm3, %v6466_v60  ;;  %v3755_v60 = vshll.u32 %v8208_v39, 16  ;;  %v8283_v26 = vrot.slane %v3752_v4, 4  ;;  %v3799_v39 = vrot.slane %v3797_v11, 4  ;;  %v8321_v22 = vsel %vm7116_vm7, %v4447_v13, %v4448_v63 }
  0xfd   : > { %v8291_v10 = vrot.slane %v3793_v21, 5  ;;  %v9754_v21 = vcombine.low %v7984_v25, %v8003_v14  ;;  %v4452_v25 = vrot.slane %v8221_v41, 5  ;;  %v6470_v14 = vld [vmem:[%s6786_s13 + $0x90] sm:$0xff]   ;;  %v5813_v1 = vrot.slane %v5797_v49, 9  ;;  %v5731_v41 = vld [vmem:[%s6786_s13 + $0x60] sm:$0xf] }
  0xfe   : > { %6233 = vmatmul.mubr.msk.bf16.gmra.mxu1 %vm756_vm3, %v5621_v35  ;;  %v6467_v35 = vld [vmem:[%s6786_s13 + $0x6c] sm:$0xff]   ;;  %v8276_v62 = vrot.slane %v3755_v60, 5  ;;  %v3810_v37 = vrot.slane %v3808_v51, 4 }
  0xff   : > { %6236 = vmatprep.mubr.msk.bf16.mxu1 %vm756_vm3, %v5622_v23  ;;  %v3784_v23 = vshrl.u32 %v5725_v3, 16  ;;  %v8274_v3 = vrot.slane %v3742_v44, 4  ;;  %v3775_v44 = vrot.slane %v3773_v33, 4  ;;  %v3821_v33 = vshrl.u32 %v8280_v17, 16 }
 0x100   : > { %v8272_v16 = vpop.f32.mrf.mxu0  ;;  %v3800_v13 = vor.u32 %v3799_v39, %v8291_v10  ;;  %v4459_v39 = vrot.slane %v8243_v7, 5  ;;  %v9758_v7 = vcombine.low %v7995_v43, %v8012_v2  ;;  %v9760_v43 = vcombine.low %v8016_v59, %v8026_v50  ;;  %v6471_v2 = vld [vmem:[%s6786_s13 + $0x9c] sm:$0xff]  }
 0x101   : > { %9751 = vst [vmem:[#allocation11_spill] sm:$0xff] %v8272_v16  ;;  %v3786_v60 = vrot.slane %v3784_v23, 4  ;;  %v6469_v23 = vld [vmem:[%s6786_s13 + $0x84] sm:$0xff]   ;;  %v8348_v16 = vld [vmem:[%s6786_s13 + $0x5c] sm:$0x1]  ;;  %v4466_v59 = vrot.slane %v8280_v17, 5 }
 0x102   : > { %v8309_v28 = vpop.f32.mrf.mxu0 }
 0x103   : > { %6271 = vmatmul.mubr.msk.bf16.gmra.mxu0 %vm756_vm3, %v6467_v35  ;;  %v8288_v35 = vrot.slane %v3769_v24, 5  ;;  %v3817_v24 = vshll.u32 %v8280_v17, 16  ;;  %9755 = vst [vmem:[#allocation15_spill] sm:$0xff] %v8309_v28  ;;  %v3813_v28 = vrot.slane %v3811_v19, 5 }
 0x104   : > { %6274 = vmatprep.mubr.msk.bf16.mxu0 %vm756_vm3, %v6468_v8  ;;  %v8297_v4 = vpop.f32.mrf.mxu1  ;;  %v8300_v8 = vld [vmem:[%s6786_s13 + $0x50] sm:$0x1]  ;;  %v8341_v49 = vpop.f32.mrf.mxu0 }
 0x105   : > { %9753 = vst [vmem:[#allocation10_spill] sm:$0xff] %v8297_v4  ;;  %v3776_v34 = vor.u32 %v3775_v44, %v8288_v35  ;;  %v8331_v4 = vrot.slane %v3766_v18, 4  ;;  %v8338_v11 = vrot.slane %v3817_v24, 5  ;;  %v3823_v44 = vrot.slane %v3821_v33, 4  ;;  %9757 = vst [vmem:[#allocation5_spill] sm:$0xff] %v8341_v49 }
 0x106   : > { %6237 = vmatmul.mubr.msk.bf16.gmra.mxu1 %vm756_vm3, %v9752_v6  ;;  %v8317_v6 = vsel %vm7116_vm7, %v5812_v52, %v4445_v36  ;;  %v3790_v36 = vor.u32 %v3789_v45, %v3786_v60  ;;  %v3803_v52 = vshll.u32 %v8300_v8, 16  ;;  %v8336_v63 = vpop.f32.mrf.mxu1  ;;  %v4454_v18 = vrot.slane %v4452_v25, 4  ;;  %v5798_v24 = vld [vmem:[%s6786_s13 + $0x48] sm:$0xe] }
 0x107   : > { %6240 = vmatprep.mubr.msk.bf16.mxu1 %vm756_vm3, %v9754_v21  ;;  %v3779_v21 = vshll.u32 %v8286_v58, 16  ;;  %9756 = vst [vmem:[#allocation13_spill] sm:$0xff] %v8336_v63  ;;  %v4455_v60 = vrot.slane %v8286_v58, 5  ;;  %v3777_v51 = vrot.slane %v3776_v34, 4  ;;  %v3832_v33 = vshrl.u32 %v5731_v41, 16 }
 0x108   : > { %v8354_v63 = vsel %vm7116_vm7, %v5813_v1, %v4452_v25  ;;  %v3791_v45 = vrot.slane %v3790_v36, 4  ;;  %v3801_v49 = vrot.slane %v3800_v13, 4  ;;  %v3805_v58 = vrot.slane %v3803_v52, 5  ;;  %v8369_v36 = vld [vmem:[%s6786_s13 + $0x64] sm:$0xf]  ;;  %v8376_v13 = vpop.f32.mrf.mxu0 }
 0x109   : > { %v3781_v19 = vrot.slane %v3779_v21, 5  ;;  %v3772_v34 = vsel %vm6830_vm4, %v8331_v4, %v8288_v35  ;;  %v3814_v21 = vor.u32 %v3813_v28, %v3810_v37  ;;  %v3824_v1 = vor.u32 %v3823_v44, %v8338_v11  ;;  %9761 = vst [vmem:[#allocation17_spill] sm:$0xff] %v8376_v13  ;;  %v5799_v28 = vld [vmem:[%s6786_s13 + $0x54] sm:$0xe]  ;;  %v6475_v13 = vld [vmem:[%s6786_s13 + $0xcc] sm:$0xff]  }
 0x10a   : > { %v3827_v25 = vshll.u32 %v8348_v16, 16  ;;  %v8380_v52 = vsel %vm7116_vm7, %v4454_v18, %v4455_v60  ;;  %v5814_v35 = vrot.slane %v5798_v24, 9  ;;  %v4461_v37 = vrot.slane %v4459_v39, 4 }
 0x10b   : > { %6275 = vmatmul.mubr.msk.bf16.gmra.mxu0 %vm756_vm3, %v6469_v23  ;;  %v3835_v23 = vshll.u32 %v5731_v41, 16  ;;  %v4462_v4 = vrot.slane %v8300_v8, 5  ;;  %v6472_v41 = vld [vmem:[%s6786_s13 + $0xa8] sm:$0xff]   ;;  %v3782_v44 = vsel %vm6830_vm4, %v3777_v51, %v3781_v19  ;;  %v3834_v50 = vrot.slane %v3832_v33, 4 }
 0x10c   : > { %6278 = vmatprep.mubr.msk.bf16.mxu0 %vm756_vm3, %v6470_v14  ;;  %v8360_v14 = vpop.f32.mrf.mxu1  ;;  %v3806_v18 = vsel %vm6830_vm4, %v3801_v49, %v3805_v58  ;;  %v3841_v60 = vshll.u32 %v8369_v36, 16  ;;  %v3845_v8 = vshrl.u32 %v8369_v36, 16  ;;  %v3825_v51 = vrot.slane %v3824_v1, 4  ;;  %v8398_v33 = vld [vmem:[%s6786_s13 + $0x68] sm:$0x1] }
 0x10d   : > { %9759 = vst [vmem:[#allocation16_spill] sm:$0xff] %v8360_v14  ;;  %v3815_v14 = vrot.slane %v3814_v21, 4  ;;  %v3829_v17 = vrot.slane %v3827_v25, 5  ;;  %v5815_v19 = vrot.slane %v5799_v28, 9  ;;  %v9764_v49 = vsel %vm6830_vm4, %v8283_v26, %v8276_v62  ;;  %v5734_v25 = vld [vmem:[%s6786_s13 + $0x6c] sm:$0xf] }
 0x10e   : > { %6241 = vmatmul.mubr.msk.bf16.gmra.mxu1 %vm756_vm3, %v9758_v7  ;;  %v3837_v7 = vrot.slane %v3835_v23, 5  ;;  %v8395_v24 = vpop.f32.mrf.mxu1  ;;  %v8419_v21 = vsel %vm7116_vm7, %v5814_v35, %v4459_v39  ;;  %v8423_v1 = vsel %vm7116_vm7, %v4461_v37, %v4462_v4  ;;  %v8426_v62 = vcombine.low %v3772_v34, %v3782_v44  ;;  %v5800_v4 = vld [vmem:[%s6786_s13 + $0x60] sm:$0xe]  ;;  %v5740_v44 = vld [vmem:[%s6786_s13 + $0x84] sm:$0xf] }
 0x10f   : > { %6244 = vmatprep.mubr.msk.bf16.mxu1 %vm756_vm3, %v9760_v43  ;;  %v3796_v43 = vsel %vm6830_vm4, %v3791_v45, %v8291_v10  ;;  %9762 = vst [vmem:[#allocation18_spill] sm:$0xff] %v8395_v24  ;;  %v9765_v45 = vsel %vm6830_vm4, %v8274_v3, %v8210_v46  ;;  %v4468_v46 = vrot.slane %v4466_v59, 4  ;;  %v4469_v3 = vrot.slane %v8348_v16, 5 }
 0x110   : > { %v8413_v23 = vcombine.low %v9765_v45, %v9764_v49  ;;  %9766 = vst [vmem:[#allocation14_spill] sm:$0xff] %v8426_v62  ;;  %v3838_v26 = vor.u32 %v3837_v7, %v3834_v50  ;;  %v8433_v28 = vcombine.low %v3796_v43, %v3806_v18  ;;  %v8435_v39 = vrot.slane %v3841_v60, 5 }
 0x111   : > { %v8401_v10 = vpop.f32.mrf.mxu0  ;;  %v8437_v35 = vrot.slane %v3845_v8, 4  ;;  %v3851_v37 = vshll.u32 %v8398_v33, 16  ;;  %v9768_v34 = vcombine.low %v8034_v54, %v8049_v56  ;;  %v3820_v50 = vsel %vm6830_vm4, %v3815_v14, %v8338_v11  ;;  %v5737_v54 = vld [vmem:[%s6786_s13 + $0x78] sm:$0xf] }
 0x112   : > { %9763 = vst [vmem:[#allocation12_spill] sm:$0xff] %v8401_v10  ;;  %9767 = vst [vmem:[#allocation19_spill] sm:$0xff] %v8433_v28  ;;  %v3830_v7 = vsel %vm6830_vm4, %v3825_v51, %v3829_v17  ;;  %v8457_v43 = vsel %vm7116_vm7, %v5815_v19, %v4466_v59  ;;  %v9770_v56 = vcombine.low %v8041_v29, %v8062_v42  ;;  %v3856_v60 = vshrl.u32 %v5734_v25, 16  ;;  %v8469_v51 = vld [vmem:[%s6786_s13 + $0x7c] sm:$0xf]  ;;  %v6474_v59 = vld [vmem:[%s6786_s13 + $0xc0] sm:$0xff]  }
 0x113   : > { %6279 = vmatmul.mubr.msk.bf16.gmra.mxu0 %vm756_vm3, %v6471_v2  ;;  %v8431_v2 = vld [vmem:[%s6786_s13 + $0x70] sm:$0xf]  ;;  %v8464_v18 = vpop.f32.mrf.mxu0  ;;  %v3859_v8 = vshll.u32 %v5734_v25, 16  ;;  %v8474_v17 = vsel %vm7116_vm7, %v4468_v46, %v4469_v3  ;;  %v8476_v29 = vrot.slane %v3838_v26, 4  ;;  %v5816_v42 = vrot.slane %v5800_v4, 9 }
 0x114   : > { %6282 = vmatprep.mubr.msk.bf16.mxu0 %vm756_vm3, %v6472_v41  ;;  %v6473_v41 = vld [vmem:[%s6786_s13 + $0xb4] sm:$0xff]   ;;  %9771 = vst [vmem:[#allocation21_spill] sm:$0xff] %v8464_v18  ;;  %v3865_v11 = vshll.u32 %v8431_v2, 16  ;;  %v3869_v14 = vshrl.u32 %v8431_v2, 16  ;;  %v4473_v19 = vrot.slane %v8369_v36, 5  ;;  %v8479_v49 = vcombine.low %v3820_v50, %v3830_v7 }
 0x115   : > { %v3848_v45 = vor.u32 %v8437_v35, %v8435_v39  ;;  %v8483_v25 = vrot.slane %v3851_v37, 5  ;;  %v3880_v46 = vshrl.u32 %v5737_v54, 16  ;;  %v3883_v3 = vshll.u32 %v5737_v54, 16  ;;  %v8495_v4 = vld [vmem:[%s6786_s13 + $0x88] sm:$0xf]  ;;  %v8498_v35 = vpop.f32.mrf.mxu0 }
 0x116   : > { %6245 = vmatmul.mubr.msk.bf16.gmra.mxu1 %vm756_vm3, %v9768_v34  ;;  %v8445_v16 = vpop.f32.mrf.mxu1  ;;  %9772 = vst [vmem:[#allocation22_spill] sm:$0xff] %v8479_v49  ;;  %v4476_v34 = vrot.slane %v8398_v33, 5  ;;  %v3889_v36 = vshll.u32 %v8469_v51, 16  ;;  %v3893_v26 = vshrl.u32 %v8469_v51, 16  ;;  %9774 = vst [vmem:[#allocation24_spill] sm:$0xff] %v8498_v35  ;;  %v3858_v33 = vrot.slane %v3856_v60, 4 }
 0x117   : > { %9769 = vst [vmem:[#allocation20_spill] sm:$0xff] %v8445_v16  ;;  %6248 = vmatprep.mubr.msk.bf16.mxu1 %vm756_vm3, %v9770_v56  ;;  %v8487_v56 = vld [vmem:[%s6786_s13 + $0x74] sm:$0x1]  ;;  %v3861_v37 = vrot.slane %v3859_v8, 5  ;;  %v8500_v50 = vrot.slane %v3865_v11, 5  ;;  %v3871_v7 = vrot.slane %v3869_v14, 4  ;;  %v9775_v54 = vcombine.low %v8053_v30, %v8069_v55  ;;  %v8528_v49 = vpop.f32.mrf.mxu0 }
 0x118   : > { %v8490_v58 = vpop.f32.mrf.mxu1  ;;  %v4475_v16 = vrot.slane %v4473_v19, 4  ;;  %v8513_v60 = vld [vmem:[%s6786_s13 + $0x80] sm:$0x1]  ;;  %v8516_v8 = vld [vmem:[%s6786_s13 + $0x6c] sm:$0xe]  ;;  %v3904_v11 = vshrl.u32 %v5740_v44, 16 }
 0x119   : > { %9773 = vst [vmem:[#allocation23_spill] sm:$0xff] %v8490_v58  ;;  %v8509_v58 = vsel %vm7116_vm7, %v5816_v42, %v4473_v19  ;;  %v3907_v14 = vshll.u32 %v5740_v44, 16  ;;  %v3917_v24 = vshrl.u32 %v8495_v4, 16  ;;  %v3882_v19 = vrot.slane %v3880_v46, 4  ;;  %9777 = vst [vmem:[#allocation26_spill] sm:$0xff] %v8528_v49 }
 0x11a   : > { %v8524_v42 = vpop.f32.mrf.mxu1  ;;  %v3885_v35 = vrot.slane %v3883_v3, 5  ;;  %v8526_v18 = vrot.slane %v3889_v36, 5  ;;  %v3895_v10 = vrot.slane %v3893_v26, 4  ;;  %v9778_v44 = vcombine.low %v8073_v15, %v8101_v32  ;;  %v8547_v32 = vld [vmem:[%s6786_s13 + $0x8c] sm:$0x1] }
 0x11b   : > { %6283 = vmatmul.mubr.msk.bf16.gmra.mxu0 %vm756_vm3, %v6473_v41  ;;  %v3875_v41 = vshll.u32 %v8487_v56, 16  ;;  %9776 = vst [vmem:[#allocation25_spill] sm:$0xff] %v8524_v42  ;;  %v3862_v30 = vor.u32 %v3861_v37, %v3858_v33  ;;  %v3872_v55 = vor.u32 %v3871_v7, %v8500_v50  ;;  %v3899_v46 = vshll.u32 %v8513_v60, 16  ;;  %v5802_v33 = vld [vmem:[%s6786_s13 + $0x78] sm:$0xe] }
 0x11c   : > { %6286 = vmatprep.mubr.msk.bf16.mxu0 %vm756_vm3, %v6474_v59  ;;  %v3913_v59 = vshll.u32 %v8495_v4, 16  ;;  %v8538_v3 = vrot.slane %v3848_v45, 4  ;;  %v8542_v36 = vsel %vm7116_vm7, %v4475_v16, %v4476_v34  ;;  %v5817_v26 = vrot.slane %v8516_v8, 9  ;;  %v8552_v42 = vpop.f32.mrf.mxu1  ;;  %v5743_v8 = vld [vmem:[%s6786_s13 + $0x90] sm:$0xf] }
 0x11d   : > { %v4487_v15 = vrot.slane %v8469_v51, 5  ;;  %v3906_v37 = vrot.slane %v3904_v11, 4  ;;  %v3909_v7 = vrot.slane %v3907_v14, 5  ;;  %9779 = vst [vmem:[#allocation27_spill] sm:$0xff] %v8552_v42  ;;  %v3877_v45 = vrot.slane %v3875_v41, 5 }
 0x11e   : > { %6249 = vmatmul.mubr.msk.bf16.gmra.mxu1 %vm756_vm3, %v9775_v54  ;;  %v4480_v54 = vrot.slane %v8431_v2, 5  ;;  %v8550_v2 = vrot.slane %v3913_v59, 5  ;;  %v4483_v49 = vrot.slane %v8487_v56, 5  ;;  %v3886_v16 = vor.u32 %v3885_v35, %v3882_v19  ;;  %v8561_v59 = vld [vmem:[%s6786_s13 + $0x94] sm:$0xf] }
 0x11f   : > { %6252 = vmatprep.mubr.msk.bf16.mxu1 %vm756_vm3, %v9778_v44  ;;  %v3919_v44 = vrot.slane %v3917_v24, 4  ;;  %v3896_v34 = vor.u32 %v3895_v10, %v8526_v18  ;;  %v3863_v51 = vrot.slane %v3862_v30, 4  ;;  %v3873_v11 = vrot.slane %v3872_v55, 4 }
 0x120   : > { %v4482_v62 = vrot.slane %v4480_v54, 4  ;;  %v3901_v14 = vrot.slane %v3899_v46, 5  ;;  %v9780_v24 = vcombine.low %v8194_v61, %v8198_v40  ;;  %v5818_v56 = vrot.slane %v5802_v33, 9 }
 0x121   : > { %v4489_v35 = vrot.slane %v4487_v15, 4  ;;  %v4490_v10 = vrot.slane %v8513_v60, 5  ;;  %v3923_v41 = vshll.u32 %v8547_v32, 16  ;;  %v3920_v30 = vor.u32 %v3919_v44, %v8550_v2 }
 0x122   : > { %v3928_v55 = vshrl.u32 %v5743_v8, 16  ;;  %v3931_v46 = vshll.u32 %v5743_v8, 16  ;;  %v9782_v61 = vcombine.low %v8113_v9, %v8118_v47  ;;  %v3887_v40 = vrot.slane %v3886_v16, 4 }
 0x123   : > { %v8557_v28 = vpop.f32.mrf.mxu0  ;;  %6287 = vmatmul.mubr.msk.bf16.gmra.mxu0 %vm756_vm3, %v6475_v13  ;;  %v3910_v13 = vor.u32 %v3909_v7, %v3906_v37  ;;  %v3897_v33 = vrot.slane %v3896_v34, 4  ;;  %v3937_v60 = vshll.u32 %v8561_v59, 16  ;;  %v3854_v37 = vsel %vm6830_vm4, %v8538_v3, %v8483_v25 }
 0x124   : > { %6326 = vmatprep.mubr.msk.bf16.mxu0 %vm756_vm3, %v9780_v24  ;;  %v3941_v24 = vshrl.u32 %v8561_v59, 16  ;;  %v3868_v9 = vsel %vm6830_vm4, %v3863_v51, %v8500_v50  ;;  %v8593_v47 = vsel %vm7116_vm7, %v5817_v26, %v4480_v54  ;;  %v8597_v7 = vsel %vm7116_vm7, %v4482_v62, %v4483_v49  ;;  %v5803_v54 = vld [vmem:[%s6786_s13 + $0x84] sm:$0xe]  ;;  %v9821_v31 = vld [vmem:[#allocation27_spill] sm:$0xff] }
 0x125   : > { %v8569_v19 = vpop.f32.mrf.mxu0  ;;  %v8605_v25 = vsel %vm7116_vm7, %v5818_v56, %v4487_v15  ;;  %v8609_v50 = vsel %vm7116_vm7, %v4489_v35, %v4490_v10  ;;  %v3925_v3 = vrot.slane %v3923_v41, 5  ;;  %v3911_v62 = vrot.slane %v3910_v13, 4  ;;  %v8633_v13 = vld [vmem:[%s6786_s13 + $0x98] sm:$0x1] }
 0x126   : > { %9781 = vst [vmem:[#allocation28_spill] sm:$0xff] %v8569_v19  ;;  %v8572_v42 = vpop.f32.mrf.mxu1  ;;  %6253 = vmatmul.mubr.msk.bf16.gmra.mxu1 %vm756_vm3, %v9782_v61  ;;  %v3921_v49 = vrot.slane %v3920_v30, 4  ;;  %v3930_v16 = vrot.slane %v3928_v55, 4  ;;  %v3933_v34 = vrot.slane %v3931_v46, 5  ;;  %v3892_v15 = vsel %vm6830_vm4, %v3887_v40, %v8526_v18  ;;  %v5746_v30 = vld [vmem:[%s6786_s13 + $0x9c] sm:$0xf] }
 0x127   : > { %v8580_v19 = vpop.f32.mrf.mxu0  ;;  %6292 = vmatprep.mubr.msk.bf16.mxu1 %vm756_vm3, %v8264_v27  ;;  %v3878_v27 = vsel %vm6830_vm4, %v3873_v11, %v3877_v45  ;;  %v3902_v45 = vsel %vm6830_vm4, %v3897_v33, %v3901_v14  ;;  %v8621_v51 = vrot.slane %v3937_v60, 5  ;;  %v3943_v11 = vrot.slane %v3941_v24, 4  ;;  %v8664_v24 = vld [vmem:[%s6786_s13 + $0xa0] sm:$0xf] }
 0x128   : > { %v8599_v44 = vpop.f32.mrf.mxu1  ;;  %v9783_v35 = vcombine.low %v8234_v48, %v8238_v38  ;;  %v5832_v10 = vcombine.low %v8457_v43, %v8474_v17  ;;  %v5833_v41 = vcombine.low %v8509_v58, %v8542_v36  ;;  %v5819_v18 = vrot.slane %v5803_v54, 9 }
 0x129   : > { %v8612_v26 = vpop.f32.mrf.mxu0  ;;  %v4494_v14 = vrot.slane %v8495_v4, 5  ;;  %v9784_v48 = vcombine.low %v8317_v6, %v8321_v22  ;;  %v9785_v38 = vsel %vm6830_vm4, %v8476_v29, %v8435_v39  ;;  %v8649_v61 = vcombine.low %v3868_v9, %v3878_v27  ;;  %v5804_v29 = vld [vmem:[%s6786_s13 + $0x90] sm:$0xe]  ;;  %v9792_v4 = vld [vmem:[#allocation5_spill] sm:$0xff] }
 0x12a   : > { %v8614_v8 = vpop.f32.mrf.mxu1  ;;  %v8647_v46 = vcombine.low %v9785_v38, %v3854_v37  ;;  %v8655_v60 = vcombine.low %v3892_v15, %v3902_v45  ;;  %v3916_v6 = vsel %vm6830_vm4, %v3911_v62, %v8550_v2  ;;  %v3926_v22 = vsel %vm6830_vm4, %v3921_v49, %v3925_v3 }
 0x12b   : > { %v6124_v56 = vpop.f32.mrf.mxu0  ;;  %6327 = vmatmul.mubr.msk.bf16.vlgmr.msra.gmra.mxu0 %vm756_vm3, %v9783_v35  ;;  %v3934_v39 = vor.u32 %v3933_v34, %v3930_v16  ;;  %v3944_v9 = vor.u32 %v3943_v11, %v8621_v51  ;;  %v3947_v27 = vshll.u32 %v8633_v13, 16  ;;  %v3952_v54 = vshrl.u32 %v5746_v30, 16 }
 0x12c   : > { %v8636_v55 = vpop.f32.mrf.mxu1  ;;  %6330 = vmatprep.mubr.msk.bf16.mxu0 %vm756_vm3, %v9784_v48  ;;  %v3955_v15 = vshll.u32 %v5746_v30, 16  ;;  %v8675_v3 = vsel %vm7116_vm7, %v5819_v18, %v4494_v14  ;;  %v4496_v62 = vrot.slane %v4494_v14, 4  ;;  %v4497_v49 = vrot.slane %v8547_v32, 5 }
 0x12d   : > { %v1560_v33 = vpop.f32.mrf.mxu0  ;;  %v5820_v16 = vrot.slane %v5804_v29, 9  ;;  %v4501_v34 = vrot.slane %v8561_v59, 5  ;;  %v3961_v11 = vshll.u32 %v8664_v24, 16  ;;  %v3965_v35 = vshrl.u32 %v8664_v24, 16 }
 0x12e   : > { %v6090_v37 = vpop.f32.mrf.mxu1  ;;  %6293 = vmatmul.mubr.msk.bf16.vlgmr.msra.gmra.mxu1 %vm756_vm3, %v8266_v57  ;;  %v8684_v48 = vcombine.low %v3916_v6, %v3926_v22  ;;  %v8686_v18 = vrot.slane %v3934_v39, 4  ;;  %v3945_v32 = vrot.slane %v3944_v9, 4  ;;  %v3949_v38 = vrot.slane %v3947_v27, 5  ;;  %v5749_v22 = vld [vmem:[%s6786_s13 + $0xa8] sm:$0xf] }
 0x12f   : > { %v1144_v45 = vadd.f32 %v6090_v37, %v8162_v5  ;;  %v6125_v2 = vpop.f32.mrf.mxu0  ;;  %6296 = vmatprep.mubr.msk.bf16.mxu1 %vm756_vm3, %v8413_v23  ;;  %v3954_v29 = vrot.slane %v3952_v54, 4  ;;  %v3957_v59 = vrot.slane %v3955_v15, 5  ;;  %v4504_v6 = vrot.slane %v8633_v13, 5  ;;  %v8712_v27 = vld [vmem:[%s6786_s13 + $0xac] sm:$0xf] }
 0x130   : > { %v1135_v57 = vpop.f32.mrf.mxu1  ;;  %v3967_v9 = vrot.slane %v3965_v35, 4  ;;  %v9789_v35 = vld [vmem:[#allocation11_spill] sm:$0xff] }
 0x131   : > { %v8681_v5 = vadd.f32 %v6124_v56, %v1144_v45  ;;  %v1136_v23 = vadd.f32 %v1135_v57, %v8186_v20  ;;  %v1563_v30 = vpop.f32.mrf.mxu0  ;;  %v9786_v45 = vcombine.low %v8354_v63, %v8380_v52  ;;  %v8697_v20 = vsel %vm7116_vm7, %v4496_v62, %v4497_v49  ;;  %v5805_v62 = vld [vmem:[%s6786_s13 + $0x9c] sm:$0xe] }
 0x132   : > { %v6091_v14 = vpop.f32.mrf.mxu1  ;;  %v4503_v63 = vrot.slane %v4501_v34, 4  ;;  %v8709_v52 = vrot.slane %v3961_v11, 5  ;;  %v4508_v49 = vrot.slane %v8664_v24, 5  ;;  %v3985_v24 = vshll.u32 %v8712_v27, 16 }
 0x133   : > { %v8688_v37 = vadd.f32 %v1560_v33, %v1136_v23  ;;  %v1147_v40 = vadd.f32 %v6091_v14, %v8205_v53  ;;  %v6128_v56 = vpop.f32.mrf.mxu0  ;;  %6331 = vmatmul.mubr.msk.bf16.gmra.mxu0 %vm756_vm3, %v9786_v45  ;;  %v9787_v33 = vcombine.low %v8419_v21, %v8423_v1  ;;  %v8707_v53 = vsel %vm7116_vm7, %v5820_v16, %v4501_v34  ;;  %v5748_v1 = vld [vmem:[%s6786_s13 + $0xa4] sm:$0x1]  ;;  %v9788_v16 = vld [vmem:[#allocation14_spill] sm:$0xff] }
 0x134   : > { %v1138_v39 = vpop.f32.mrf.mxu1  ;;  %v3940_v21 = vsel %vm6830_vm4, %v8686_v18, %v8621_v51  ;;  %v3976_v34 = vshrl.u32 %v5749_v22, 16  ;;  %v9790_v51 = vld [vmem:[#allocation19_spill] sm:$0xff]  ;;  %v3989_v18 = vshrl.u32 %v8712_v27, 16 }
 0x135   : > { %6334 = vmatprep.mubr.msk.bf16.mxu0 %vm756_vm3, %v9787_v33  ;;  %v8714_v54 = vadd.f32 %v6125_v2, %v1147_v40  ;;  %v1139_v13 = vadd.f32 %v1138_v39, %v8250_v12  ;;  %v1576_v15 = vpop.f32.mrf.mxu0  ;;  %v3950_v40 = vsel %vm6830_vm4, %v3945_v32, %v3949_v38  ;;  %v3958_v2 = vor.u32 %v3957_v59, %v3954_v29  ;;  %v9791_v59 = vld [vmem:[#allocation15_spill] sm:$0xff] }
 0x136   : > { %v6094_v57 = vpop.f32.mrf.mxu1  ;;  %6297 = vmatmul.mubr.msk.bf16.gmra.mxu1 %vm756_vm3, %v9788_v16  ;;  %v3979_v12 = vshll.u32 %v5749_v22, 16  ;;  %v8737_v39 = vsel %vm7116_vm7, %v4503_v63, %v4504_v6  ;;  %v3968_v32 = vor.u32 %v3967_v9, %v8709_v52  ;;  %v3971_v38 = vshll.u32 %v5748_v1, 16 }
 0x137   : > { %v8728_v11 = vadd.f32 %v1563_v30, %v1139_v13  ;;  %v1160_v23 = vadd.f32 %v6094_v57, %v9789_v35  ;;  %v6129_v14 = vpop.f32.mrf.mxu0  ;;  %6300 = vmatprep.mubr.msk.bf16.mxu1 %vm756_vm3, %v9790_v51  ;;  %v5821_v30 = vrot.slane %v5805_v62, 9  ;;  %v4510_v13 = vrot.slane %v4508_v49, 4 }
 0x138   : > { %v1151_v45 = vpop.f32.mrf.mxu1  ;;  %v4511_v57 = vrot.slane %v5748_v1, 5  ;;  %v8745_v51 = vrot.slane %v3958_v2, 4  ;;  %v3978_v6 = vrot.slane %v3976_v34, 4  ;;  %v3981_v63 = vrot.slane %v3979_v12, 5  ;;  %v8755_v1 = vld [vmem:[%s6786_s13 + $0xb0] sm:$0x1] }
 0x139   : > { %v8740_v29 = vadd.f32 %v6128_v56, %v1160_v23  ;;  %v1152_v22 = vadd.f32 %v1151_v45, %v9791_v59  ;;  %v1579_v33 = vpop.f32.mrf.mxu0  ;;  %v8757_v23 = vrot.slane %v3985_v24, 5  ;;  %v3991_v2 = vrot.slane %v3989_v18, 4  ;;  %v9793_v12 = vld [vmem:[#allocation17_spill] sm:$0xff] }
 0x13a   : > { %v6095_v16 = vpop.f32.mrf.mxu1  ;;  %v8767_v43 = vrot.slane %v3968_v32, 4  ;;  %v8769_v17 = vrot.slane %v3971_v38, 5  ;;  %v8777_v58 = vsel %vm7116_vm7, %v5821_v30, %v4508_v49  ;;  %v8781_v36 = vsel %vm7116_vm7, %v4510_v13, %v4511_v57  ;;  %v8793_v30 = vld [vmem:[%s6786_s13 + $0xb8] sm:$0xf] }
 0x13b   : > { %v8747_v9 = vadd.f32 %v1576_v15, %v1152_v22  ;;  %v1163_v62 = vadd.f32 %v6095_v16, %v9792_v4  ;;  %v6132_v56 = vpop.f32.mrf.mxu0  ;;  %6335 = vmatmul.mubr.msk.bf16.gmra.mxu0 %vm756_vm3, %v5832_v10  ;;  %v8763_v15 = vcombine.low %v3940_v21, %v3950_v40  ;;  %v5806_v10 = vld [vmem:[%s6786_s13 + $0xa8] sm:$0xe]  ;;  %v3982_v32 = vor.u32 %v3981_v63, %v3978_v6  ;;  %v9795_v22 = vld [vmem:[#allocation12_spill] sm:$0xff] }
 0x13c   : > { %v1154_v45 = vpop.f32.mrf.mxu1  ;;  %6338 = vmatprep.mubr.msk.bf16.mxu0 %vm756_vm3, %v5833_v41  ;;  %v5752_v41 = vld [vmem:[%s6786_s13 + $0xb4] sm:$0xf]  ;;  %v9794_v40 = vld [vmem:[#allocation22_spill] sm:$0xff]  ;;  %v3995_v38 = vshll.u32 %v8755_v1, 16  ;;  %v4515_v49 = vrot.slane %v8712_v27, 5  ;;  %v3992_v16 = vor.u32 %v3991_v2, %v8757_v23  ;;  %v3974_v27 = vsel %vm6830_vm4, %v8767_v43, %v8769_v17 }
 0x13d   : > { %v8772_v34 = vadd.f32 %v6129_v14, %v1163_v62  ;;  %v1155_v24 = vadd.f32 %v1154_v45, %v9793_v12  ;;  %v1592_v18 = vpop.f32.mrf.mxu0  ;;  %v5822_v62 = vrot.slane %v5806_v10, 9  ;;  %v4000_v6 = vshrl.u32 %v5752_v41, 16 }
 0x13e   : > { %v6098_v21 = vpop.f32.mrf.mxu1  ;;  %6301 = vmatmul.mubr.msk.bf16.gmra.mxu1 %vm756_vm3, %v9794_v40  ;;  %v4003_v63 = vshll.u32 %v5752_v41, 16  ;;  %v4009_v2 = vshll.u32 %v8793_v30, 16  ;;  %v4013_v10 = vshrl.u32 %v8793_v30, 16  ;;  %v5755_v40 = vld [vmem:[%s6786_s13 + $0xc0] sm:$0xf]  ;;  %v3983_v4 = vrot.slane %v3982_v32, 4 }
 0x13f   : > { %v8795_v59 = vadd.f32 %v1579_v33, %v1155_v24  ;;  %v1176_v13 = vadd.f32 %v6098_v21, %v9795_v22  ;;  %v6133_v57 = vpop.f32.mrf.mxu0  ;;  %6304 = vmatprep.mubr.msk.bf16.mxu1 %vm756_vm3, %v8647_v46  ;;  %v9797_v24 = vld [vmem:[#allocation21_spill] sm:$0xff]  ;;  %v3997_v43 = vrot.slane %v3995_v38, 5  ;;  %v4517_v17 = vrot.slane %v4515_v49, 4 }
 0x140   : > { %v1167_v45 = vpop.f32.mrf.mxu1  ;;  %v4518_v33 = vrot.slane %v8755_v1, 5  ;;  %v8823_v14 = vsel %vm7116_vm7, %v5822_v62, %v4515_v49  ;;  %v8826_v32 = vld [vmem:[%s6786_s13 + $0xc4] sm:$0xf]  ;;  %v9801_v1 = vcombine.low %v8605_v25, %v8609_v50  ;;  %v8838_v62 = vrot.slane %v4009_v2, 5 }
 0x141   : > { %v8807_v12 = vadd.f32 %v6132_v56, %v1176_v13  ;;  %v1168_v21 = vadd.f32 %v1167_v45, %v9797_v24  ;;  %v1595_v46 = vpop.f32.mrf.mxu0  ;;  %v9799_v56 = vld [vmem:[#allocation24_spill] sm:$0xff]  ;;  %v9800_v45 = vcombine.low %v8593_v47, %v8597_v7  ;;  %v3993_v24 = vrot.slane %v3992_v16, 4  ;;  %v9802_v16 = vld [vmem:[#allocation26_spill] sm:$0xff] }
 0x142   : > { %v6099_v22 = vpop.f32.mrf.mxu1  ;;  %v4024_v47 = vshrl.u32 %v5755_v40, 16  ;;  %v4027_v7 = vshll.u32 %v5755_v40, 16  ;;  %v3988_v25 = vsel %vm6830_vm4, %v3983_v4, %v8757_v23  ;;  %v8847_v50 = vsel %vm7116_vm7, %v4517_v17, %v4518_v33  ;;  %v5807_v40 = vld [vmem:[%s6786_s13 + $0xb4] sm:$0xe] }
 0x143   : > { %9796 = vst [vmem:[#allocation14_spill] sm:$0xff] %v8807_v12  ;;  %v8814_v35 = vadd.f32 %v1592_v18, %v1168_v21  ;;  %v1179_v41 = vadd.f32 %v6099_v22, %v9799_v56  ;;  %v6136_v13 = vpop.f32.mrf.mxu0  ;;  %6339 = vmatmul.mubr.msk.bf16.gmra.mxu0 %vm756_vm3, %v9800_v45  ;;  %v8833_v18 = vld [vmem:[%s6786_s13 + $0xbc] sm:$0x1]  ;;  %v4002_v21 = vrot.slane %v4000_v6, 4  ;;  %v4005_v22 = vrot.slane %v4003_v63, 5 }
 0x144   : > { %v1170_v38 = vpop.f32.mrf.mxu1  ;;  %6342 = vmatprep.mubr.msk.bf16.mxu0 %vm756_vm3, %v9801_v1  ;;  %v4037_v6 = vshrl.u32 %v8826_v32, 16  ;;  %v4019_v23 = vshll.u32 %v8833_v18, 16  ;;  %v4522_v17 = vrot.slane %v8793_v30, 5  ;;  %v9803_v1 = vld [vmem:[#allocation28_spill] sm:$0xff] }
 0x145   : > { %9798 = vst [vmem:[#allocation11_spill] sm:$0xff] %v8814_v35  ;;  %v8835_v56 = vadd.f32 %v6133_v57, %v1179_v41  ;;  %v1171_v45 = vadd.f32 %v1170_v38, %v9802_v16  ;;  %v1608_v49 = vpop.f32.mrf.mxu0  ;;  %v4015_v35 = vrot.slane %v4013_v10, 4  ;;  %v4033_v57 = vshll.u32 %v8826_v32, 16 }
 0x146   : > { %v6102_v12 = vpop.f32.mrf.mxu1  ;;  %6305 = vmatmul.mubr.msk.bf16.gmra.mxu1 %vm756_vm3, %v8649_v61  ;;  %v3998_v61 = vsel %vm6830_vm4, %v3993_v24, %v3997_v43  ;;  %v4006_v33 = vor.u32 %v4005_v22, %v4002_v21  ;;  %v4026_v41 = vrot.slane %v4024_v47, 4  ;;  %v4029_v38 = vrot.slane %v4027_v7, 5 }
 0x147   : > { %v8851_v63 = vadd.f32 %v1595_v46, %v1171_v45  ;;  %v1192_v2 = vadd.f32 %v6102_v12, %v8557_v28  ;;  %v6137_v10 = vpop.f32.mrf.mxu0  ;;  %6308 = vmatprep.mubr.msk.bf16.mxu1 %vm756_vm3, %v8655_v60  ;;  %v9804_v60 = vsel %vm6830_vm4, %v8745_v51, %v8709_v52  ;;  %v4016_v24 = vor.u32 %v4015_v35, %v8838_v62 }
 0x148   : > { %v1183_v4 = vpop.f32.mrf.mxu1  ;;  %v8869_v43 = vcombine.low %v9804_v60, %v3974_v27  ;;  %v8872_v30 = vcombine.low %v3988_v25, %v3998_v61  ;;  %v8876_v22 = vrot.slane %v4033_v57, 5  ;;  %v4039_v47 = vrot.slane %v4037_v6, 4  ;;  %v5757_v27 = vld [vmem:[%s6786_s13 + $0xc8] sm:$0x1] }
 0x149   : > { %v8861_v46 = vadd.f32 %v6136_v13, %v1192_v2  ;;  %v1184_v28 = vadd.f32 %v1183_v4, %v9803_v1  ;;  %v1611_v12 = vpop.f32.mrf.mxu0  ;;  %v5839_v13 = vcombine.low %v8823_v14, %v8847_v50  ;;  %v9805_v52 = vcombine.low %v8675_v3, %v8697_v20  ;;  %v5758_v14 = vld [vmem:[%s6786_s13 + $0xcc] sm:$0xf]  ;;  %v8897_v20 = vld [vmem:[%s6786_s13 + $0xd0] sm:$0xf]  ;;  %v5808_v4 = vld [vmem:[%s6786_s13 + $0xc0] sm:$0xe] }
 0x14a   : > { %v6103_v21 = vpop.f32.mrf.mxu1  ;;  %v8885_v35 = vrot.slane %v4019_v23, 5  ;;  %v5823_v51 = vrot.slane %v5807_v40, 9  ;;  %v9806_v50 = vcombine.low %v8707_v53, %v8737_v39  ;;  %v4525_v57 = vrot.slane %v8833_v18, 5 }
 0x14b   : > { %v8878_v7 = vadd.f32 %v1608_v49, %v1184_v28  ;;  %v1195_v16 = vadd.f32 %v6103_v21, %v8580_v19  ;;  %v6140_v45 = vpop.f32.mrf.mxu0  ;;  %6343 = vmatmul.mubr.msk.bf16.gmra.mxu0 %vm756_vm3, %v9805_v52  ;;  %v8893_v49 = vrot.slane %v4006_v33, 4  ;;  %v4524_v19 = vrot.slane %v4522_v17, 4 }
 0x14c   : > { %v1186_v25 = vpop.f32.mrf.mxu1  ;;  %6346 = vmatprep.mubr.msk.bf16.mxu0 %vm756_vm3, %v9806_v50  ;;  %v4030_v3 = vor.u32 %v4029_v38, %v4026_v41  ;;  %v8902_v23 = vrot.slane %v4016_v24, 4  ;;  %v4529_v53 = vrot.slane %v8826_v32, 5  ;;  %v4040_v33 = vor.u32 %v4039_v47, %v8876_v22 }
 0x14d   : > { %v8899_v6 = vadd.f32 %v6137_v10, %v1195_v16  ;;  %v1187_v2 = vadd.f32 %v1186_v25, %v8612_v26  ;;  %v1624_v61 = vpop.f32.mrf.mxu0  ;;  %v4043_v18 = vshll.u32 %v5757_v27, 16  ;;  %v4048_v40 = vshrl.u32 %v5758_v14, 16  ;;  %v9809_v10 = vld [vmem:[#allocation7_spill] sm:$0xff]  ;;  %v9810_v16 = vld [vmem:[#allocation6_spill] sm:$0xff] }
 0x14e   : > { %v6106_v39 = vpop.f32.mrf.mxu1  ;;  %6309 = vmatmul.mubr.msk.bf16.gmra.mxu1 %vm756_vm3, %v8684_v48  ;;  %v4051_v41 = vshll.u32 %v5758_v14, 16  ;;  %v4057_v28 = vshll.u32 %v8897_v20, 16  ;;  %v4061_v32 = vshrl.u32 %v8897_v20, 16  ;;  %v4523_v48 = vsel %vm7116_vm7, %v5823_v51, %v4522_v17  ;;  %v9811_v17 = vld [vmem:[#allocation9_spill] sm:$0xff] }
 0x14f   : > { %9807 = vst [vmem:[#allocation19_spill] sm:$0xff] %v8899_v6  ;;  %v8909_v38 = vadd.f32 %v1611_v12, %v1187_v2  ;;  %v1208_v1 = vadd.f32 %v6106_v39, %v9809_v10  ;;  %v6141_v26 = vpop.f32.mrf.mxu0  ;;  %6312 = vmatprep.mubr.msk.bf16.mxu1 %vm756_vm3, %v8763_v15  ;;  %v4526_v24 = vsel %vm7116_vm7, %v4524_v19, %v4525_v57  ;;  %v4031_v21 = vrot.slane %v4030_v3, 4 }
 0x150   : > { %v1199_v60 = vpop.f32.mrf.mxu1  ;;  %v5824_v12 = vrot.slane %v5808_v4, 9  ;;  %v4531_v25 = vrot.slane %v4529_v53, 4  ;;  %v4532_v15 = vrot.slane %v5757_v27, 5  ;;  %v4041_v2 = vrot.slane %v4040_v33, 4  ;;  %v5760_v33 = vld [vmem:[%s6786_s13 + $0xd4] sm:$0x1] }
 0x151   : > { %9808 = vst [vmem:[#allocation15_spill] sm:$0xff] %v8909_v38  ;;  %v8920_v47 = vadd.f32 %v6140_v45, %v1208_v1  ;;  %v1200_v52 = vadd.f32 %v1199_v60, %v9810_v16  ;;  %v1627_v14 = vpop.f32.mrf.mxu0  ;;  %v4045_v39 = vrot.slane %v4043_v18, 5  ;;  %v4050_v10 = vrot.slane %v4048_v40, 4  ;;  %v9813_v18 = vld [vmem:[#allocation8_spill] sm:$0xff] }
 0x152   : > { %v6107_v50 = vpop.f32.mrf.mxu1  ;;  %v4053_v38 = vrot.slane %v4051_v41, 5  ;;  %v9812_v45 = vcombine.low %v8777_v58, %v8781_v36  ;;  %v8930_v57 = vrot.slane %v4057_v28, 5  ;;  %v4063_v27 = vrot.slane %v4061_v32, 4 }
 0x153   : > { %v8923_v6 = vadd.f32 %v1624_v61, %v1200_v52  ;;  %v1211_v51 = vadd.f32 %v6107_v50, %v9811_v17  ;;  %v6144_v19 = vpop.f32.mrf.mxu0  ;;  %v4012_v61 = vsel %vm6830_vm4, %v8893_v49, %v8838_v62  ;;  %v4022_v4 = vsel %vm6830_vm4, %v8902_v23, %v8885_v35  ;;  %v5809_v62 = vld [vmem:[%s6786_s13 + $0xcc] sm:$0xe] }
 0x154   : > { %6347 = vmatmul.mubr.msk.bf16.gmra.mxu0 %vm756_vm3, %v9812_v45  ;;  %v1202_v3 = vpop.f32.mrf.mxu1  ;;  %v4536_v58 = vrot.slane %v8897_v20, 5  ;;  %v4533_v1 = vsel %vm7116_vm7, %v4531_v25, %v4532_v15  ;;  %v5840_v35 = vcombine.low %v4523_v48, %v4526_v24  ;;  %v4036_v20 = vsel %vm6830_vm4, %v4031_v21, %v8876_v22  ;;  %v9815_v25 = vld [vmem:[#allocation13_spill] sm:$0xff] }
 0x155   : > { %6350 = vmatprep.mubr.msk.bf16.mxu0 %vm756_vm3, %v5839_v13  ;;  %v8943_v36 = vadd.f32 %v6141_v26, %v1211_v51  ;;  %v1203_v40 = vadd.f32 %v1202_v3, %v9813_v18  ;;  %v1640_v41 = vpop.f32.mrf.mxu0  ;;  %v4530_v13 = vsel %vm7116_vm7, %v5824_v12, %v4529_v53  ;;  %v4046_v23 = vsel %vm6830_vm4, %v4041_v2, %v4045_v39  ;;  %v9814_v53 = vld [vmem:[#allocation10_spill] sm:$0xff] }
 0x156   : > { %v6110_v49 = vpop.f32.mrf.mxu1  ;;  %6313 = vmatmul.mubr.msk.bf16.gmra.mxu1 %vm756_vm3, %v8869_v43  ;;  %v4054_v26 = vor.u32 %v4053_v38, %v4050_v10  ;;  %v4064_v12 = vor.u32 %v4063_v27, %v8930_v57  ;;  %v4067_v43 = vshll.u32 %v5760_v33, 16  ;;  %v5841_v24 = vcombine.low %v4530_v13, %v4533_v1 }
 0x157   : > { %v8958_v28 = vadd.f32 %v1627_v14, %v1203_v40  ;;  %v1224_v32 = vadd.f32 %v6110_v49, %v9814_v53  ;;  %v6145_v60 = vpop.f32.mrf.mxu0  ;;  %6316 = vmatprep.mubr.msk.bf16.mxu1 %vm756_vm3, %v8872_v30  ;;  %v5825_v16 = vrot.slane %v5809_v62, 9  ;;  %v4538_v52 = vrot.slane %v4536_v58, 4  ;;  %v9816_v30 = vld [vmem:[#allocation16_spill] sm:$0xff] }
 0x158   : > { %v1215_v48 = vpop.f32.mrf.mxu1  ;;  %v4539_v22 = vrot.slane %v5760_v33, 5  ;;  %v5775_v50 = vcombine.low %v4012_v61, %v4022_v4  ;;  %v5776_v2 = vcombine.low %v4036_v20, %v4046_v23  ;;  %v4055_v39 = vrot.slane %v4054_v26, 4  ;;  %v9817_v33 = vld [vmem:[#allocation18_spill] sm:$0xff]  ;;  %v9818_v62 = vld [vmem:[#allocation20_spill] sm:$0xff]  ;;  %v9819_v26 = vld [vmem:[#allocation23_spill] sm:$0xff] }
 0x159   : > { %v8964_v21 = vadd.f32 %v6144_v19, %v1224_v32  ;;  %v1216_v38 = vadd.f32 %v1215_v48, %v9815_v25  ;;  %v1643_v14 = vpop.f32.mrf.mxu0  ;;  %v4065_v45 = vrot.slane %v4064_v12, 4  ;;  %v4069_v27 = vrot.slane %v4067_v43, 5  ;;  %v9820_v43 = vld [vmem:[#allocation25_spill] sm:$0xff] }
 0x15a   : > { %v6111_v15 = vpop.f32.mrf.mxu1  ;;  %v4537_v19 = vsel %vm7116_vm7, %v5825_v16, %v4536_v58  ;;  %v4540_v61 = vsel %vm7116_vm7, %v4538_v52, %v4539_v22  ;;  %v4060_v13 = vsel %vm6830_vm4, %v4055_v39, %v8930_v57 }
 0x15b   : > { %v8967_v10 = vadd.f32 %v1640_v41, %v1216_v38  ;;  %v1227_v17 = vadd.f32 %v6111_v15, %v9816_v30  ;;  %v6148_v51 = vpop.f32.mrf.mxu0  ;;  %v4070_v0 = vsel %vm6830_vm4, %v4065_v45, %v4069_v27 }
 0x15c   : > { %6351 = vmatmul.mubr.msk.bf16.gmra.mxu0 %vm756_vm3, %v5840_v35  ;;  %v1218_v3 = vpop.f32.mrf.mxu1  ;;  %v5842_v35 = vcombine.low %v4537_v19, %v4540_v61  ;;  %v5777_v12 = vcombine.low %v4060_v13, %v4070_v0 }
 0x15d   : > { %6354 = vmatprep.mubr.msk.bf16.mxu0 %vm756_vm3, %v5841_v24  ;;  %v8976_v4 = vadd.f32 %v6145_v60, %v1227_v17  ;;  %v1219_v18 = vadd.f32 %v1218_v3, %v9817_v33  ;;  %v1656_v40 = vpop.f32.mrf.mxu0 }
 0x15e   : > { %v6114_v41 = vpop.f32.mrf.mxu1  ;;  %6317 = vmatmul.mubr.msk.bf16.gmra.mxu1 %vm756_vm3, %v5775_v50 }
 0x15f   : > { %v8983_v1 = vadd.f32 %v1643_v14, %v1219_v18  ;;  %v1240_v49 = vadd.f32 %v6114_v41, %v9818_v62  ;;  %v6149_v58 = vpop.f32.mrf.mxu0  ;;  %6320 = vmatprep.mubr.msk.bf16.mxu1 %vm756_vm3, %v5776_v2 }
 0x160   : > { %v1231_v20 = vpop.f32.mrf.mxu1 }
 0x161   : > { %v8989_v23 = vadd.f32 %v6148_v51, %v1240_v49  ;;  %v1232_v53 = vadd.f32 %v1231_v20, %v9819_v26  ;;  %v1659_v32 = vpop.f32.mrf.mxu0 }
 0x162   : > { %v6115_v60 = vpop.f32.mrf.mxu1 }
 0x163   : > { %v8992_v57 = vadd.f32 %v1656_v40, %v1232_v53  ;;  %v1243_v48 = vadd.f32 %v6115_v60, %v9820_v43  ;;  %v6152_v24 = vpop.f32.mrf.mxu0 }
 0x164   : > { %6355 = vmatmul.mubr.msk.bf16.gmra.mxu0 %vm756_vm3, %v5842_v35  ;;  %v1234_v16 = vpop.f32.mrf.mxu1 }
 0x165   : > { %v8996_v52 = vadd.f32 %v6149_v58, %v1243_v48  ;;  %v1235_v22 = vadd.f32 %v1234_v16, %v9821_v31  ;;  %v1672_v25 = vpop.f32.mrf.mxu0 }
 0x166   : > { %v6118_v38 = vpop.f32.mrf.mxu1  ;;  %6321 = vmatmul.mubr.msk.bf16.gmra.mxu1 %vm756_vm3, %v5777_v12 }
 0x167   : > { %v9000_v14 = vadd.f32 %v1659_v32, %v1235_v22  ;;  %v1256_v15 = vadd.f32 %v6118_v38, %v8572_v42  ;;  %v6153_v50 = vpop.f32.mrf.mxu0 }
 0x168   : > { %v1247_v2 = vpop.f32.mrf.mxu1 }
 0x169   : > { %v9003_v39 = vadd.f32 %v6152_v24, %v1256_v15  ;;  %v1248_v30 = vadd.f32 %v1247_v2, %v8599_v44  ;;  %v1675_v17 = vpop.f32.mrf.mxu0 }
 0x16a   : > { %v6119_v51 = vpop.f32.mrf.mxu1 }
 0x16b   : > { %v9006_v45 = vadd.f32 %v1672_v25, %v1248_v30  ;;  %v1259_v27 = vadd.f32 %v6119_v51, %v8614_v8  ;;  %v6192_v3 = vpop.f32.mrf.mxu0  ;;  %v9822_v30 = vld [vmem:[#allocation14_spill] sm:$0xff] }
 0x16c   : > { %v1250_v19 = vpop.f32.mrf.mxu1 }
 0x16d   : > { %v9009_v61 = vadd.f32 %v6153_v50, %v1259_v27  ;;  %v1251_v33 = vadd.f32 %v1250_v19, %v8636_v55  ;;  %v2648_v18 = vpop.f32.mrf.mxu0 }
 0x16e   : > { %v6158_v42 = vpop.f32.mrf.mxu1 }
 0x16f   : > { %v9012_v40 = vadd.f32 %v1675_v17, %v1251_v33  ;;  %v2051_v41 = vadd.f32 %v6158_v42, %v8681_v5  ;;  %v6193_v13 = vpop.f32.mrf.mxu0 }
 0x170   : > { %v1922_v44 = vpop.f32.mrf.mxu1 }
 0x171   : > { %v9015_v62 = vadd.f32 %v6192_v3, %v2051_v41  ;;  %v2049_v49 = vadd.f32 %v1922_v44, %v8688_v37  ;;  %v2651_v58 = vpop.f32.mrf.mxu0  ;;  %v9823_v3 = vld [vmem:[#allocation11_spill] sm:$0xff] }
 0x172   : > { %v6159_v8 = vpop.f32.mrf.mxu1 }
 0x173   : > { %v9018_v0 = vadd.f32 %v2648_v18, %v2049_v49  ;;  %v2052_v35 = vadd.f32 %v6159_v8, %v8714_v54  ;;  %v6196_v20 = vpop.f32.mrf.mxu0 }
 0x174   : > { %v1925_v55 = vpop.f32.mrf.mxu1 }
 0x175   : > { %v9021_v26 = vadd.f32 %v6193_v13, %v2052_v35  ;;  %v2050_v53 = vadd.f32 %v1925_v55, %v8728_v11  ;;  %v2664_v32 = vpop.f32.mrf.mxu0 }
 0x176   : > { %v6162_v5 = vpop.f32.mrf.mxu1 }
 0x177   : > { %v9024_v60 = vadd.f32 %v2651_v58, %v2050_v53  ;;  %v2055_v12 = vadd.f32 %v6162_v5, %v8740_v29  ;;  %v6197_v43 = vpop.f32.mrf.mxu0 }
 0x178   : > { %v1938_v37 = vpop.f32.mrf.mxu1 }
 0x179   : > { %v9027_v48 = vadd.f32 %v6196_v20, %v2055_v12  ;;  %v2053_v24 = vadd.f32 %v1938_v37, %v8747_v9  ;;  %v2667_v16 = vpop.f32.mrf.mxu0 }
 0x17a   : > { %v6163_v54 = vpop.f32.mrf.mxu1 }
 0x17b   : > { %v9030_v31 = vadd.f32 %v2664_v32, %v2053_v24  ;;  %v2056_v22 = vadd.f32 %v6163_v54, %v8772_v34  ;;  %v6200_v25 = vpop.f32.mrf.mxu0  ;;  %v9828_v54 = vld [vmem:[#allocation15_spill] sm:$0xff] }
 0x17c   : > { %v1941_v11 = vpop.f32.mrf.mxu1 }
 0x17d   : > { %v9033_v38 = vadd.f32 %v6197_v43, %v2056_v22  ;;  %v2054_v15 = vadd.f32 %v1941_v11, %v8795_v59  ;;  %v2680_v50 = vpop.f32.mrf.mxu0  ;;  %v9826_v43 = vld [vmem:[#allocation19_spill] sm:$0xff] }
 0x17e   : > { %v6166_v29 = vpop.f32.mrf.mxu1 }
 0x17f   : > { %v9036_v2 = vadd.f32 %v2667_v16, %v2054_v15  ;;  %v2059_v17 = vadd.f32 %v6166_v29, %v9822_v30  ;;  %v6201_v51 = vpop.f32.mrf.mxu0 }
 0x180   : > { %v1954_v9 = vpop.f32.mrf.mxu1 }
 0x181   : > { %v9039_v27 = vadd.f32 %v6200_v25, %v2059_v17  ;;  %v2057_v19 = vadd.f32 %v1954_v9, %v9823_v3  ;;  %v2683_v33 = vpop.f32.mrf.mxu0 }
 0x182   : > { %v6167_v34 = vpop.f32.mrf.mxu1 }
 0x183   : > { %v9042_v18 = vadd.f32 %v2680_v50, %v2057_v19  ;;  %v2060_v42 = vadd.f32 %v6167_v34, %v8835_v56  ;;  %v6204_v41 = vpop.f32.mrf.mxu0 }
 0x184   : > { %v1957_v59 = vpop.f32.mrf.mxu1 }
 0x185   : > { %v9045_v13 = vadd.f32 %v6201_v51, %v2060_v42  ;;  %v2058_v44 = vadd.f32 %v1957_v59, %v8851_v63  ;;  %v2696_v49 = vpop.f32.mrf.mxu0 }
 0x186   : > { %v6170_v58 = vpop.f32.mrf.mxu1 }
 0x187   : > { %v9048_v8 = vadd.f32 %v2683_v33, %v2058_v44  ;;  %v2063_v35 = vadd.f32 %v6170_v58, %v8861_v46  ;;  %v6205_v20 = vpop.f32.mrf.mxu0 }
 0x188   : > { %v1970_v55 = vpop.f32.mrf.mxu1 }
 0x189   : > { %v9051_v53 = vadd.f32 %v6204_v41, %v2063_v35  ;;  %v2061_v32 = vadd.f32 %v1970_v55, %v8878_v7  ;;  %v2699_v5 = vpop.f32.mrf.mxu0 }
 0x18a   : > { %v6171_v56 = vpop.f32.mrf.mxu1 }
 0x18b   : > { %9824 = vst [vmem:[#allocation5_spill] sm:$0xff] %v9051_v53  ;;  %v9054_v12 = vadd.f32 %v2696_v49, %v2061_v32  ;;  %v2064_v37 = vadd.f32 %v6171_v56, %v9826_v43  ;;  %v6208_v24 = vpop.f32.mrf.mxu0 }
 0x18c   : > { %v1973_v63 = vpop.f32.mrf.mxu1 }
 0x18d   : > { %9825 = vst [vmem:[#allocation17_spill] sm:$0xff] %v9054_v12  ;;  %v9057_v16 = vadd.f32 %v6205_v20, %v2064_v37  ;;  %v2062_v22 = vadd.f32 %v1973_v63, %v9828_v54  ;;  %v2712_v25 = vpop.f32.mrf.mxu0 }
 0x18e   : > { %v6174_v46 = vpop.f32.mrf.mxu1 }
 0x18f   : > { %9827 = vst [vmem:[#allocation22_spill] sm:$0xff] %v9057_v16  ;;  %v9060_v11 = vadd.f32 %v2699_v5, %v2062_v22  ;;  %v2067_v15 = vadd.f32 %v6174_v46, %v8920_v47  ;;  %v6209_v50 = vpop.f32.mrf.mxu0 }
 0x190   : > { %v1986_v7 = vpop.f32.mrf.mxu1 }
 0x191   : > { %9829 = vst [vmem:[#allocation12_spill] sm:$0xff] %v9060_v11  ;;  %v9063_v29 = vadd.f32 %v6208_v24, %v2067_v15  ;;  %v2065_v30 = vadd.f32 %v1986_v7, %v8923_v6  ;;  %v2715_v17 = vpop.f32.mrf.mxu0 }
 0x192   : > { %v6175_v51 = vpop.f32.mrf.mxu1 }
 0x193   : > { %9830 = vst [vmem:[#allocation21_spill] sm:$0xff] %v9063_v29  ;;  %v9066_v9 = vadd.f32 %v2712_v25, %v2065_v30  ;;  %v2068_v3 = vadd.f32 %v6175_v51, %v8943_v36  ;;  %v6212_v19 = vpop.f32.mrf.mxu0 }
 0x194   : > { %v1989_v33 = vpop.f32.mrf.mxu1 }
 0x195   : > { %9831 = vst [vmem:[#allocation24_spill] sm:$0xff] %v9066_v9  ;;  %v9069_v34 = vadd.f32 %v6209_v50, %v2068_v3  ;;  %v2066_v42 = vadd.f32 %v1989_v33, %v8958_v28  ;;  %v2728_v41 = vpop.f32.mrf.mxu0 }
 0x196   : > { %v6178_v47 = vpop.f32.mrf.mxu1 }
 0x197   : > { %9832 = vst [vmem:[#allocation26_spill] sm:$0xff] %v9069_v34  ;;  %v9072_v59 = vadd.f32 %v2715_v17, %v2066_v42  ;;  %v2071_v44 = vadd.f32 %v6178_v47, %v8964_v21  ;;  %v6213_v49 = vpop.f32.mrf.mxu0 }
 0x198   : > { %v2002_v6 = vpop.f32.mrf.mxu1 }
 0x199   : > { %9833 = vst [vmem:[#allocation28_spill] sm:$0xff] %v9072_v59  ;;  %v9075_v58 = vadd.f32 %v6212_v19, %v2071_v44  ;;  %v2069_v35 = vadd.f32 %v2002_v6, %v8967_v10  ;;  %v2731_v20 = vpop.f32.mrf.mxu0 }
 0x19a   : > { %v6179_v36 = vpop.f32.mrf.mxu1 }
 0x19b   : > { %9834 = vst [vmem:[#allocation7_spill] sm:$0xff] %v9075_v58  ;;  %v9078_v55 = vadd.f32 %v2728_v41, %v2069_v35  ;;  %v2072_v32 = vadd.f32 %v6179_v36, %v8976_v4  ;;  %v6216_v5 = vpop.f32.mrf.mxu0 }
 0x19c   : > { %v2005_v28 = vpop.f32.mrf.mxu1 }
 0x19d   : > { %v9081_v56 = vadd.f32 %v6213_v49, %v2072_v32  ;;  %v2070_v43 = vadd.f32 %v2005_v28, %v8983_v1  ;;  %v2744_v37 = vpop.f32.mrf.mxu0 }
 0x19e   : > { %v6182_v21 = vpop.f32.mrf.mxu1 }
 0x19f   : > { %v9084_v24 = vadd.f32 %v2731_v20, %v2070_v43  ;;  %v2075_v63 = vadd.f32 %v6182_v21, %v8989_v23  ;;  %v6217_v54 = vpop.f32.mrf.mxu0 }
 0x1a0   : > { %v2018_v10 = vpop.f32.mrf.mxu1 }
 0x1a1   : > { %v9087_v22 = vadd.f32 %v6216_v5, %v2075_v63  ;;  %v2073_v25 = vadd.f32 %v2018_v10, %v8992_v57  ;;  %v2747_v46 = vpop.f32.mrf.mxu0 }
 0x1a2   : > { %v6183_v4 = vpop.f32.mrf.mxu1 }
 0x1a3   : > { %v9090_v15 = vadd.f32 %v2744_v37, %v2073_v25  ;;  %v2076_v50 = vadd.f32 %v6183_v4, %v8996_v52  ;;  %v6220_v7 = vpop.f32.mrf.mxu0 }
 0x1a4   : > { %v2021_v1 = vpop.f32.mrf.mxu1 }
 0x1a5   : > { %v9093_v30 = vadd.f32 %v6217_v54, %v2076_v50  ;;  %v2074_v17 = vadd.f32 %v2021_v1, %v9000_v14  ;;  %v2760_v51 = vpop.f32.mrf.mxu0 }
 0x1a6   : > { %v6186_v23 = vpop.f32.mrf.mxu1 }
 0x1a7   : > { %v9096_v3 = vadd.f32 %v2747_v46, %v2074_v17  ;;  %v2079_v19 = vadd.f32 %v6186_v23, %v9003_v39  ;;  %v6221_v33 = vpop.f32.mrf.mxu0 }
 0x1a8   : > { %v2034_v57 = vpop.f32.mrf.mxu1 }
 0x1a9   : > { %v9099_v42 = vadd.f32 %v6220_v7, %v2079_v19  ;;  %v2077_v41 = vadd.f32 %v2034_v57, %v9006_v45  ;;  %v2763_v47 = vpop.f32.mrf.mxu0 }
 0x1aa   : > { %v6187_v52 = vpop.f32.mrf.mxu1 }
 0x1ab   : > { %v9102_v44 = vadd.f32 %v2760_v51, %v2077_v41  ;;  %v2080_v49 = vadd.f32 %v6187_v52, %v9009_v61  ;;  %v9105_v6 = vpop.f32.mrf.mxu0 }
 0x1ac   : > { %v2037_v14 = vpop.f32.mrf.mxu1 }
 0x1ad   : > { %v9107_v35 = vadd.f32 %v6221_v33, %v2080_v49  ;;  %v2078_v20 = vadd.f32 %v2037_v14, %v9012_v40  ;;  %v9110_v39 = vpop.f32.mrf.mxu0 }
 0x1ae   : > { %v9112_v36 = vpop.f32.mrf.mxu1 }
 0x1af   : > { %v9114_v32 = vadd.f32 %v2763_v47, %v2078_v20  ;;  %v9116_v45 = vpop.f32.mrf.mxu0 }
 0x1b0   : > { %v9118_v5 = vpop.f32.mrf.mxu1 }
 0x1b1   : > { %v9120_v28 = vpop.f32.mrf.mxu0 }
 0x1b2   : > { %v9122_v61 = vpop.f32.mrf.mxu1 }
 0x1b3   : > { %v9124_v43 = vpop.f32.mrf.mxu0 }
 0x1b4   : > { %v9126_v37 = vpop.f32.mrf.mxu1 }
 0x1b5   : > { %v9128_v21 = vpop.f32.mrf.mxu0 }
 0x1b6   : > { %v9130_v40 = vpop.f32.mrf.mxu1 }
 0x1b7   : > { %v9132_v63 = vpop.f32.mrf.mxu0 }
 0x1b8   : > { %v9134_v54 = vpop.f32.mrf.mxu1 }
 0x1b9   : > { %v9136_v10 = vpop.f32.mrf.mxu0 }
 0x1ba   : > { %v9138_v25 = vpop.f32.mrf.mxu1 }
 0x1bb   : > { %v9140_v46 = vpop.f32.mrf.mxu0 }
 0x1bc   : > { %v9142_v4 = vpop.f32.mrf.mxu1 }
 0x1bd   : > { %v9144_v50 = vpop.f32.mrf.mxu0 }
 0x1be   : > { %v9146_v7 = vpop.f32.mrf.mxu1 }
 0x1bf   : > { %v9148_v1 = vpop.f32.mrf.mxu0 }
 0x1c0   : > { %v9150_v17 = vpop.f32.mrf.mxu1 }
 0x1c1   : > { %v9152_v51 = vpop.f32.mrf.mxu0 }
 0x1c2   : > { %v9154_v23 = vpop.f32.mrf.mxu1 }
 0x1c3   : > { %v9156_v19 = vpop.f32.mrf.mxu0 }
 0x1c4   : > { %9835 = vst [vmem:[#allocation6_spill] sm:$0xff] %v9156_v19  ;;  %v9158_v33 = vpop.f32.mrf.mxu1 }
 0x1c5   : > { %v9160_v57 = vpop.f32.mrf.mxu0 }
 0x1c6   : > { %9836 = vst [vmem:[#allocation9_spill] sm:$0xff] %v9160_v57  ;;  %v9162_v41 = vpop.f32.mrf.mxu1 }
 0x1c7   : > { %9837 = vst [vmem:[#allocation8_spill] sm:$0xff] %v9162_v41  ;;  %v9164_v47 = vpop.f32.mrf.mxu0 }
 0x1c8   : > { %9838 = vst [vmem:[#allocation10_spill] sm:$0xff] %v9164_v47  ;;  %v9166_v52 = vpop.f32.mrf.mxu1 }
 0x1c9   : > { %9839 = vst [vmem:[#allocation13_spill] sm:$0xff] %v9166_v52  ;;  %v9168_v49 = vpop.f32.mrf.mxu0 }
 0x1ca   : > { %9840 = vst [vmem:[#allocation16_spill] sm:$0xff] %v9168_v49  ;;  %v9170_v14 = vpop.f32.mrf.mxu1 }
 0x1cb   : > { %9841 = vst [vmem:[#allocation18_spill] sm:$0xff] %v9170_v14  ;;  %v9172_v20 = vpop.f32.mrf.mxu0 }
 0x1cc   : > { %9842 = vst [vmem:[#allocation20_spill] sm:$0xff] %v9172_v20  ;;  %v9174_v58 = vpop.f32.mrf.mxu1 }
 0x1cd   : > { %9843 = vst [vmem:[#allocation23_spill] sm:$0xff] %v9174_v58  ;;  %v9176_v59 = vpop.f32.mrf.mxu0 }
 0x1ce   : > { %9844 = vst [vmem:[#allocation25_spill] sm:$0xff] %v9176_v59  ;;  %v9178_v34 = vpop.f32.mrf.mxu1 }
 0x1cf   : > { %9845 = vst [vmem:[#allocation27_spill] sm:$0xff] %v9178_v34  ;;  %v9180_v9 = vpop.f32.mrf.mxu0 }
 0x1d0   : > { %9846 = vst [vmem:[#allocation14_spill] sm:$0xff] %v9180_v9  ;;  %v9182_v29 = vpop.f32.mrf.mxu1 }
 0x1d1   : > { %9847 = vst [vmem:[#allocation11_spill] sm:$0xff] %v9182_v29  ;;  %v9184_v57 = vpop.f32.mrf.mxu0 }
 0x1d2   : > { %9848 = vst [vmem:[#allocation19_spill] sm:$0xff] %v9184_v57  ;;  %v9186_v47 = vpop.f32.mrf.mxu1 }
 0x1d3   : > { %9849 = vst [vmem:[#allocation15_spill] sm:$0xff] %v9186_v47  ;;  %v9188_v19 = vpop.f32.mrf.mxu0 }
 0x1d4   : > { %9850 = vst [vmem:[#allocation29_spill] sm:$0xff] %v9188_v19  ;;  %v9190_v49 = vpop.f32.mrf.mxu1 }
 0x1d5   : > { %9851 = vst [vmem:[#allocation30_spill] sm:$0xff] %v9190_v49  ;;  %v3560_v11 = vpop.f32.mrf.mxu0 }
 0x1d6   : > { %v9192_v20 = vpop.f32.mrf.mxu1 }
 0x1d7   : > { %9852 = vst [vmem:[#allocation31_spill] sm:$0xff] %v9192_v20  ;;  %v6281_v58 = vpop.f32.mrf.mxu0 }
 0x1d8   : > { %v3198_v14 = vpop.f32.mrf.mxu1 }
 0x1d9   : > { %v3265_v59 = vadd.f32 %v3198_v14, %v9078_v55  ;;  %v3563_v34 = vpop.f32.mrf.mxu0 }
 0x1da   : > { %v6247_v16 = vpop.f32.mrf.mxu1 }
 0x1db   : > { %v9195_v9 = vadd.f32 %v3560_v11, %v3265_v59  ;;  %v3268_v29 = vadd.f32 %v6247_v16, %v9081_v56  ;;  %v6284_v57 = vpop.f32.mrf.mxu0 }
 0x1dc   : > { %v3201_v52 = vpop.f32.mrf.mxu1 }
 0x1dd   : > { %v9198_v47 = vadd.f32 %v6281_v58, %v3268_v29  ;;  %v3266_v19 = vadd.f32 %v3201_v52, %v9084_v24  ;;  %v3576_v49 = vpop.f32.mrf.mxu0 }
 0x1de   : > { %v6250_v12 = vpop.f32.mrf.mxu1 }
 0x1df   : > { %v9201_v41 = vadd.f32 %v3563_v34, %v3266_v19  ;;  %v3271_v20 = vadd.f32 %v6250_v12, %v9087_v22  ;;  %v6285_v53 = vpop.f32.mrf.mxu0 }
 0x1e0   : > { %v3214_v55 = vpop.f32.mrf.mxu1 }
 0x1e1   : > { %v9204_v14 = vadd.f32 %v6284_v57, %v3271_v20  ;;  %v3269_v11 = vadd.f32 %v3214_v55, %v9090_v15  ;;  %v3579_v59 = vpop.f32.mrf.mxu0 }
 0x1e2   : > { %v6251_v16 = vpop.f32.mrf.mxu1 }
 0x1e3   : > { %v9207_v56 = vadd.f32 %v3576_v49, %v3269_v11  ;;  %v3272_v29 = vadd.f32 %v6251_v16, %v9093_v30  ;;  %v6288_v58 = vpop.f32.mrf.mxu0  ;;  %v3247_v49 = vadd.f32 %v9112_v36, %v9015_v62  ;;  %v3248_v62 = vadd.f32 %v9122_v61, %v9021_v26 }
 0x1e4   : > { %v3217_v24 = vpop.f32.mrf.mxu1  ;;  %v3249_v26 = vadd.f32 %v9134_v54, %v9030_v31  ;;  %v3255_v31 = vadd.f32 %v9146_v7, %v9039_v27  ;;  %v9260_v54 = vld [vmem:[%s9632_s3] ss:$0 sm:$0xff] }
 0x1e5   : > { %v9210_v52 = vadd.f32 %v6285_v53, %v3272_v29  ;;  %v3270_v34 = vadd.f32 %v3217_v24, %v9096_v3  ;;  %v3592_v19 = vpop.f32.mrf.mxu0  ;;  %v3245_v3 = vadd.f32 %v9118_v5, %v9018_v0  ;;  %v3609_v24 = vadd.f32 %v9105_v6, %v3247_v49 }
 0x1e6   : > { %v6254_v12 = vpop.f32.mrf.mxu1  ;;  %v3246_v0 = vadd.f32 %v9126_v37, %v9024_v60  ;;  %v3251_v6 = vadd.f32 %v9130_v40, %v9027_v48  ;;  %v3610_v60 = vadd.f32 %v9116_v45, %v3248_v62  ;;  %v3250_v48 = vadd.f32 %v9142_v4, %v9036_v2 }
 0x1e7   : > { %v9213_v22 = vadd.f32 %v3579_v59, %v3270_v34  ;;  %v3275_v57 = vadd.f32 %v6254_v12, %v9099_v42  ;;  %v6289_v20 = vpop.f32.mrf.mxu0  ;;  %v3607_v12 = vadd.f32 %v9110_v39, %v3245_v3  ;;  %v9246_v39 = vld [vmem:[%s9631_s2] ss:$0 sm:$0xff]  ;;  %v3256_v40 = vadd.f32 %v9154_v23, %v9045_v13 }
 0x1e8   : > { %v3230_v15 = vpop.f32.mrf.mxu1  ;;  %v3613_v27 = vadd.f32 %v9124_v43, %v3251_v6  ;;  %v3254_v13 = vadd.f32 %v9158_v33, %v9048_v8  ;;  %v3612_v3 = vadd.f32 %v9136_v10, %v3250_v48  ;;  %v3617_v43 = vadd.f32 %v9140_v46, %v3255_v31  ;;  %v9853_v10 = vld [vmem:[#allocation5_spill] sm:$0xff]  ;;  %v9854_v46 = vld [vmem:[#allocation8_spill] sm:$0xff] }
 0x1e9   : > { %v9218_v55 = vadd.f32 %v6288_v58, %v3275_v57  ;;  %v3273_v30 = vadd.f32 %v3230_v15, %v9102_v44  ;;  %v3595_v11 = vpop.f32.mrf.mxu0 }
 0x1ea   : > { %v6255_v53 = vpop.f32.mrf.mxu1  ;;  %v9285_v62 = vadd.f32 %v9152_v51, %v3254_v13  ;;  %v9858_v51 = vld [vmem:[#allocation18_spill] sm:$0xff] }
 0x1eb   : > { %v9223_v16 = vadd.f32 %v3592_v19, %v3273_v30  ;;  %v3276_v59 = vadd.f32 %v6255_v53, %v9107_v35  ;;  %v6328_v29 = vpop.f32.mrf.mxu0 }
 0x1ec   : > { %v3233_v42 = vpop.f32.mrf.mxu1 }
 0x1ed   : > { %v9229_v36 = vadd.f32 %v6289_v20, %v3276_v59  ;;  %v3274_v44 = vadd.f32 %v3233_v42, %v9114_v32  ;;  %v4676_v58 = vpop.f32.mrf.mxu0  ;;  %v3252_v32 = vadd.f32 %v9138_v25, %v9033_v38  ;;  %v3253_v38 = vadd.f32 %v9150_v17, %v9042_v18 }
 0x1ee   : > { %v6294_v34 = vpop.f32.mrf.mxu1  ;;  %v3608_v25 = vadd.f32 %v9120_v28, %v3246_v0  ;;  %v3611_v18 = vadd.f32 %v9128_v21, %v3249_v26  ;;  %v9857_v26 = vld [vmem:[#allocation22_spill] sm:$0xff] }
 0x1ef   : > { %v9235_v5 = vadd.f32 %v3595_v11, %v3274_v44  ;;  %v4335_v35 = vadd.f32 %v6294_v34, %v3609_v24  ;;  %v6329_v19 = vpop.f32.mrf.mxu0  ;;  %v3614_v7 = vadd.f32 %v9132_v63, %v3252_v32  ;;  %v3615_v21 = vadd.f32 %v9144_v50, %v3253_v38  ;;  %v9855_v50 = vld [vmem:[#allocation17_spill] sm:$0xff] }
 0x1f0   : > { %v4206_v61 = vpop.f32.mrf.mxu1  ;;  %v9277_v63 = vadd.f32 %v9148_v1, %v3256_v40  ;;  %v3259_v44 = vadd.f32 %v9854_v46, %v9853_v10  ;;  %v3260_v32 = vadd.f32 %v9858_v51, %v9857_v26 }
 0x1f1   : > { %v4805_v37 = vadd.f32 %v6328_v29, %v4335_v35  ;;  %v4333_v57 = vadd.f32 %v4206_v61, %v3607_v12  ;;  %v4679_v20 = vpop.f32.mrf.mxu0  ;;  %v9859_v61 = vld [vmem:[#allocation12_spill] sm:$0xff] }
 0x1f2   : > { %v6295_v45 = vpop.f32.mrf.mxu1 }
 0x1f3   : > { %v4844_v15 = vmul.f32 %v9246_v39, %v4805_v37  ;;  %v4803_v2 = vadd.f32 %v4676_v58, %v4333_v57  ;;  %v4336_v4 = vadd.f32 %v6295_v45, %v3610_v60  ;;  %v6332_v49 = vpop.f32.mrf.mxu0  ;;  %v9856_v58 = vld [vmem:[#allocation13_spill] sm:$0xff]  ;;  %v9860_v60 = vld [vmem:[#allocation23_spill] sm:$0xff] }
 0x1f4   : > { %v4209_v17 = vpop.f32.mrf.mxu1  ;;  %v3257_v1 = vadd.f32 %v9856_v58, %v9855_v50  ;;  %v3258_v37 = vadd.f32 %v9860_v60, %v9859_v61  ;;  %v9866_v50 = vld [vmem:[#allocation27_spill] sm:$0xff]  ;;  %v9869_v60 = vld [vmem:[#allocation26_spill] sm:$0xff] }
 0x1f5   : > { %v9270_v23 = vadd.f32 %v9260_v54, %v4844_v15  ;;  %v4842_v28 = vmul.f32 %v9246_v39, %v4803_v2  ;;  %v4806_v30 = vadd.f32 %v6329_v19, %v4336_v4  ;;  %v4334_v11 = vadd.f32 %v4209_v17, %v3608_v25  ;;  %v4692_v53 = vpop.f32.mrf.mxu0  ;;  %v9861_v25 = vld [vmem:[#allocation6_spill] sm:$0xff]  ;;  %v9862_v2 = vld [vmem:[#allocation9_spill] sm:$0xff] }
 0x1f6   : > { %v6298_v59 = vpop.f32.mrf.mxu1  ;;  %v9305_v15 = vadd.f32 %v9861_v25, %v3259_v44  ;;  %v9308_v4 = vadd.f32 %v9862_v2, %v3257_v1  ;;  %v9867_v1 = vld [vmem:[#allocation24_spill] sm:$0xff] }
 0x1f7   : > { %v5863_v8 = vmul.f32 -1.442695, %v9270_v23  ;;  %v9281_v33 = vadd.f32 %v9260_v54, %v4842_v28  ;;  %v4845_v29 = vmul.f32 %v9246_v39, %v4806_v30  ;;  %v4804_v42 = vadd.f32 %v4679_v20, %v4334_v11  ;;  %v6333_v24 = vpop.f32.mrf.mxu0  ;;  %v9863_v11 = vld [vmem:[#allocation10_spill] sm:$0xff] }
 0x1f8   : > { %v4339_v34 = vadd.f32 %v6298_v59, %v3613_v27  ;;  %v4222_v12 = vpop.f32.mrf.mxu1  ;;  %v9313_v59 = vadd.f32 %v9863_v11, %v3260_v32 }
 0x1f9   : > { %6476 = vpow2.f32 %v5863_v8  ;;  %v5861_v0 = vmul.f32 -1.442695, %v9281_v33  ;;  %v9293_v35 = vadd.f32 %v9260_v54, %v4845_v29  ;;  %v4843_v19 = vmul.f32 %v9246_v39, %v4804_v42  ;;  %v4695_v6 = vpop.f32.mrf.mxu0 }
 0x1fa   : > { %v4809_v57 = vadd.f32 %v6332_v49, %v4339_v34  ;;  %v4337_v20 = vadd.f32 %v4222_v12, %v3611_v18  ;;  %v6299_v48 = vpop.f32.mrf.mxu1  ;;  %v9868_v34 = vld [vmem:[#allocation11_spill] sm:$0xff] }
 0x1fb   : > { %6478 = vpow2.f32 %v5861_v0  ;;  %v5864_v31 = vmul.f32 -1.442695, %v9293_v35  ;;  %v9302_v38 = vadd.f32 %v9260_v54, %v4843_v19  ;;  %v4340_v40 = vadd.f32 %v6299_v48, %v3614_v7  ;;  %v6336_v45 = vpop.f32.mrf.mxu0  ;;  %v9864_v7 = vld [vmem:[#allocation16_spill] sm:$0xff]  ;;  %v9872_v48 = vld [vmem:[#allocation30_spill] sm:$0xff] }
 0x1fc   : > { %v4848_v27 = vmul.f32 %v9246_v39, %v4809_v57  ;;  %v4807_v13 = vadd.f32 %v4692_v53, %v4337_v20  ;;  %v4225_v49 = vpop.f32.mrf.mxu1  ;;  %v9316_v8 = vadd.f32 %v9864_v7, %v3258_v37  ;;  %v3261_v12 = vadd.f32 %v9868_v34, %v9867_v1  ;;  %v9870_v37 = vld [vmem:[#allocation15_spill] sm:$0xff]  ;;  %v9871_v20 = vld [vmem:[#allocation28_spill] sm:$0xff] }
 0x1fd   : > { %6480 = vpow2.f32 %v5864_v31  ;;  %v5862_v18 = vmul.f32 -1.442695, %v9302_v38  ;;  %v4810_v17 = vadd.f32 %v6333_v24, %v4340_v40  ;;  %v4338_v28 = vadd.f32 %v4225_v49, %v3612_v3  ;;  %v4708_v30 = vpop.f32.mrf.mxu0  ;;  %v9865_v3 = vld [vmem:[#allocation21_spill] sm:$0xff]  ;;  %v9873_v49 = vld [vmem:[#allocation20_spill] sm:$0xff] }
 0x1fe   : > { %v9319_v29 = vadd.f32 %v9260_v54, %v4848_v27  ;;  %v4846_v42 = vmul.f32 %v9246_v39, %v4807_v13  ;;  %v6302_v10 = vpop.f32.mrf.mxu1  ;;  %v3263_v58 = vadd.f32 %v9866_v50, %v9865_v3  ;;  %v3264_v57 = vadd.f32 %v9870_v37, %v9869_v60  ;;  %v9876_v50 = vld [vmem:[#allocation19_spill] sm:$0xff] }
 0x1ff   : > { %6482 = vpow2.f32 %v5862_v18  ;;  %v4849_v53 = vmul.f32 %v9246_v39, %v4810_v17  ;;  %v4808_v46 = vadd.f32 %v4695_v6, %v4338_v28  ;;  %v4343_v44 = vadd.f32 %v6302_v10, %v3617_v43  ;;  %v6337_v24 = vpop.f32.mrf.mxu0  ;;  %v9874_v17 = vld [vmem:[#allocation25_spill] sm:$0xff]  ;;  %v9878_v60 = vld [vmem:[#allocation31_spill] sm:$0xff] }
 0x200   : > { %v5867_v0 = vmul.f32 -1.442695, %v9319_v29  ;;  %v9329_v19 = vadd.f32 %v9260_v54, %v4846_v42  ;;  %v4238_v26 = vpop.f32.mrf.mxu1  ;;  %v3262_v31 = vadd.f32 %v9872_v48, %v9871_v20  ;;  %v9346_v18 = vadd.f32 %v9873_v49, %v3263_v58 }
 0x201   : > { %v9332_v51 = vadd.f32 %v9260_v54, %v4849_v53  ;;  %v4847_v32 = vmul.f32 %v9246_v39, %v4808_v46  ;;  %v4813_v6 = vadd.f32 %v6336_v45, %v4343_v44  ;;  %v4341_v43 = vadd.f32 %v4238_v26, %v3615_v21  ;;  %v4711_v61 = vpop.f32.mrf.mxu0  ;;  %v9875_v44 = vld [vmem:[#allocation14_spill] sm:$0xff] }
 0x202   : > { %6484 = vpow2.f32 %v5867_v0  ;;  %v5865_v40 = vmul.f32 -1.442695, %v9329_v19  ;;  %v6303_v25 = vpop.f32.mrf.mxu1  ;;  %v9349_v28 = vadd.f32 %v9874_v17, %v3261_v12  ;;  %v9358_v3 = vadd.f32 %v9875_v44, %v3264_v57 }
 0x203   : > { %v5868_v2 = vmul.f32 -1.442695, %v9332_v51  ;;  %v9342_v27 = vadd.f32 %v9260_v54, %v4847_v32  ;;  %v4852_v13 = vmul.f32 %v9246_v39, %v4813_v6  ;;  %v4811_v45 = vadd.f32 %v4708_v30, %v4341_v43  ;;  %v6340_v21 = vpop.f32.mrf.mxu0  ;;  %v9877_v43 = vld [vmem:[#allocation7_spill] sm:$0xff] }
 0x204   : > { %6486 = vpow2.f32 %v5865_v40  ;;  %v4344_v11 = vadd.f32 %v6303_v25, %v9277_v63  ;;  %v4241_v7 = vpop.f32.mrf.mxu1  ;;  %v9361_v58 = vadd.f32 %v9876_v50, %v3262_v31  ;;  %v3267_v37 = vadd.f32 %v9878_v60, %v9877_v43 }
 0x205   : > { %6488 = vpow2.f32 %v5868_v2  ;;  %v5866_v42 = vmul.f32 -1.442695, %v9342_v27  ;;  %v9354_v10 = vadd.f32 %v9260_v54, %v4852_v13  ;;  %v4850_v53 = vmul.f32 %v9246_v39, %v4811_v45  ;;  %v4724_v30 = vpop.f32.mrf.mxu0 }
 0x206   : > { %v6477_v46 = vpop.eup %6476  ;;  %v4814_v1 = vadd.f32 %v6337_v24, %v4344_v11  ;;  %v4342_v63 = vadd.f32 %v4241_v7, %v9285_v62  ;;  %v6306_v34 = vpop.f32.mrf.mxu1 }
 0x207   : > { %v5011_v12 = vadd.f32 1.0, %v6477_v46  ;;  %6490 = vpow2.f32 %v5866_v42  ;;  %v5871_v0 = vmul.f32 -1.442695, %v9354_v10  ;;  %v9366_v26 = vadd.f32 %v9260_v54, %v4850_v53  ;;  %v6341_v32 = vpop.f32.mrf.mxu0 }
 0x208   : > { %v6479_v6 = vpop.eup %6478  ;;  %v4853_v57 = vmul.f32 %v9246_v39, %v4814_v1  ;;  %v4812_v20 = vadd.f32 %v4711_v61, %v4342_v63  ;;  %v4347_v24 = vadd.f32 %v6306_v34, %v9305_v15  ;;  %v4254_v48 = vpop.f32.mrf.mxu1 }
 0x209   : > { %6492 = vrcp.f32 %v5011_v12  ;;  %v5009_v62 = vadd.f32 1.0, %v6479_v6  ;;  %v5869_v31 = vmul.f32 -1.442695, %v9366_v26  ;;  %v4345_v40 = vadd.f32 %v4254_v48, %v9308_v4  ;;  %v4727_v25 = vpop.f32.mrf.mxu0 }
 0x20a   : > { %v6481_v2 = vpop.eup %6480  ;;  %6494 = vpow2.f32 %v5871_v0  ;;  %v9375_v13 = vadd.f32 %v9260_v54, %v4853_v57  ;;  %v4851_v45 = vmul.f32 %v9246_v39, %v4812_v20  ;;  %v4817_v49 = vadd.f32 %v6340_v21, %v4347_v24  ;;  %v6307_v17 = vpop.f32.mrf.mxu1 }
 0x20b   : > { %6496 = vrcp.f32 %v5009_v62  ;;  %v5012_v61 = vadd.f32 1.0, %v6481_v2  ;;  %v4815_v15 = vadd.f32 %v4724_v30, %v4345_v40  ;;  %v4348_v11 = vadd.f32 %v6307_v17, %v9313_v59  ;;  %v6344_v7 = vpop.f32.mrf.mxu0  ;;  %v9879_v62 = vld [vmem:[#allocation29_spill] sm:$0xff] }
 0x20c   : > { %v6483_v42 = vpop.eup %6482  ;;  %6498 = vpow2.f32 %v5869_v31  ;;  %v5872_v4 = vmul.f32 -1.442695, %v9375_v13  ;;  %v9381_v53 = vadd.f32 %v9260_v54, %v4851_v45  ;;  %v4856_v46 = vmul.f32 %v9246_v39, %v4817_v49  ;;  %v4257_v44 = vpop.f32.mrf.mxu1 }
 0x20d   : > { %6500 = vrcp.f32 %v5012_v61  ;;  %v5010_v21 = vadd.f32 1.0, %v6483_v42  ;;  %v4854_v50 = vmul.f32 %v9246_v39, %v4815_v15  ;;  %v4818_v1 = vadd.f32 %v6341_v32, %v4348_v11  ;;  %v4740_v30 = vpop.f32.mrf.mxu0 }
 0x20e   : > { %6502 = vpow2.f32 %v5872_v4  ;;  %v5870_v59 = vmul.f32 -1.442695, %v9381_v53  ;;  %v9387_v63 = vadd.f32 %v9260_v54, %v4856_v46  ;;  %v4346_v34 = vadd.f32 %v4257_v44, %v9316_v8  ;;  %v6310_v12 = vpop.f32.mrf.mxu1 }
 0x20f   : > { %v6485_v0 = vpop.eup %6484  ;;  %6504 = vrcp.f32 %v5010_v21  ;;  %v9391_v6 = vadd.f32 %v9260_v54, %v4854_v50  ;;  %v4857_v43 = vmul.f32 %v9246_v39, %v4818_v1  ;;  %v4351_v60 = vadd.f32 %v6310_v12, %v9346_v18  ;;  %v6345_v32 = vpop.f32.mrf.mxu0 }
 0x210   : > { %v5015_v57 = vadd.f32 1.0, %v6485_v0  ;;  %6506 = vpow2.f32 %v5870_v59  ;;  %v5875_v20 = vmul.f32 -1.442695, %v9387_v63  ;;  %v4816_v24 = vadd.f32 %v4727_v25, %v4346_v34  ;;  %v4270_v48 = vpop.f32.mrf.mxu1 }
 0x211   : > { %v6487_v8 = vpop.eup %6486  ;;  %v3629_v31 = vadd.f32 %v9879_v62, %v3267_v37  ;;  %v9399_v40 = vadd.f32 %v9260_v54, %v4857_v43  ;;  %v4821_v2 = vadd.f32 %v6344_v7, %v4351_v60  ;;  %v4349_v45 = vadd.f32 %v4270_v48, %v9349_v28  ;;  %v4743_v49 = vpop.f32.mrf.mxu0 }
 0x212   : > { %v6489_v18 = vpop.eup %6488  ;;  %6508 = vrcp.f32 %v5015_v57  ;;  %v5013_v17 = vadd.f32 1.0, %v6487_v8  ;;  %v5873_v61 = vmul.f32 -1.442695, %v9391_v6  ;;  %v4855_v15 = vmul.f32 %v9246_v39, %v4816_v24  ;;  %v6311_v11 = vpop.f32.mrf.mxu1 }
 0x213   : > { %v5016_v25 = vadd.f32 1.0, %v6489_v18  ;;  %6510 = vpow2.f32 %v5875_v20  ;;  %v5876_v37 = vmul.f32 -1.442695, %v9399_v40  ;;  %v4860_v7 = vmul.f32 %v9246_v39, %v4821_v2 }
 0x214   : > { %v6348_v42 = vpop.f32.mrf.mxu0  ;;  %v6491_v28 = vpop.eup %6490  ;;  %6512 = vrcp.f32 %v5013_v17  ;;  %v9411_v4 = vadd.f32 %v9260_v54, %v4855_v15  ;;  %v4819_v46 = vadd.f32 %v4740_v30, %v4349_v45  ;;  %v4352_v44 = vadd.f32 %v6311_v11, %v9358_v3 }
 0x215   : > { %v4273_v21 = vpop.f32.mrf.mxu1  ;;  %6514 = vrcp.f32 %v5016_v25  ;;  %v5014_v50 = vadd.f32 1.0, %v6491_v28  ;;  %v9415_v1 = vadd.f32 %v9260_v54, %v4860_v7 }
 0x216   : > { %v4350_v59 = vadd.f32 %v4273_v21, %v9361_v58  ;;  %v4756_v34 = vpop.f32.mrf.mxu0  ;;  %v6493_v12 = vpop.eup %6492  ;;  %6516 = vpow2.f32 %v5873_v61  ;;  %v5874_v0 = vmul.f32 -1.442695, %v9411_v4  ;;  %v4858_v43 = vmul.f32 %v9246_v39, %v4819_v46 }
 0x217   : > { %v4822_v60 = vadd.f32 %v6345_v32, %v4352_v44  ;;  %v6314_v30 = vpop.f32.mrf.mxu1  ;;  %v6495_v57 = vpop.eup %6494  ;;  %v5107_v3 = vmul.f32 %v6493_v12, %v9270_v23  ;;  %6518 = vrcp.f32 %v5014_v50  ;;  %v5879_v20 = vmul.f32 -1.442695, %v9415_v1 }
 0x218   : > { %v4820_v24 = vadd.f32 %v4743_v49, %v4350_v59  ;;  %v6349_v48 = vpop.f32.mrf.mxu0  ;;  %v6497_v8 = vpop.eup %6496  ;;  %v5019_v58 = vadd.f32 1.0, %v6495_v57  ;;  %6520 = vpow2.f32 %v5876_v37  ;;  %v9423_v62 = vadd.f32 %v9260_v54, %v4858_v43 }
 0x219   : > { %v4861_v2 = vmul.f32 %v9246_v39, %v4822_v60  ;;  %v4286_v45 = vpop.f32.mrf.mxu1  ;;  %v6499_v18 = vpop.eup %6498  ;;  %5139 = vst [vmem:[%s9427_s22 + $0x10] sm:$0xff] %v5107_v3  ;;  %v5105_v23 = vmul.f32 %v6497_v8, %v9281_v33  ;;  %6522 = vpow2.f32 %v5874_v0  ;;  %v4355_v49 = vadd.f32 %v6314_v30, %v3629_v31 }
 0x21a   : > { %v4859_v32 = vmul.f32 %v9246_v39, %v4820_v24  ;;  %v4759_v17 = vpop.f32.mrf.mxu0  ;;  %v6501_v61 = vpop.eup %6500  ;;  %6524 = vrcp.f32 %v5019_v58  ;;  %v5017_v15 = vadd.f32 1.0, %v6499_v18  ;;  %v5877_v11 = vmul.f32 -1.442695, %v9423_v62 }
 0x21b   : > { %v9434_v25 = vadd.f32 %v9260_v54, %v4861_v2  ;;  %v6315_v37 = vpop.f32.mrf.mxu1  ;;  %v6503_v7 = vpop.eup %6502  ;;  %5137 = vst [vmem:[%s9427_s22] sm:$0xff] %v5105_v23  ;;  %v5108_v28 = vmul.f32 %v6501_v61, %v9293_v35  ;;  %6526 = vpow2.f32 %v5879_v20  ;;  %v4825_v31 = vadd.f32 %v6348_v42, %v4355_v49 }
 0x21c   : > { %v9439_v33 = vadd.f32 %v9260_v54, %v4859_v32  ;;  %v6352_v46 = vpop.f32.mrf.mxu0  ;;  %v6505_v44 = vpop.eup %6504  ;;  %6528 = vrcp.f32 %v5017_v15  ;;  %v5020_v21 = vadd.f32 1.0, %v6503_v7  ;;  %v4353_v59 = vadd.f32 %v4286_v45, %v9195_v9 }
 0x21d   : > { %v5880_v50 = vmul.f32 -1.442695, %v9434_v25  ;;  %v4289_v12 = vpop.f32.mrf.mxu1  ;;  %v6507_v0 = vpop.eup %6506  ;;  %5140 = vst [vmem:[%s9427_s22 + $0x18] sm:$0xff] %v5108_v28  ;;  %v5106_v43 = vmul.f32 %v6505_v44, %v9302_v38  ;;  %6530 = vpow2.f32 %v5877_v11  ;;  %v4864_v60 = vmul.f32 %v9246_v39, %v4825_v31 }
 0x21e   : > { %v5878_v35 = vmul.f32 -1.442695, %v9439_v33  ;;  %v4772_v42 = vpop.f32.mrf.mxu0  ;;  %6532 = vrcp.f32 %v5020_v21  ;;  %v5018_v30 = vadd.f32 1.0, %v6507_v0  ;;  %v4823_v57 = vadd.f32 %v4756_v34, %v4353_v59 }
 0x21f   : > { %v4356_v3 = vadd.f32 %v6315_v37, %v9198_v47  ;;  %v6318_v20 = vpop.f32.mrf.mxu1  ;;  %v6509_v24 = vpop.eup %6508  ;;  %5138 = vst [vmem:[%s9427_s22 + $0x8] sm:$0xff] %v5106_v43  ;;  %6534 = vpow2.f32 %v5880_v50  ;;  %v9450_v9 = vadd.f32 %v9260_v54, %v4864_v60  ;;  %v4354_v38 = vadd.f32 %v4289_v12, %v9201_v41 }
 0x220   : > { %v4359_v8 = vadd.f32 %v6318_v20, %v9204_v14  ;;  %v6353_v58 = vpop.f32.mrf.mxu0  ;;  %v6511_v2 = vpop.eup %6510  ;;  %v5111_v45 = vmul.f32 %v6509_v24, %v9319_v29  ;;  %6536 = vrcp.f32 %v5018_v30  ;;  %v4862_v34 = vmul.f32 %v9246_v39, %v4823_v57 }
 0x221   : > { %v4826_v47 = vadd.f32 %v6349_v48, %v4356_v3  ;;  %v4302_v18 = vpop.f32.mrf.mxu1  ;;  %v6513_v23 = vpop.eup %6512  ;;  %v5023_v32 = vadd.f32 1.0, %v6511_v2  ;;  %6538 = vpow2.f32 %v5878_v35  ;;  %v5883_v49 = vmul.f32 -1.442695, %v9450_v9 }
 0x222   : > { %v4824_v61 = vadd.f32 %v4759_v17, %v4354_v38  ;;  %v6515_v15 = vpop.eup %6514  ;;  %5143 = vst [vmem:[%s9427_s22 + $0x30] sm:$0xff] %v5111_v45  ;;  %v5109_v41 = vmul.f32 %v6513_v23, %v9329_v19  ;;  %v9460_v14 = vadd.f32 %v9260_v54, %v4862_v34  ;;  %v4829_v11 = vadd.f32 %v6352_v46, %v4359_v8  ;;  %v4775_v37 = vpop.f32.mrf.mxu0 }
 0x223   : > { %v4865_v29 = vmul.f32 %v9246_v39, %v4826_v47  ;;  %v6319_v48 = vpop.f32.mrf.mxu1  ;;  %v6517_v7 = vpop.eup %6516  ;;  %v5112_v28 = vmul.f32 %v6515_v15, %v9332_v51  ;;  %6540 = vrcp.f32 %v5023_v32  ;;  %v4357_v17 = vadd.f32 %v4302_v18, %v9207_v56 }
 0x224   : > { %v4863_v31 = vmul.f32 %v9246_v39, %v4824_v61  ;;  %v6519_v44 = vpop.eup %6518  ;;  %5141 = vst [vmem:[%s9427_s22 + $0x20] sm:$0xff] %v5109_v41  ;;  %v5021_v19 = vadd.f32 1.0, %v6517_v7  ;;  %6542 = vpow2.f32 %v5883_v49  ;;  %v5881_v21 = vmul.f32 -1.442695, %v9460_v14  ;;  %v6356_v3 = vpop.f32.mrf.mxu0 }
 0x225   : > { %v9469_v50 = vadd.f32 %v9260_v54, %v4865_v29  ;;  %v4305_v46 = vpop.f32.mrf.mxu1  ;;  %v6521_v59 = vpop.eup %6520  ;;  %5144 = vst [vmem:[%s9427_s22 + $0x38] sm:$0xff] %v5112_v28  ;;  %v5110_v51 = vmul.f32 %v6519_v44, %v9342_v27  ;;  %v4868_v56 = vmul.f32 %v9246_v39, %v4829_v11  ;;  %v4827_v0 = vadd.f32 %v4772_v42, %v4357_v17 }
 0x226   : > { %v9474_v12 = vadd.f32 %v9260_v54, %v4863_v31  ;;  %v6523_v43 = vpop.eup %6522  ;;  %6544 = vrcp.f32 %v5021_v19  ;;  %v5024_v35 = vadd.f32 1.0, %v6521_v59  ;;  %v4360_v30 = vadd.f32 %v6319_v48, %v9210_v52 }
 0x227   : > { %v5884_v60 = vmul.f32 -1.442695, %v9469_v50  ;;  %v6322_v57 = vpop.f32.mrf.mxu1  ;;  %v6525_v20 = vpop.eup %6524  ;;  %5142 = vst [vmem:[%s9427_s22 + $0x28] sm:$0xff] %v5110_v51  ;;  %v5022_v24 = vadd.f32 1.0, %v6523_v43  ;;  %6546 = vpow2.f32 %v5881_v21  ;;  %v9482_v38 = vadd.f32 %v9260_v54, %v4868_v56 }
 0x228   : > { %v5882_v27 = vmul.f32 -1.442695, %v9474_v12  ;;  %v6527_v42 = vpop.eup %6526  ;;  %v5115_v8 = vmul.f32 %v6525_v20, %v9354_v10  ;;  %6548 = vrcp.f32 %v5024_v35  ;;  %v4866_v2 = vmul.f32 %v9246_v39, %v4827_v0 }
 0x229   : > { %v4830_v45 = vadd.f32 %v6353_v58, %v4360_v30  ;;  %v4318_v52 = vpop.f32.mrf.mxu1  ;;  %v6529_v34 = vpop.eup %6528  ;;  %6550 = vrcp.f32 %v5022_v24  ;;  %v5027_v47 = vadd.f32 1.0, %v6527_v42  ;;  %v5887_v18 = vmul.f32 -1.442695, %v9482_v38 }
 0x22a   : > { %v4358_v23 = vadd.f32 %v4305_v46, %v9213_v22  ;;  %v6531_v32 = vpop.eup %6530  ;;  %5147 = vst [vmem:[%s9427_s22 + $0x50] sm:$0xff] %v5115_v8  ;;  %v5113_v49 = vmul.f32 %v6529_v34, %v9366_v26  ;;  %6552 = vpow2.f32 %v5884_v60  ;;  %v9491_v10 = vadd.f32 %v9260_v54, %v4866_v2  ;;  %v4788_v58 = vpop.f32.mrf.mxu0 }
 0x22b   : > { %v4869_v61 = vmul.f32 %v9246_v39, %v4830_v45  ;;  %v6323_v15 = vpop.f32.mrf.mxu1  ;;  %v6533_v41 = vpop.eup %6532  ;;  %6554 = vrcp.f32 %v5027_v47  ;;  %v5025_v29 = vadd.f32 1.0, %v6531_v32  ;;  %v4363_v48 = vadd.f32 %v6322_v57, %v9218_v55 }
 0x22c   : > { %v4828_v11 = vadd.f32 %v4775_v37, %v4358_v23  ;;  %v6535_v22 = vpop.eup %6534  ;;  %5145 = vst [vmem:[%s9427_s22 + $0x40] sm:$0xff] %v5113_v49  ;;  %v5116_v7 = vmul.f32 %v6533_v41, %v9375_v13  ;;  %6556 = vpow2.f32 %v5882_v27  ;;  %v5885_v26 = vmul.f32 -1.442695, %v9491_v10  ;;  %v6357_v59 = vpop.f32.mrf.mxu0 }
 0x22d   : > { %v9499_v28 = vadd.f32 %v9260_v54, %v4869_v61  ;;  %v6537_v31 = vpop.eup %6536  ;;  %6558 = vrcp.f32 %v5025_v29  ;;  %v5028_v17 = vadd.f32 1.0, %v6535_v22  ;;  %v4833_v19 = vadd.f32 %v6356_v3, %v4363_v48  ;;  %v4321_v37 = vpop.f32.mrf.mxu1 }
 0x22e   : > { %v4867_v44 = vmul.f32 %v9246_v39, %v4828_v11  ;;  %v6539_v21 = vpop.eup %6538  ;;  %5148 = vst [vmem:[%s9427_s22 + $0x58] sm:$0xff] %v5116_v7  ;;  %v5114_v55 = vmul.f32 %v6537_v31, %v9381_v53  ;;  %6560 = vpow2.f32 %v5887_v18  ;;  %v4361_v46 = vadd.f32 %v4318_v52, %v9223_v16  ;;  %v4791_v42 = vpop.f32.mrf.mxu0 }
 0x22f   : > { %v5888_v13 = vmul.f32 -1.442695, %v9499_v28  ;;  %6562 = vrcp.f32 %v5028_v17  ;;  %v5026_v51 = vadd.f32 1.0, %v6539_v21  ;;  %v4872_v0 = vmul.f32 %v9246_v39, %v4833_v19 }
 0x230   : > { %v9507_v56 = vadd.f32 %v9260_v54, %v4867_v44  ;;  %v6541_v43 = vpop.eup %6540  ;;  %5146 = vst [vmem:[%s9427_s22 + $0x48] sm:$0xff] %v5114_v55  ;;  %6564 = vpow2.f32 %v5885_v26  ;;  %v4831_v35 = vadd.f32 %v4788_v58, %v4361_v46  ;;  %v4364_v53 = vadd.f32 %v6323_v15, %v9229_v36 }
 0x231   : > { %v4362_v60 = vadd.f32 %v4321_v37, %v9235_v5  ;;  %v6543_v30 = vpop.eup %6542  ;;  %v5119_v16 = vmul.f32 %v6541_v43, %v9387_v63  ;;  %6566 = vrcp.f32 %v5026_v51  ;;  %v9516_v3 = vadd.f32 %v9260_v54, %v4872_v0 }
 0x232   : > { %v5886_v57 = vmul.f32 -1.442695, %v9507_v56  ;;  %v5031_v20 = vadd.f32 1.0, %v6543_v30  ;;  %6568 = vpow2.f32 %v5888_v13  ;;  %v4870_v24 = vmul.f32 %v9246_v39, %v4831_v35 }
 0x233   : > { %v4834_v27 = vadd.f32 %v6357_v59, %v4364_v53  ;;  %v6545_v8 = vpop.eup %6544  ;;  %5151 = vst [vmem:[%s9427_s22 + $0x70] sm:$0xff] %v5119_v16  ;;  %v5891_v36 = vmul.f32 -1.442695, %v9516_v3  ;;  %v4832_v5 = vadd.f32 %v4791_v42, %v4362_v60 }
 0x234   : > { %6570 = vpow2.f32 %v5886_v57  ;;  %v6547_v63 = vpop.eup %6546  ;;  %v5117_v2 = vmul.f32 %v6545_v8, %v9391_v6  ;;  %v9523_v45 = vadd.f32 %v9260_v54, %v4870_v24 }
 0x235   : > { %6572 = vrcp.f32 %v5031_v20  ;;  %v4873_v52 = vmul.f32 %v9246_v39, %v4834_v27  ;;  %v6549_v34 = vpop.eup %6548  ;;  %v5029_v47 = vadd.f32 1.0, %v6547_v63  ;;  %v4871_v18 = vmul.f32 %v9246_v39, %v4832_v5 }
 0x236   : > { %6574 = vpow2.f32 %v5891_v36  ;;  %v6551_v23 = vpop.eup %6550  ;;  %5149 = vst [vmem:[%s9427_s22 + $0x60] sm:$0xff] %v5117_v2  ;;  %v5120_v32 = vmul.f32 %v6549_v34, %v9399_v40  ;;  %v5889_v49 = vmul.f32 -1.442695, %v9523_v45 }
 0x237   : > { %v9531_v6 = vadd.f32 %v9260_v54, %v4873_v52  ;;  %v6553_v61 = vpop.eup %6552  ;;  %v5118_v58 = vmul.f32 %v6551_v23, %v9411_v4  ;;  %6576 = vrcp.f32 %v5029_v47  ;;  %v9535_v15 = vadd.f32 %v9260_v54, %v4871_v18 }
 0x238   : > { %v6555_v41 = vpop.eup %6554  ;;  %5152 = vst [vmem:[%s9427_s22 + $0x78] sm:$0xff] %v5120_v32  ;;  %v5032_v39 = vadd.f32 1.0, %v6553_v61  ;;  %6578 = vpow2.f32 %v5889_v49 }
 0x239   : > { %v5892_v29 = vmul.f32 -1.442695, %v9531_v6  ;;  %v6557_v40 = vpop.eup %6556  ;;  %5150 = vst [vmem:[%s9427_s22 + $0x68] sm:$0xff] %v5118_v58  ;;  %v5123_v11 = vmul.f32 %v6555_v41, %v9415_v1  ;;  %v5890_v48 = vmul.f32 -1.442695, %v9535_v15 }
 0x23a   : > { %v6559_v22 = vpop.eup %6558  ;;  %6580 = vrcp.f32 %v5032_v39  ;;  %v5030_v4 = vadd.f32 1.0, %v6557_v40 }
 0x23b   : > { %v6561_v7 = vpop.eup %6560  ;;  %5155 = vst [vmem:[%s9427_s22 + $0x90] sm:$0xff] %v5123_v11  ;;  %v5121_v54 = vmul.f32 %v6559_v22, %v9423_v62  ;;  %6582 = vpow2.f32 %v5892_v29 }
 0x23c   : > { %v6563_v26 = vpop.eup %6562  ;;  %6584 = vrcp.f32 %v5030_v4  ;;  %v5035_v31 = vadd.f32 1.0, %v6561_v7 }
 0x23d   : > { %v6565_v17 = vpop.eup %6564  ;;  %5153 = vst [vmem:[%s9427_s22 + $0x80] sm:$0xff] %v5121_v54  ;;  %v5124_v44 = vmul.f32 %v6563_v26, %v9434_v25  ;;  %6586 = vpow2.f32 %v5890_v48 }
 0x23e   : > { %v6567_v1 = vpop.eup %6566  ;;  %6588 = vrcp.f32 %v5035_v31  ;;  %v5033_v19 = vadd.f32 1.0, %v6565_v17 }
 0x23f   : > { %v6569_v37 = vpop.eup %6568  ;;  %5156 = vst [vmem:[%s9427_s22 + $0x98] sm:$0xff] %v5124_v44  ;;  %v5122_v21 = vmul.f32 %v6567_v1, %v9439_v33 }
 0x240   : > { %6590 = vrcp.f32 %v5033_v19  ;;  %v5036_v62 = vadd.f32 1.0, %v6569_v37 }
 0x241   : > { %v6571_v55 = vpop.eup %6570  ;;  %5154 = vst [vmem:[%s9427_s22 + $0x88] sm:$0xff] %v5122_v21 }
 0x242   : > { %v6573_v13 = vpop.eup %6572  ;;  %v5034_v46 = vadd.f32 1.0, %v6571_v55  ;;  %6592 = vrcp.f32 %v5036_v62 }
 0x243   : > { %v6575_v59 = vpop.eup %6574  ;;  %v5127_v51 = vmul.f32 %v6573_v13, %v9450_v9 }
 0x244   : > { %6594 = vrcp.f32 %v5034_v46  ;;  %v5039_v25 = vadd.f32 1.0, %v6575_v59  ;;  %v6577_v0 = vpop.eup %6576 }
 0x245   : > { %5159 = vst [vmem:[%s9427_s22 + $0xb0] sm:$0xff] %v5127_v51  ;;  %v6579_v43 = vpop.eup %6578  ;;  %v5125_v35 = vmul.f32 %v6577_v0, %v9460_v14 }
 0x246   : > { %6596 = vrcp.f32 %v5039_v25  ;;  %v5037_v33 = vadd.f32 1.0, %v6579_v43 }
 0x247   : > { %v6581_v53 = vpop.eup %6580  ;;  %5157 = vst [vmem:[%s9427_s22 + $0xa0] sm:$0xff] %v5125_v35 }
 0x248   : > { %v6583_v60 = vpop.eup %6582  ;;  %v5128_v30 = vmul.f32 %v6581_v53, %v9469_v50  ;;  %6598 = vrcp.f32 %v5037_v33 }
 0x249   : > { %v6585_v9 = vpop.eup %6584  ;;  %v5040_v16 = vadd.f32 1.0, %v6583_v60 }
 0x24a   : > { %v6587_v57 = vpop.eup %6586  ;;  %5160 = vst [vmem:[%s9427_s22 + $0xb8] sm:$0xff] %v5128_v30  ;;  %v5126_v20 = vmul.f32 %v6585_v9, %v9474_v12 }
 0x24b   : > { %v6589_v24 = vpop.eup %6588  ;;  %6600 = vrcp.f32 %v5040_v16  ;;  %v5038_v14 = vadd.f32 1.0, %v6587_v57 }
 0x24c   : > { %5158 = vst [vmem:[%s9427_s22 + $0xa8] sm:$0xff] %v5126_v20  ;;  %v5131_v27 = vmul.f32 %v6589_v24, %v9482_v38 }
 0x24d   : > { %v6591_v42 = vpop.eup %6590  ;;  %6602 = vrcp.f32 %v5038_v14 }
 0x24e   : > { %5163 = vst [vmem:[%s9427_s22 + $0xd0] sm:$0xff] %v5131_v27  ;;  %v5129_v50 = vmul.f32 %v6591_v42, %v9491_v10 }
 0x24f   : > { %v6593_v8 = vpop.eup %6592 }
 0x250   : > { %5161 = vst [vmem:[%s9427_s22 + $0xc0] sm:$0xff] %v5129_v50  ;;  %v5132_v12 = vmul.f32 %v6593_v8, %v9499_v28 }
 0x251   : > { %v6595_v36 = vpop.eup %6594 }
 0x252   : > { %v5130_v5 = vmul.f32 %v6595_v36, %v9507_v56  ;;  %5164 = vst [vmem:[%s9427_s22 + $0xd8] sm:$0xff] %v5132_v12 }
 0x253   : > { %v6597_v63 = vpop.eup %6596 }
 0x254   : > { %5162 = vst [vmem:[%s9427_s22 + $0xc8] sm:$0xff] %v5130_v5  ;;  %v5135_v38 = vmul.f32 %v6597_v63, %v9516_v3 }
 0x255   : > { %v6599_v2 = vpop.eup %6598 }
 0x256   : > { %5167 = vst [vmem:[%s9427_s22 + $0xf0] sm:$0xff] %v5135_v38  ;;  %v5133_v10 = vmul.f32 %v6599_v2, %v9523_v45 }
 0x258   : > { %v6601_v52 = vpop.eup %6600  ;;  %5165 = vst [vmem:[%s9427_s22 + $0xe0] sm:$0xff] %v5133_v10 }
 0x259   : > { %v5136_v28 = vmul.f32 %v6601_v52, %v9531_v6 }
 0x25a   : > { %v6603_v56 = vpop.eup %6602 }
 0x25b   : > { %5168 = vst [vmem:[%s9427_s22 + $0xf8] sm:$0xff] %v5136_v28  ;;  %v5134_v3 = vmul.f32 %v6603_v56, %v9535_v15 }
 0x25d   : > { %5166 = vst [vmem:[%s9427_s22 + $0xe8] sm:$0xff] %v5134_v3 }
 0x25e   : > { %6619 = shalt.err (!%p6616_p5)
}
 0x25f   : > { %s6620_s10 = scalar_lea.hbm %s9575_s5, 4096  ;;  %s6624_s13 = scalar_lea.hbm %s9633_s4, 8192 }
 0x260   : > { %p6621_p6 = scmp.ne.s32.totalorder %s9575_s5, %s6620_s10  ;;  %p6625_p10 = scmp.lt.s32.totalorder %s9575_s5, %s9633_s4 }
 0x261   : > { %p6626_p11 = scmp.lt.s32.totalorder %s6624_s13, %s6620_s10 }
 0x262   : > { %p6622_p7 = pnand %p6621_p6, %p6752_p4 }
 0x263   : > { %p6627_p12 = por %p6626_p11, %p6625_p10 }
 0x264   : > { %p6623_p9 = pneg %p6622_p7 }
 0x266   : > { %p6628_p13 = pnand %p6627_p12, %p6623_p9 }
 0x268   : > { %6631 = shalt.err (!%p6628_p13)
}
 0x269   : > { %s6685_s22 = smov 128   ;;  %s6686_s24 = smov 8  }
 0x26a   : > { %6371 = dma.vmem_to_hbm [thread:$0]  (%p6752_p4), %s9577_s26, 4096, %s9575_s5, %s9584_s18, %s6685_s22, %s6685_s22, %s6686_s24  }
 0x26b PF: > { %p6377_p0 = scmp.ge.s32.totalorder %s6682_s20, 2  ;;  %s5202_s29 = sand.u32 1, %s6662_s15  }
 0x26c   : > { %s5203_s30 = scalar_lea.sflag [#allocation3], %s5202_s29 }
 0x26d   : > { %p6374_p1 = pnand %p6377_p0, %p6759_p8 }
 0x26f   : > { %p6375_p2 = pneg %p6374_p1 }
 0x271   : > { %6657 = dma.done.wait (%p6375_p2), %s5203_s30, 4096  }
 0x272   : > { %6659 = vsyncadd (%p6375_p2), %s5203_s30, 4294963200  ;;  %s17_s20 = sadd.s32 1, %s6682_s20   ;;  %s9880_s15 = smov %s6666_s16 }
 0x273   : > { %p14_p3 = scmp.ge.s32.totalorder %s17_s20, 4   ;;  %s9881_s16 = smov %s6670_s17 }
 0x274   : > { %s9882_s17 = smov %s6765_s28  ;;  %s9883_s18 = smov %s6678_s19 }
 0x275   : > { %s9884_s19 = smov %s9886_s23  ;;  %16 = sbr.rel (!%p14_p3) target bundleno = 4 (0x4), region = 91 }
 0x27a   :  { %5208 = vsyncpa [#allocation3], 1 }
 0x27b   :  { %5210 = vsyncpa [#allocation3 + $0x1], 1 }

</bundles_post_ra>
